<compile_context>
chip_gen: v5e
topology: v5e:2x2
jax: 0.10.0
libtpu: 0.0.40
codegen_flags: <defaults>
</compile_context>

<pallas_src>
import functools
import math

import jax
import jax.numpy as jnp
from jax.experimental import pallas as pl
from jax.experimental.pallas import tpu as pltpu


def _round_up(x, m):
    return ((x + m - 1) // m) * m


_VMEM_LIMIT = 64 * 1024 * 1024   # <= physical VMEM on v5e/v6e (128 MiB) and v7x (64 MiB)


# ----------------------- tiled matmul (+ bias, activation, residual) -----------------------

def _linear_kernel(x_ref, w_ref, b_ref, *rest, activation, has_residual):
    if has_residual:
        r_ref, o_ref, acc_ref = rest
    else:
        o_ref, acc_ref = rest

    @pl.when(pl.program_id(2) == 0)
    def _():
        acc_ref[...] = jnp.zeros_like(acc_ref)

    acc_ref[...] += jnp.dot(x_ref[...].astype(jnp.bfloat16),
                            w_ref[...].astype(jnp.bfloat16),
                            preferred_element_type=jnp.float32)

    @pl.when(pl.program_id(2) == pl.num_programs(2) - 1)
    def _():
        y = acc_ref[...] + b_ref[...].astype(jnp.float32)
        if activation == "relu":
            y = jnp.maximum(y, 0.0)
        if has_residual:
            y = y + r_ref[...].astype(jnp.float32)
        o_ref[...] = y.astype(o_ref.dtype)


def linear(x, w, b, activation=None, residual=None, *, tm=512, tn=512, tk=512,
           out_dtype=jnp.bfloat16):
    """y = act(x @ w + b) [+ residual].  x:(M,K), w:(K,N) bf16, b:(N,) f32 -> (M,N) bf16."""
    M, K = x.shape
    N = w.shape[1]
    tm = min(tm, _round_up(M, 8))
    tn = N if N <= tn else tn
    tk = K if K <= tk else tk
    Mp, Kp, Np = _round_up(M, tm), _round_up(K, tk), _round_up(N, tn)

    xp = jnp.pad(x, ((0, Mp - M), (0, Kp - K))) if (Mp, Kp) != (M, K) else x
    wp = jnp.pad(w, ((0, Kp - K), (0, Np - N))) if (Kp, Np) != (K, N) else w
    bp = (jnp.pad(b, (0, Np - N)) if Np != N else b).reshape(1, Np)

    inputs = [xp, wp, bp]
    in_specs = [pl.BlockSpec((tm, tk), lambda i, j, k: (i, k)),
                pl.BlockSpec((tk, tn), lambda i, j, k: (k, j)),
                pl.BlockSpec((1, tn), lambda i, j, k: (0, j))]
    if residual is not None:
        rp = (jnp.pad(residual, ((0, Mp - M), (0, Np - N)))
              if (Mp, Np) != (M, N) else residual)
        inputs.append(rp)
        in_specs.append(pl.BlockSpec((tm, tn), lambda i, j, k: (i, j)))

    out = pl.pallas_call(
        functools.partial(_linear_kernel, activation=activation,
                          has_residual=residual is not None),
        grid=(Mp // tm, Np // tn, Kp // tk),
        in_specs=in_specs,
        out_specs=pl.BlockSpec((tm, tn), lambda i, j, k: (i, j)),
        out_shape=jax.ShapeDtypeStruct((Mp, Np), out_dtype),
        scratch_shapes=[pltpu.VMEM((tm, tn), jnp.float32)],
        compiler_params=pltpu.CompilerParams(
            dimension_semantics=("parallel", "parallel", "arbitrary"),
            vmem_limit_bytes=_VMEM_LIMIT),
    )(*inputs)
    return out[:M, :N] if (Mp, Np) != (M, N) else out


# ------------------ fused LayerNorm + matmul (QKV projection), LN cached -------------------

def _ln_linear_kernel(x_ref, g_ref, be_ref, w_ref, b_ref, o_ref, h_sc, *, eps):
    # LN(x) is computed once per row tile (j == 0) into a bf16 VMEM scratch and reused
    # for every output-column tile j > 0.
    @pl.when(pl.program_id(1) == 0)
    def _():
        x = x_ref[...].astype(jnp.float32)
        mean = jnp.mean(x, axis=-1, keepdims=True)
        var = jnp.mean(jnp.square(x - mean), axis=-1, keepdims=True)
        h = (x - mean) * jax.lax.rsqrt(var + eps)
        h = h * g_ref[...].astype(jnp.float32) + be_ref[...].astype(jnp.float32)
        h_sc[...] = h.astype(jnp.bfloat16)

    y = jnp.dot(h_sc[...], w_ref[...].astype(jnp.bfloat16),
                preferred_element_type=jnp.float32)
    o_ref[...] = (y + b_ref[...].astype(jnp.float32)).astype(o_ref.dtype)


def ln_linear(x, g, beta, w, b, *, tm=512, tn=1024, eps=1e-5, out_dtype=jnp.bfloat16):
    """y = LN(x) @ w + b.  x:(M,D), w:(D,N).  D kept whole per block (LN needs full row)."""
    M, D = x.shape
    N = w.shape[1]
    tm = min(tm, _round_up(M, 8))
    tn = N if N <= tn else tn
    Mp, Np = _round_up(M, tm), _round_up(N, tn)
    xp = jnp.pad(x, ((0, Mp - M), (0, 0))) if Mp != M else x
    wp = jnp.pad(w, ((0, 0), (0, Np - N))) if Np != N else w
    bp = (jnp.pad(b, (0, Np - N)) if Np != N else b).reshape(1, Np)

    out = pl.pallas_call(
        functools.partial(_ln_linear_kernel, eps=eps),
        grid=(Mp // tm, Np // tn),
        in_specs=[pl.BlockSpec((tm, D), lambda i, j: (i, 0)),
                  pl.BlockSpec((1, D), lambda i, j: (0, 0)),
                  pl.BlockSpec((1, D), lambda i, j: (0, 0)),
                  pl.BlockSpec((D, tn), lambda i, j: (0, j)),
                  pl.BlockSpec((1, tn), lambda i, j: (0, j))],
        out_specs=pl.BlockSpec((tm, tn), lambda i, j: (i, j)),
        out_shape=jax.ShapeDtypeStruct((Mp, Np), out_dtype),
        scratch_shapes=[pltpu.VMEM((tm, D), jnp.bfloat16)],
        compiler_params=pltpu.CompilerParams(
            dimension_semantics=("parallel", "arbitrary"),
            vmem_limit_bytes=_VMEM_LIMIT),
    )(xp, g.reshape(1, D), beta.reshape(1, D), wp, bp)
    return out[:M, :N] if (Mp, Np) != (M, N) else out


# -------------- fused FFN block: x + W2 @ relu(W1 @ LN(x) + b1) + b2, LN cached -------------

def _ffn_kernel(x_ref, g_ref, be_ref, w1_ref, b1_ref, w2_ref, b2_ref, o_ref,
                acc_ref, h_sc, *, eps):
    f = pl.program_id(1)

    @pl.when(f == 0)
    def _():
        acc_ref[...] = jnp.zeros_like(acc_ref)
        x = x_ref[...].astype(jnp.float32)
        mean = jnp.mean(x, axis=-1, keepdims=True)
        var = jnp.mean(jnp.square(x - mean), axis=-1, keepdims=True)
        h = (x - mean) * jax.lax.rsqrt(var + eps)
        h = h * g_ref[...].astype(jnp.float32) + be_ref[...].astype(jnp.float32)
        h_sc[...] = h.astype(jnp.bfloat16)        # LN cached, reused for every d_ff tile

    u = jnp.dot(h_sc[...], w1_ref[...].astype(jnp.bfloat16),
                preferred_element_type=jnp.float32)
    u = jnp.maximum(u + b1_ref[...].astype(jnp.float32), 0.0)
    acc_ref[...] += jnp.dot(u.astype(jnp.bfloat16), w2_ref[...].astype(jnp.bfloat16),
                            preferred_element_type=jnp.float32)

    @pl.when(f == pl.num_programs(1) - 1)
    def _():
        y = acc_ref[...] + b2_ref[...].astype(jnp.float32) + x_ref[...].astype(jnp.float32)
        o_ref[...] = y.astype(o_ref.dtype)


def ffn_block(x, g, beta, w1, b1, w2, b2, *, tm=512, tf=512, eps=1e-5,
              out_dtype=jnp.bfloat16):
    M, D = x.shape
    F = w1.shape[1]
    tm = min(tm, _round_up(M, 8))
    tf = F if F <= tf else tf
    Mp, Fp = _round_up(M, tm), _round_up(F, tf)
    xp = jnp.pad(x, ((0, Mp - M), (0, 0))) if Mp != M else x
    w1p = jnp.pad(w1, ((0, 0), (0, Fp - F))) if Fp != F else w1
    b1p = (jnp.pad(b1, (0, Fp - F)) if Fp != F else b1).reshape(1, Fp)
    w2p = jnp.pad(w2, ((0, Fp - F), (0, 0))) if Fp != F else w2

    out = pl.pallas_call(
        functools.partial(_ffn_kernel, eps=eps),
        grid=(Mp // tm, Fp // tf),
        in_specs=[pl.BlockSpec((tm, D), lambda i, f: (i, 0)),
                  pl.BlockSpec((1, D), lambda i, f: (0, 0)),
                  pl.BlockSpec((1, D), lambda i, f: (0, 0)),
                  pl.BlockSpec((D, tf), lambda i, f: (0, f)),
                  pl.BlockSpec((1, tf), lambda i, f: (0, f)),
                  pl.BlockSpec((tf, D), lambda i, f: (f, 0)),
                  pl.BlockSpec((1, D), lambda i, f: (0, 0))],
        out_specs=pl.BlockSpec((tm, D), lambda i, f: (i, 0)),
        out_shape=jax.ShapeDtypeStruct((Mp, D), out_dtype),
        scratch_shapes=[pltpu.VMEM((tm, D), jnp.float32),
                        pltpu.VMEM((tm, D), jnp.bfloat16)],
        compiler_params=pltpu.CompilerParams(
            dimension_semantics=("parallel", "arbitrary"),
            vmem_limit_bytes=_VMEM_LIMIT),
    )(xp, g.reshape(1, D), beta.reshape(1, D), w1p, b1p, w2p, b2.reshape(1, D))
    return out[:M] if Mp != M else out


# ------------------------------------ tiled LayerNorm ---------------------------------------

def _layernorm_kernel(x_ref, g_ref, b_ref, o_ref, *, eps):
    x = x_ref[...].astype(jnp.float32)
    mean = jnp.mean(x, axis=-1, keepdims=True)
    var = jnp.mean(jnp.square(x - mean), axis=-1, keepdims=True)
    y = (x - mean) * jax.lax.rsqrt(var + eps)
    o_ref[...] = (y * g_ref[...].astype(jnp.float32)
                  + b_ref[...].astype(jnp.float32)).astype(o_ref.dtype)


def layernorm(x, g, b, *, tm=512, eps=1e-5, out_dtype=None):
    M, D = x.shape
    out_dtype = x.dtype if out_dtype is None else out_dtype
    tm = min(tm, _round_up(M, 8))
    Mp = _round_up(M, tm)
    xp = jnp.pad(x, ((0, Mp - M), (0, 0))) if Mp != M else x
    out = pl.pallas_call(
        functools.partial(_layernorm_kernel, eps=eps),
        grid=(Mp // tm,),
        in_specs=[pl.BlockSpec((tm, D), lambda i: (i, 0)),
                  pl.BlockSpec((1, D), lambda i: (0, 0)),
                  pl.BlockSpec((1, D), lambda i: (0, 0))],
        out_specs=pl.BlockSpec((tm, D), lambda i: (i, 0)),
        out_shape=jax.ShapeDtypeStruct((Mp, D), out_dtype),
        compiler_params=pltpu.CompilerParams(dimension_semantics=("parallel",)),
    )(xp, g.reshape(1, D), b.reshape(1, D))
    return out[:M] if Mp != M else out


# ------------- Conv1d(k=3, s=2, p=1) + ReLU as ONE concatenated-tap matmul ------------------

def conv1d_subsample(x, w_cat, b, *, kernel=3, stride=2, pad=1):
    """Conv1d(k=3, s=2, p=1) + ReLU over time.  x:(B,T,Cin), w_cat:(3*Cin,Cout) (tap-major)."""
    B, T, Cin = x.shape
    Cout = w_cat.shape[1]
    t_out = (T + 2 * pad - kernel) // stride + 1
    xp = jnp.pad(x, ((0, 0), (pad, pad), (0, 0)))
    # concatenate the 3 shifted taps along channels -> single (M, 3*Cin) x (3*Cin, Cout) matmul
    taps = jnp.concatenate([xp[:, k:k + stride * t_out:stride, :] for k in range(kernel)],
                           axis=-1).reshape(B * t_out, kernel * Cin)
    y = linear(taps, w_cat, b, activation="relu")
    return y.reshape(B, t_out, Cout)


# ------- head-grouped flash attention reading directly from the (B, T, 3D) QKV buffer -------

def _flash_qkv_kernel(lens_ref, q_ref, k_ref, v_ref, o_ref, m_sc, l_sc, acc_sc, *,
                      n_heads_per_group, head_dim, block_k):
    G, dh = n_heads_per_group, head_dim
    ki = pl.program_id(3)

    @pl.when(ki == 0)
    def _():
        m_sc[...] = jnp.full_like(m_sc, -1e30)
        l_sc[...] = jnp.zeros_like(l_sc)
        acc_sc[...] = jnp.zeros_like(acc_sc)

    b = pl.program_id(0)
    length = lens_ref[b]
    kv_pos = ki * block_k + jax.lax.broadcasted_iota(jnp.int32, (1, block_k), 1)
    mask_bias = jnp.where(kv_pos < length, 0.0, -1e30)       # (1, tk) key-padding bias

    q = q_ref[...].astype(jnp.bfloat16)        # (tq, G*dh); 1/sqrt(dh) folded into Wq at init
    k = k_ref[...].astype(jnp.bfloat16)        # (tk, G*dh)
    v = v_ref[...].astype(jnp.bfloat16)        # (tk, G*dh)

    for gi in range(G):                        # static unroll over heads in the group
        lo, hi = gi * dh, (gi + 1) * dh
        s = jax.lax.dot_general(q[:, lo:hi], k[:, lo:hi], (((1,), (1,)), ((), ())),
                                preferred_element_type=jnp.float32)       # (tq, tk)
        s = s + mask_bias
        m_prev = m_sc[gi]
        m_new = jnp.maximum(m_prev, jnp.max(s, axis=-1, keepdims=True))
        alpha = jnp.exp(m_prev - m_new)
        p = jnp.exp(s - m_new)
        l_sc[gi] = alpha * l_sc[gi] + jnp.sum(p, axis=-1, keepdims=True)
        pv = jax.lax.dot_general(p.astype(jnp.bfloat16), v[:, lo:hi],
                                 (((1,), (0,)), ((), ())),
                                 preferred_element_type=jnp.float32)      # (tq, dh)
        acc_sc[gi] = alpha * acc_sc[gi] + pv
        m_sc[gi] = m_new

    @pl.when(ki == pl.num_programs(3) - 1)
    def _():
        # lane-dense (tq, G*dh) store; exact normalization (no approximate reciprocal)
        outs = [acc_sc[gi] / l_sc[gi] for gi in range(G)]
        o_ref[...] = jnp.concatenate(outs, axis=-1).astype(o_ref.dtype)


def flash_attention_qkv(qkv, lengths, *, n_heads, head_dim, block=256):
    """qkv:(B, T, 3D) with columns [Q heads | K heads | V heads] -> attn out (B, T, D) bf16."""
    B, T, threeD = qkv.shape
    H, dh = n_heads, head_dim
    D = H * dh
    assert threeD == 3 * D

    if dh % 128 == 0:
        G = 1
    elif (128 % dh == 0) and (H >= 128 // dh) and (H % (128 // dh) == 0):
        G = 128 // dh
    else:
        G = H
    gw = G * dh                                  # lane width of one head group
    assert gw % 128 == 0, "head-group lane width must be a multiple of 128"
    n_groups = H // G

    t = min(block, _round_up(T, 8))
    Tp = _round_up(T, t)
    if Tp != T:
        qkv = jnp.pad(qkv, ((0, 0), (0, Tp - T), (0, 0)))
    if lengths is None:
        lengths = jnp.full((B,), T, dtype=jnp.int32)
    lengths = lengths.astype(jnp.int32)
    n_t = Tp // t

    out = pl.pallas_call(
        functools.partial(_flash_qkv_kernel, n_heads_per_group=G, head_dim=dh, block_k=t),
        grid_spec=pltpu.PrefetchScalarGridSpec(
            num_scalar_prefetch=1,
            grid=(B, n_groups, n_t, n_t),
            in_specs=[
                pl.BlockSpec((None, t, gw), lambda b, g, qi, ki, lens: (b, qi, g)),
                pl.BlockSpec((None, t, gw), lambda b, g, qi, ki, lens: (b, ki, n_groups + g)),
                pl.BlockSpec((None, t, gw),
                             lambda b, g, qi, ki, lens: (b, ki, 2 * n_groups + g)),
            ],
            out_specs=pl.BlockSpec((None, t, gw), lambda b, g, qi, ki, lens: (b, qi, g)),
            scratch_shapes=[pltpu.VMEM((G, t, 1), jnp.float32),
                            pltpu.VMEM((G, t, 1), jnp.float32),
                            pltpu.VMEM((G, t, dh), jnp.float32)]),
        out_shape=jax.ShapeDtypeStruct((B, Tp, D), jnp.bfloat16),
        compiler_params=pltpu.CompilerParams(
            dimension_semantics=("parallel", "parallel", "parallel", "arbitrary"),
            vmem_limit_bytes=_VMEM_LIMIT),
    )(lengths, qkv, qkv, qkv)
    return out[:, :T, :] if Tp != T else out


# --------------------------------- model building blocks ------------------------------------

def transformer_layer(x, lengths, lyr, n_heads, *, att_block=256):
    """Pre-LN transformer encoder layer (MHA + FFN).  x:(B, T, D) bf16 (T already padded)."""
    B, T, D = x.shape
    dh = D // n_heads
    xf = x.reshape(B * T, D)

    # LN1 fused into the (fused Q|K|V) projection; 1/sqrt(dh) pre-folded into Wq at init.
    qkv = ln_linear(xf, lyr["ln1_g"], lyr["ln1_b"], lyr["wqkv"], lyr["bqkv"])   # (B*T, 3D) bf16
    # Attention reads head-group column blocks directly from qkv and writes (B, T, D) directly.
    attn = flash_attention_qkv(qkv.reshape(B, T, 3 * D), lengths,
                               n_heads=n_heads, head_dim=dh, block=att_block)   # (B, T, D) bf16
    y = linear(attn.reshape(B * T, D), lyr["wo"], lyr["bo"], residual=xf)       # out-proj + res
    y = ffn_block(y, lyr["ln2_g"], lyr["ln2_b"], lyr["w1"], lyr["b1"],
                  lyr["w2"], lyr["b2"])                                          # LN2+FFN+res
    return y.reshape(B, T, D)


def subsampled_lengths(lengths, *, kernel=3, stride=2, pad=1):
    return (lengths + 2 * pad - kernel) // stride + 1


def speech_encoder_forward(params, x, lengths, *, n_heads, att_block=256):
    """Mirrors SpeechEncoder.forward for 3-D (mel-feature) input.

    x:(B, T_mel, n_mels) f32, lengths:(B,) int32 -> (embs:(B, T', d_model) f32, lengths':(B,)).
    """
    # --- ConvolutionalSubSampler: two Conv1d(k=3, s=2, p=1) + ReLU ---
    x = conv1d_subsample(x, params["conv1_w"], params["conv1_b"])
    x = conv1d_subsample(x, params["conv2_w"], params["conv2_b"])
    if lengths is not None:
        lengths = subsampled_lengths(subsampled_lengths(lengths))

    B, Tc, D = x.shape
    valid = (lengths.astype(jnp.int32) if lengths is not None
             else jnp.full((B,), Tc, jnp.int32))

    # Pad time once to the attention tile; keep padded through the whole transformer stack.
    t_att = min(att_block, _round_up(Tc, 8))
    Tp = _round_up(Tc, t_att)
    if Tp != Tc:
        x = jnp.pad(x, ((0, 0), (0, Tp - Tc), (0, 0)))

    for lyr in params["layers"]:
        x = transformer_layer(x, valid, lyr, n_heads, att_block=att_block)

    x = layernorm(x.reshape(B * Tp, D), params["ln_f_g"], params["ln_f_b"],
                  out_dtype=jnp.float32).reshape(B, Tp, D)
    if Tp != Tc:
        x = x[:, :Tc]
    return x, lengths


# --------------------------------------- param init -----------------------------------------

def init_params(key, n_mels, d_model, d_ff, n_layers, n_heads):
    state = {"key": key}

    def nxt():
        state["key"], sub = jax.random.split(state["key"])
        return sub

    def w_init(din, dout):
        return jax.random.normal(nxt(), (din, dout), jnp.float32) / math.sqrt(din)

    def conv_w(cin, cout):
        w = jax.random.normal(nxt(), (3 * cin, cout), jnp.float32) / math.sqrt(3 * cin)
        return w.astype(jnp.bfloat16), jnp.zeros((cout,), jnp.float32)

    params = {}
    params["conv1_w"], params["conv1_b"] = conv_w(n_mels, d_model)
    params["conv2_w"], params["conv2_b"] = conv_w(d_model, d_model)

    dh = d_model // n_heads
    scale = 1.0 / math.sqrt(dh)
    layers = []
    for _ in range(n_layers):
        lyr = {"ln1_g": jnp.ones((d_model,), jnp.float32),
               "ln1_b": jnp.zeros((d_model,), jnp.float32),
               "ln2_g": jnp.ones((d_model,), jnp.float32),
               "ln2_b": jnp.zeros((d_model,), jnp.float32)}
        wq = w_init(d_model, d_model) * scale        # fold 1/sqrt(dh) into Q (before bf16 cast)
        wk = w_init(d_model, d_model)
        wv = w_init(d_model, d_model)
        lyr["wqkv"] = jnp.concatenate([wq, wk, wv], axis=1).astype(jnp.bfloat16)
        lyr["bqkv"] = jnp.zeros((3 * d_model,), jnp.float32)
        lyr["wo"] = w_init(d_model, d_model).astype(jnp.bfloat16)
        lyr["bo"] = jnp.zeros((d_model,), jnp.float32)
        lyr["w1"] = w_init(d_model, d_ff).astype(jnp.bfloat16)
        lyr["b1"] = jnp.zeros((d_ff,), jnp.float32)
        lyr["w2"] = w_init(d_ff, d_model).astype(jnp.bfloat16)
        lyr["b2"] = jnp.zeros((d_model,), jnp.float32)
        layers.append(lyr)
    params["layers"] = layers
    params["ln_f_g"] = jnp.ones((d_model,), jnp.float32)
    params["ln_f_b"] = jnp.zeros((d_model,), jnp.float32)
    return params


# ------------------------------------------- main --------------------------------------------

if __name__ == "__main__":
    B, T_mel, n_mels = 2, 64, 16
    d_model, n_heads, d_ff, n_layers = 128, 4, 256, 2

    key = jax.random.PRNGKey(0)
    kx, kp = jax.random.split(key)
    x = jax.random.normal(kx, (B, T_mel, n_mels), jnp.float32)   # precomputed mel features
    lengths = jnp.array([64, 48], dtype=jnp.int32)

    params = init_params(kp, n_mels, d_model, d_ff, n_layers, n_heads)

    fwd = jax.jit(functools.partial(speech_encoder_forward, n_heads=n_heads))
    embs, out_lengths = fwd(params, x, lengths)
    jax.block_until_ready(embs)
    jax.block_until_ready(out_lengths)

    assert embs.shape == (B, 16, d_model), embs.shape            # 64 -> 32 -> 16 frames
    assert out_lengths.shape == (B,)
    assert out_lengths.tolist() == [16, 12], out_lengths
    assert bool(jnp.isfinite(embs).all())
    print("KERNEL_OK")
</pallas_src>

<mosaic_0001>
module attributes {stable_mosaic.version = 11 : i64} {
  func.func @_linear_kernel(%arg0: i32, %arg1: i32, %arg2: i32, %arg3: memref<64x48xf32, #tpu.memory_space<vmem>>, %arg4: memref<48x128xbf16, #tpu.memory_space<vmem>>, %arg5: memref<1x128xf32, #tpu.memory_space<vmem>>, %arg6: memref<64x128xbf16, #tpu.memory_space<vmem>>, %arg7: memref<64x128xf32, #tpu.memory_space<vmem>>) attributes {dimension_semantics = [#tpu.dimension_semantics<parallel>, #tpu.dimension_semantics<parallel>, #tpu.dimension_semantics<arbitrary>], iteration_bounds = array<i64: 1, 1, 1>, scalar_prefetch = 0 : i64, scratch_operands = 1 : i64, tpu.core_type = #tpu.core_type<tc>, window_params = [{transform_indices = @transform_0, window_bounds = array<i64: 64, 48>}, {transform_indices = @transform_1, window_bounds = array<i64: 48, 128>}, {transform_indices = @transform_2, window_bounds = array<i64: 1, 128>}, {transform_indices = @transform_3, window_bounds = array<i64: 64, 128>}]} {
    %c0_i32 = arith.constant 0 : i32
    %0 = arith.cmpi eq, %arg2, %c0_i32 : i32
    %1 = arith.extui %0 : i1 to i32
    %c0_i32_0 = arith.constant 0 : i32
    %2 = arith.cmpi ne, %1, %c0_i32_0 : i32
    scf.if %2 {
      %cst_10 = arith.constant 0.000000e+00 : f32
      %13 = vector.broadcast %cst_10 : f32 to vector<64x128xf32>
      %c0_11 = arith.constant 0 : index
      %c0_12 = arith.constant 0 : index
      %14 = vector.load %arg7[%c0_11, %c0_12] : memref<64x128xf32, #tpu.memory_space<vmem>>, vector<64x128xf32>
      tpu.vector_store %arg7[%c0_11, %c0_12], %13 {strides = array<i32>} : memref<64x128xf32, #tpu.memory_space<vmem>>, vector<64x128xf32>,
    } else {
    }
    %c0 = arith.constant 0 : index
    %c0_1 = arith.constant 0 : index
    %3 = vector.load %arg7[%c0, %c0_1] : memref<64x128xf32, #tpu.memory_space<vmem>>, vector<64x128xf32>
    %c0_2 = arith.constant 0 : index
    %c0_3 = arith.constant 0 : index
    %4 = vector.load %arg3[%c0_2, %c0_3] : memref<64x48xf32, #tpu.memory_space<vmem>>, vector<64x48xf32>
    %5 = arith.truncf %4 : vector<64x48xf32> to vector<64x48xbf16>
    %c0_4 = arith.constant 0 : index
    %c0_5 = arith.constant 0 : index
    %6 = vector.load %arg4[%c0_4, %c0_5] : memref<48x128xbf16, #tpu.memory_space<vmem>>, vector<48x128xbf16>
    %cst = arith.constant dense<0.000000e+00> : vector<64x128xf32>
    %7 = tpu.matmul %5, %6, %cst {dimension_numbers = #tpu.dot_dimension_numbers<[1], [0], [0], [1], [0, 0, 1, 1], [], []>} : vector<64x48xbf16>, vector<48x128xbf16>, vector<64x128xf32> -> vector<64x128xf32>
    %8 = arith.addf %3, %7 : vector<64x128xf32>
    %c0_6 = arith.constant 0 : index
    %c0_7 = arith.constant 0 : index
    %9 = vector.load %arg7[%c0_6, %c0_7] : memref<64x128xf32, #tpu.memory_space<vmem>>, vector<64x128xf32>
    tpu.vector_store %arg7[%c0_6, %c0_7], %8 {strides = array<i32>} : memref<64x128xf32, #tpu.memory_space<vmem>>, vector<64x128xf32>,
    %c0_i32_8 = arith.constant 0 : i32
    %10 = arith.cmpi eq, %arg2, %c0_i32_8 : i32
    %11 = arith.extui %10 : i1 to i32
    %c0_i32_9 = arith.constant 0 : i32
    %12 = arith.cmpi ne, %11, %c0_i32_9 : i32
    scf.if %12 {
      %c0_10 = arith.constant 0 : index
      %c0_11 = arith.constant 0 : index
      %13 = vector.load %arg7[%c0_10, %c0_11] : memref<64x128xf32, #tpu.memory_space<vmem>>, vector<64x128xf32>
      %c0_12 = arith.constant 0 : index
      %c0_13 = arith.constant 0 : index
      %14 = vector.load %arg5[%c0_12, %c0_13] : memref<1x128xf32, #tpu.memory_space<vmem>>, vector<1x128xf32>
      %15 = vector.broadcast %14 : vector<1x128xf32> to vector<64x128xf32>
      %16 = arith.addf %13, %15 : vector<64x128xf32>
      %cst_14 = arith.constant 0.000000e+00 : f32
      %17 = vector.broadcast %cst_14 : f32 to vector<64x128xf32>
      %18 = arith.maximumf %16, %17 : vector<64x128xf32>
      %19 = arith.truncf %18 : vector<64x128xf32> to vector<64x128xbf16>
      %c0_15 = arith.constant 0 : index
      %c0_16 = arith.constant 0 : index
      %20 = vector.load %arg6[%c0_15, %c0_16] : memref<64x128xbf16, #tpu.memory_space<vmem>>, vector<64x128xbf16>
      tpu.vector_store %arg6[%c0_15, %c0_16], %19 {strides = array<i32>} : memref<64x128xbf16, #tpu.memory_space<vmem>>, vector<64x128xbf16>,
    } else {
    }
    return
  }
  func.func @transform_0(%arg0: i32, %arg1: i32, %arg2: i32) -> (i32, i32) {
    %c0_i32 = arith.constant 0 : i32
    return %arg0, %arg2 : i32, i32
  }
  func.func @transform_1(%arg0: i32, %arg1: i32, %arg2: i32) -> (i32, i32) {
    %c0_i32 = arith.constant 0 : i32
    return %arg2, %arg1 : i32, i32
  }
  func.func @transform_2(%arg0: i32, %arg1: i32, %arg2: i32) -> (i32, i32) {
    %c0_i32 = arith.constant 0 : i32
    %c0_i32_0 = arith.constant 0 : i32
    return %c0_i32, %arg1 : i32, i32
  }
  func.func @transform_3(%arg0: i32, %arg1: i32, %arg2: i32) -> (i32, i32) {
    %c0_i32 = arith.constant 0 : i32
    return %arg0, %arg1 : i32, i32
  }
}

module attributes {stable_mosaic.version = 11 : i64} {
  func.func @_linear_kernel(%arg0: i32, %arg1: i32, %arg2: i32, %arg3: memref<32x384xbf16, #tpu.memory_space<vmem>>, %arg4: memref<384x128xbf16, #tpu.memory_space<vmem>>, %arg5: memref<1x128xf32, #tpu.memory_space<vmem>>, %arg6: memref<32x128xbf16, #tpu.memory_space<vmem>>, %arg7: memref<32x128xf32, #tpu.memory_space<vmem>>) attributes {dimension_semantics = [#tpu.dimension_semantics<parallel>, #tpu.dimension_semantics<parallel>, #tpu.dimension_semantics<arbitrary>], iteration_bounds = array<i64: 1, 1, 1>, scalar_prefetch = 0 : i64, scratch_operands = 1 : i64, tpu.core_type = #tpu.core_type<tc>, window_params = [{transform_indices = @transform_0, window_bounds = array<i64: 32, 384>}, {transform_indices = @transform_1, window_bounds = array<i64: 384, 128>}, {transform_indices = @transform_2, window_bounds = array<i64: 1, 128>}, {transform_indices = @transform_3, window_bounds = array<i64: 32, 128>}]} {
    %c0_i32 = arith.constant 0 : i32
    %0 = arith.cmpi eq, %arg2, %c0_i32 : i32
    %1 = arith.extui %0 : i1 to i32
    %c0_i32_0 = arith.constant 0 : i32
    %2 = arith.cmpi ne, %1, %c0_i32_0 : i32
    scf.if %2 {
      %cst_10 = arith.constant 0.000000e+00 : f32
      %12 = vector.broadcast %cst_10 : f32 to vector<32x128xf32>
      %c0_11 = arith.constant 0 : index
      %c0_12 = arith.constant 0 : index
      %13 = vector.load %arg7[%c0_11, %c0_12] : memref<32x128xf32, #tpu.memory_space<vmem>>, vector<32x128xf32>
      tpu.vector_store %arg7[%c0_11, %c0_12], %12 {strides = array<i32>} : memref<32x128xf32, #tpu.memory_space<vmem>>, vector<32x128xf32>,
    } else {
    }
    %c0 = arith.constant 0 : index
    %c0_1 = arith.constant 0 : index
    %3 = vector.load %arg7[%c0, %c0_1] : memref<32x128xf32, #tpu.memory_space<vmem>>, vector<32x128xf32>
    %c0_2 = arith.constant 0 : index
    %c0_3 = arith.constant 0 : index
    %4 = vector.load %arg3[%c0_2, %c0_3] : memref<32x384xbf16, #tpu.memory_space<vmem>>, vector<32x384xbf16>
    %c0_4 = arith.constant 0 : index
    %c0_5 = arith.constant 0 : index
    %5 = vector.load %arg4[%c0_4, %c0_5] : memref<384x128xbf16, #tpu.memory_space<vmem>>, vector<384x128xbf16>
    %cst = arith.constant dense<0.000000e+00> : vector<32x128xf32>
    %6 = tpu.matmul %4, %5, %cst {dimension_numbers = #tpu.dot_dimension_numbers<[1], [0], [0], [1], [0, 0, 1, 1], [], []>} : vector<32x384xbf16>, vector<384x128xbf16>, vector<32x128xf32> -> vector<32x128xf32>
    %7 = arith.addf %3, %6 : vector<32x128xf32>
    %c0_6 = arith.constant 0 : index
    %c0_7 = arith.constant 0 : index
    %8 = vector.load %arg7[%c0_6, %c0_7] : memref<32x128xf32, #tpu.memory_space<vmem>>, vector<32x128xf32>
    tpu.vector_store %arg7[%c0_6, %c0_7], %7 {strides = array<i32>} : memref<32x128xf32, #tpu.memory_space<vmem>>, vector<32x128xf32>,
    %c0_i32_8 = arith.constant 0 : i32
    %9 = arith.cmpi eq, %arg2, %c0_i32_8 : i32
    %10 = arith.extui %9 : i1 to i32
    %c0_i32_9 = arith.constant 0 : i32
    %11 = arith.cmpi ne, %10, %c0_i32_9 : i32
    scf.if %11 {
      %c0_10 = arith.constant 0 : index
      %c0_11 = arith.constant 0 : index
      %12 = vector.load %arg7[%c0_10, %c0_11] : memref<32x128xf32, #tpu.memory_space<vmem>>, vector<32x128xf32>
      %c0_12 = arith.constant 0 : index
      %c0_13 = arith.constant 0 : index
      %13 = vector.load %arg5[%c0_12, %c0_13] : memref<1x128xf32, #tpu.memory_space<vmem>>, vector<1x128xf32>
      %14 = vector.broadcast %13 : vector<1x128xf32> to vector<32x128xf32>
      %15 = arith.addf %12, %14 : vector<32x128xf32>
      %cst_14 = arith.constant 0.000000e+00 : f32
      %16 = vector.broadcast %cst_14 : f32 to vector<32x128xf32>
      %17 = arith.maximumf %15, %16 : vector<32x128xf32>
      %18 = arith.truncf %17 : vector<32x128xf32> to vector<32x128xbf16>
      %c0_15 = arith.constant 0 : index
      %c0_16 = arith.constant 0 : index
      %19 = vector.load %arg6[%c0_15, %c0_16] : memref<32x128xbf16, #tpu.memory_space<vmem>>, vector<32x128xbf16>
      tpu.vector_store %arg6[%c0_15, %c0_16], %18 {strides = array<i32>} : memref<32x128xbf16, #tpu.memory_space<vmem>>, vector<32x128xbf16>,
    } else {
    }
    return
  }
  func.func @transform_0(%arg0: i32, %arg1: i32, %arg2: i32) -> (i32, i32) {
    %c0_i32 = arith.constant 0 : i32
    return %arg0, %arg2 : i32, i32
  }
  func.func @transform_1(%arg0: i32, %arg1: i32, %arg2: i32) -> (i32, i32) {
    %c0_i32 = arith.constant 0 : i32
    return %arg2, %arg1 : i32, i32
  }
  func.func @transform_2(%arg0: i32, %arg1: i32, %arg2: i32) -> (i32, i32) {
    %c0_i32 = arith.constant 0 : i32
    %c0_i32_0 = arith.constant 0 : i32
    return %c0_i32, %arg1 : i32, i32
  }
  func.func @transform_3(%arg0: i32, %arg1: i32, %arg2: i32) -> (i32, i32) {
    %c0_i32 = arith.constant 0 : i32
    return %arg0, %arg1 : i32, i32
  }
}

module attributes {stable_mosaic.version = 11 : i64} {
  func.func @_flash_qkv_kernel(%arg0: i32, %arg1: i32, %arg2: i32, %arg3: i32, %arg4: memref<2xi32, #tpu.memory_space<smem>>, %arg5: memref<1x16x128xbf16, #tpu.memory_space<vmem>>, %arg6: memref<1x16x128xbf16, #tpu.memory_space<vmem>>, %arg7: memref<1x16x128xbf16, #tpu.memory_space<vmem>>, %arg8: memref<1x16x128xbf16, #tpu.memory_space<vmem>>, %arg9: memref<4x16x1xf32, #tpu.memory_space<vmem>>, %arg10: memref<4x16x1xf32, #tpu.memory_space<vmem>>, %arg11: memref<4x16x32xf32, #tpu.memory_space<vmem>>) attributes {dimension_semantics = [#tpu.dimension_semantics<parallel>, #tpu.dimension_semantics<parallel>, #tpu.dimension_semantics<parallel>, #tpu.dimension_semantics<arbitrary>], iteration_bounds = array<i64: 2, 1, 1, 1>, scalar_prefetch = 1 : i64, scratch_operands = 3 : i64, tpu.core_type = #tpu.core_type<tc>, window_params = [{transform_indices = @transform_0, window_bounds = array<i64: 1, 16, 128>}, {transform_indices = @transform_1, window_bounds = array<i64: 1, 16, 128>}, {transform_indices = @transform_2, window_bounds = array<i64: 1, 16, 128>}, {transform_indices = @transform_3, window_bounds = array<i64: 1, 16, 128>}]} {
    %c0_i32 = arith.constant 0 : i32
    %0 = arith.cmpi eq, %arg3, %c0_i32 : i32
    %1 = arith.extui %0 : i1 to i32
    %c0_i32_0 = arith.constant 0 : i32
    %2 = arith.cmpi ne, %1, %c0_i32_0 : i32
    scf.if %2 {
      %cst_97 = arith.constant -1.000000e+30 : f32
      %175 = vector.broadcast %cst_97 : f32 to vector<4x16x1xf32>
      %c0_98 = arith.constant 0 : index
      %c0_99 = arith.constant 0 : index
      %c0_100 = arith.constant 0 : index
      %176 = vector.load %arg9[%c0_98, %c0_99, %c0_100] : memref<4x16x1xf32, #tpu.memory_space<vmem>>, vector<4x16x1xf32>
      tpu.vector_store %arg9[%c0_98, %c0_99, %c0_100], %175 {strides = array<i32>} : memref<4x16x1xf32, #tpu.memory_space<vmem>>, vector<4x16x1xf32>,
      %cst_101 = arith.constant 0.000000e+00 : f32
      %177 = vector.broadcast %cst_101 : f32 to vector<4x16x1xf32>
      %c0_102 = arith.constant 0 : index
      %c0_103 = arith.constant 0 : index
      %c0_104 = arith.constant 0 : index
      %178 = vector.load %arg10[%c0_102, %c0_103, %c0_104] : memref<4x16x1xf32, #tpu.memory_space<vmem>>, vector<4x16x1xf32>
      tpu.vector_store %arg10[%c0_102, %c0_103, %c0_104], %177 {strides = array<i32>} : memref<4x16x1xf32, #tpu.memory_space<vmem>>, vector<4x16x1xf32>,
      %cst_105 = arith.constant 0.000000e+00 : f32
      %179 = vector.broadcast %cst_105 : f32 to vector<4x16x32xf32>
      %c0_106 = arith.constant 0 : index
      %c0_107 = arith.constant 0 : index
      %c0_108 = arith.constant 0 : index
      %180 = vector.load %arg11[%c0_106, %c0_107, %c0_108] : memref<4x16x32xf32, #tpu.memory_space<vmem>>, vector<4x16x32xf32>
      tpu.vector_store %arg11[%c0_106, %c0_107, %c0_108], %179 {strides = array<i32>} : memref<4x16x32xf32, #tpu.memory_space<vmem>>, vector<4x16x32xf32>,
    } else {
    }
    %3 = arith.index_cast %arg0 : i32 to index
    %4 = memref.load %arg4[%3] : memref<2xi32, #tpu.memory_space<smem>>
    %c16_i32 = arith.constant 16 : i32
    %5 = arith.muli %arg3, %c16_i32 : i32
    %6 = tpu.iota {dimensions = array<i32: 1>} : vector<1x16xi32>
    %7 = vector.broadcast %5 : i32 to vector<1x16xi32>
    %8 = arith.addi %7, %6 : vector<1x16xi32>
    %9 = vector.broadcast %4 : i32 to vector<1x16xi32>
    %10 = arith.cmpi slt, %8, %9 : vector<1x16xi32>
    %cst = arith.constant 0.000000e+00 : f32
    %cst_1 = arith.constant -1.000000e+30 : f32
    %11 = vector.broadcast %cst : f32 to vector<1x16xf32>
    %12 = vector.broadcast %cst_1 : f32 to vector<1x16xf32>
    %13 = arith.select %10, %11, %12 : vector<1x16xi1>, vector<1x16xf32>
    %c0 = arith.constant 0 : index
    %c0_2 = arith.constant 0 : index
    %c0_3 = arith.constant 0 : index
    %14 = vector.load %arg5[%c0, %c0_2, %c0_3] : memref<1x16x128xbf16, #tpu.memory_space<vmem>>, vector<1x16x128xbf16>
    %15 = vector.shape_cast %14 : vector<1x16x128xbf16> to vector<16x128xbf16>
    %c0_4 = arith.constant 0 : index
    %c0_5 = arith.constant 0 : index
    %c0_6 = arith.constant 0 : index
    %16 = vector.load %arg6[%c0_4, %c0_5, %c0_6] : memref<1x16x128xbf16, #tpu.memory_space<vmem>>, vector<1x16x128xbf16>
    %17 = vector.shape_cast %16 : vector<1x16x128xbf16> to vector<16x128xbf16>
    %c0_7 = arith.constant 0 : index
    %c0_8 = arith.constant 0 : index
    %c0_9 = arith.constant 0 : index
    %18 = vector.load %arg7[%c0_7, %c0_8, %c0_9] : memref<1x16x128xbf16, #tpu.memory_space<vmem>>, vector<1x16x128xbf16>
    %19 = vector.shape_cast %18 : vector<1x16x128xbf16> to vector<16x128xbf16>
    %20 = vector.extract_strided_slice %15 {offsets = [0, 0], sizes = [16, 32], strides = [1, 1]} : vector<16x128xbf16> to vector<16x32xbf16>
    %21 = vector.extract_strided_slice %17 {offsets = [0, 0], sizes = [16, 32], strides = [1, 1]} : vector<16x128xbf16> to vector<16x32xbf16>
    %cst_10 = arith.constant dense<0.000000e+00> : vector<16x16xf32>
    %22 = tpu.matmul %20, %21, %cst_10 {dimension_numbers = #tpu.dot_dimension_numbers<[1], [1], [0], [0], [0, 0, 1, 0], [], []>} : vector<16x32xbf16>, vector<16x32xbf16>, vector<16x16xf32> -> vector<16x16xf32>
    %23 = vector.broadcast %13 : vector<1x16xf32> to vector<16x16xf32>
    %24 = arith.addf %22, %23 : vector<16x16xf32>
    %c0_11 = arith.constant 0 : index
    %c0_12 = arith.constant 0 : index
    %c0_13 = arith.constant 0 : index
    %25 = vector.load %arg9[%c0_11, %c0_12, %c0_13] : memref<4x16x1xf32, #tpu.memory_space<vmem>>, vector<1x16x1xf32>
    %26 = vector.shape_cast %25 : vector<1x16x1xf32> to vector<16x1xf32>
    %cst_14 = arith.constant dense<0xFF800000> : vector<16xf32>
    %27 = vector.multi_reduction <maximumf>, %24, %cst_14 [1] : vector<16x16xf32> to vector<16xf32>
    %28 = vector.shape_cast %27 : vector<16xf32> to vector<16x1xf32>
    %29 = arith.maximumf %26, %28 : vector<16x1xf32>
    %30 = arith.subf %26, %29 : vector<16x1xf32>
    %31 = math.exp %30 : vector<16x1xf32>
    %32 = vector.broadcast %29 : vector<16x1xf32> to vector<16x16xf32>
    %33 = arith.subf %24, %32 : vector<16x16xf32>
    %34 = math.exp %33 : vector<16x16xf32>
    %c0_15 = arith.constant 0 : index
    %c0_16 = arith.constant 0 : index
    %c0_17 = arith.constant 0 : index
    %35 = vector.load %arg10[%c0_15, %c0_16, %c0_17] : memref<4x16x1xf32, #tpu.memory_space<vmem>>, vector<1x16x1xf32>
    %36 = vector.shape_cast %35 : vector<1x16x1xf32> to vector<16x1xf32>
    %37 = arith.mulf %31, %36 : vector<16x1xf32>
    %cst_18 = arith.constant dense<0.000000e+00> : vector<16xf32>
    %38 = vector.multi_reduction <add>, %34, %cst_18 [1] : vector<16x16xf32> to vector<16xf32>
    %39 = vector.shape_cast %38 : vector<16xf32> to vector<16x1xf32>
    %40 = arith.addf %37, %39 : vector<16x1xf32>
    %c0_19 = arith.constant 0 : index
    %c0_20 = arith.constant 0 : index
    %c0_21 = arith.constant 0 : index
    %41 = vector.load %arg10[%c0_19, %c0_20, %c0_21] : memref<4x16x1xf32, #tpu.memory_space<vmem>>, vector<1x16x1xf32>
    %42 = vector.shape_cast %41 : vector<1x16x1xf32> to vector<16x1xf32>
    %43 = vector.shape_cast %40 : vector<16x1xf32> to vector<1x16x1xf32>
    tpu.vector_store %arg10[%c0_19, %c0_20, %c0_21], %43 {strides = array<i32>} : memref<4x16x1xf32, #tpu.memory_space<vmem>>, vector<1x16x1xf32>,
    %44 = arith.truncf %34 : vector<16x16xf32> to vector<16x16xbf16>
    %45 = vector.extract_strided_slice %19 {offsets = [0, 0], sizes = [16, 32], strides = [1, 1]} : vector<16x128xbf16> to vector<16x32xbf16>
    %cst_22 = arith.constant dense<0.000000e+00> : vector<16x32xf32>
    %46 = tpu.matmul %44, %45, %cst_22 {dimension_numbers = #tpu.dot_dimension_numbers<[1], [0], [0], [1], [0, 0, 1, 1], [], []>} : vector<16x16xbf16>, vector<16x32xbf16>, vector<16x32xf32> -> vector<16x32xf32>
    %c0_23 = arith.constant 0 : index
    %c0_24 = arith.constant 0 : index
    %c0_25 = arith.constant 0 : index
    %47 = vector.load %arg11[%c0_23, %c0_24, %c0_25] : memref<4x16x32xf32, #tpu.memory_space<vmem>>, vector<1x16x32xf32>
    %48 = vector.shape_cast %47 : vector<1x16x32xf32> to vector<16x32xf32>
    %49 = vector.broadcast %31 : vector<16x1xf32> to vector<16x32xf32>
    %50 = arith.mulf %49, %48 : vector<16x32xf32>
    %51 = arith.addf %50, %46 : vector<16x32xf32>
    %c0_26 = arith.constant 0 : index
    %c0_27 = arith.constant 0 : index
    %c0_28 = arith.constant 0 : index
    %52 = vector.load %arg11[%c0_26, %c0_27, %c0_28] : memref<4x16x32xf32, #tpu.memory_space<vmem>>, vector<1x16x32xf32>
    %53 = vector.shape_cast %52 : vector<1x16x32xf32> to vector<16x32xf32>
    %54 = vector.shape_cast %51 : vector<16x32xf32> to vector<1x16x32xf32>
    tpu.vector_store %arg11[%c0_26, %c0_27, %c0_28], %54 {strides = array<i32>} : memref<4x16x32xf32, #tpu.memory_space<vmem>>, vector<1x16x32xf32>,
    %c0_29 = arith.constant 0 : index
    %c0_30 = arith.constant 0 : index
    %c0_31 = arith.constant 0 : index
    %55 = vector.load %arg9[%c0_29, %c0_30, %c0_31] : memref<4x16x1xf32, #tpu.memory_space<vmem>>, vector<1x16x1xf32>
    %56 = vector.shape_cast %55 : vector<1x16x1xf32> to vector<16x1xf32>
    %57 = vector.shape_cast %29 : vector<16x1xf32> to vector<1x16x1xf32>
    tpu.vector_store %arg9[%c0_29, %c0_30, %c0_31], %57 {strides = array<i32>} : memref<4x16x1xf32, #tpu.memory_space<vmem>>, vector<1x16x1xf32>,
    %58 = vector.extract_strided_slice %15 {offsets = [0, 32], sizes = [16, 32], strides = [1, 1]} : vector<16x128xbf16> to vector<16x32xbf16>
    %59 = vector.extract_strided_slice %17 {offsets = [0, 32], sizes = [16, 32], strides = [1, 1]} : vector<16x128xbf16> to vector<16x32xbf16>
    %cst_32 = arith.constant dense<0.000000e+00> : vector<16x16xf32>
    %60 = tpu.matmul %58, %59, %cst_32 {dimension_numbers = #tpu.dot_dimension_numbers<[1], [1], [0], [0], [0, 0, 1, 0], [], []>} : vector<16x32xbf16>, vector<16x32xbf16>, vector<16x16xf32> -> vector<16x16xf32>
    %61 = vector.broadcast %13 : vector<1x16xf32> to vector<16x16xf32>
    %62 = arith.addf %60, %61 : vector<16x16xf32>
    %c1 = arith.constant 1 : index
    %c0_33 = arith.constant 0 : index
    %c0_34 = arith.constant 0 : index
    %63 = vector.load %arg9[%c1, %c0_33, %c0_34] : memref<4x16x1xf32, #tpu.memory_space<vmem>>, vector<1x16x1xf32>
    %64 = vector.shape_cast %63 : vector<1x16x1xf32> to vector<16x1xf32>
    %cst_35 = arith.constant dense<0xFF800000> : vector<16xf32>
    %65 = vector.multi_reduction <maximumf>, %62, %cst_35 [1] : vector<16x16xf32> to vector<16xf32>
    %66 = vector.shape_cast %65 : vector<16xf32> to vector<16x1xf32>
    %67 = arith.maximumf %64, %66 : vector<16x1xf32>
    %68 = arith.subf %64, %67 : vector<16x1xf32>
    %69 = math.exp %68 : vector<16x1xf32>
    %70 = vector.broadcast %67 : vector<16x1xf32> to vector<16x16xf32>
    %71 = arith.subf %62, %70 : vector<16x16xf32>
    %72 = math.exp %71 : vector<16x16xf32>
    %c1_36 = arith.constant 1 : index
    %c0_37 = arith.constant 0 : index
    %c0_38 = arith.constant 0 : index
    %73 = vector.load %arg10[%c1_36, %c0_37, %c0_38] : memref<4x16x1xf32, #tpu.memory_space<vmem>>, vector<1x16x1xf32>
    %74 = vector.shape_cast %73 : vector<1x16x1xf32> to vector<16x1xf32>
    %75 = arith.mulf %69, %74 : vector<16x1xf32>
    %cst_39 = arith.constant dense<0.000000e+00> : vector<16xf32>
    %76 = vector.multi_reduction <add>, %72, %cst_39 [1] : vector<16x16xf32> to vector<16xf32>
    %77 = vector.shape_cast %76 : vector<16xf32> to vector<16x1xf32>
    %78 = arith.addf %75, %77 : vector<16x1xf32>
    %c1_40 = arith.constant 1 : index
    %c0_41 = arith.constant 0 : index
    %c0_42 = arith.constant 0 : index
    %79 = vector.load %arg10[%c1_40, %c0_41, %c0_42] : memref<4x16x1xf32, #tpu.memory_space<vmem>>, vector<1x16x1xf32>
    %80 = vector.shape_cast %79 : vector<1x16x1xf32> to vector<16x1xf32>
    %81 = vector.shape_cast %78 : vector<16x1xf32> to vector<1x16x1xf32>
    tpu.vector_store %arg10[%c1_40, %c0_41, %c0_42], %81 {strides = array<i32>} : memref<4x16x1xf32, #tpu.memory_space<vmem>>, vector<1x16x1xf32>,
    %82 = arith.truncf %72 : vector<16x16xf32> to vector<16x16xbf16>
    %83 = vector.extract_strided_slice %19 {offsets = [0, 32], sizes = [16, 32], strides = [1, 1]} : vector<16x128xbf16> to vector<16x32xbf16>
    %cst_43 = arith.constant dense<0.000000e+00> : vector<16x32xf32>
    %84 = tpu.matmul %82, %83, %cst_43 {dimension_numbers = #tpu.dot_dimension_numbers<[1], [0], [0], [1], [0, 0, 1, 1], [], []>} : vector<16x16xbf16>, vector<16x32xbf16>, vector<16x32xf32> -> vector<16x32xf32>
    %c1_44 = arith.constant 1 : index
    %c0_45 = arith.constant 0 : index
    %c0_46 = arith.constant 0 : index
    %85 = vector.load %arg11[%c1_44, %c0_45, %c0_46] : memref<4x16x32xf32, #tpu.memory_space<vmem>>, vector<1x16x32xf32>
    %86 = vector.shape_cast %85 : vector<1x16x32xf32> to vector<16x32xf32>
    %87 = vector.broadcast %69 : vector<16x1xf32> to vector<16x32xf32>
    %88 = arith.mulf %87, %86 : vector<16x32xf32>
    %89 = arith.addf %88, %84 : vector<16x32xf32>
    %c1_47 = arith.constant 1 : index
    %c0_48 = arith.constant 0 : index
    %c0_49 = arith.constant 0 : index
    %90 = vector.load %arg11[%c1_47, %c0_48, %c0_49] : memref<4x16x32xf32, #tpu.memory_space<vmem>>, vector<1x16x32xf32>
    %91 = vector.shape_cast %90 : vector<1x16x32xf32> to vector<16x32xf32>
    %92 = vector.shape_cast %89 : vector<16x32xf32> to vector<1x16x32xf32>
    tpu.vector_store %arg11[%c1_47, %c0_48, %c0_49], %92 {strides = array<i32>} : memref<4x16x32xf32, #tpu.memory_space<vmem>>, vector<1x16x32xf32>,
    %c1_50 = arith.constant 1 : index
    %c0_51 = arith.constant 0 : index
    %c0_52 = arith.constant 0 : index
    %93 = vector.load %arg9[%c1_50, %c0_51, %c0_52] : memref<4x16x1xf32, #tpu.memory_space<vmem>>, vector<1x16x1xf32>
    %94 = vector.shape_cast %93 : vector<1x16x1xf32> to vector<16x1xf32>
    %95 = vector.shape_cast %67 : vector<16x1xf32> to vector<1x16x1xf32>
    tpu.vector_store %arg9[%c1_50, %c0_51, %c0_52], %95 {strides = array<i32>} : memref<4x16x1xf32, #tpu.memory_space<vmem>>, vector<1x16x1xf32>,
    %96 = vector.extract_strided_slice %15 {offsets = [0, 64], sizes = [16, 32], strides = [1, 1]} : vector<16x128xbf16> to vector<16x32xbf16>
    %97 = vector.extract_strided_slice %17 {offsets = [0, 64], sizes = [16, 32], strides = [1, 1]} : vector<16x128xbf16> to vector<16x32xbf16>
    %cst_53 = arith.constant dense<0.000000e+00> : vector<16x16xf32>
    %98 = tpu.matmul %96, %97, %cst_53 {dimension_numbers = #tpu.dot_dimension_numbers<[1], [1], [0], [0], [0, 0, 1, 0], [], []>} : vector<16x32xbf16>, vector<16x32xbf16>, vector<16x16xf32> -> vector<16x16xf32>
    %99 = vector.broadcast %13 : vector<1x16xf32> to vector<16x16xf32>
    %100 = arith.addf %98, %99 : vector<16x16xf32>
    %c2 = arith.constant 2 : index
    %c0_54 = arith.constant 0 : index
    %c0_55 = arith.constant 0 : index
    %101 = vector.load %arg9[%c2, %c0_54, %c0_55] : memref<4x16x1xf32, #tpu.memory_space<vmem>>, vector<1x16x1xf32>
    %102 = vector.shape_cast %101 : vector<1x16x1xf32> to vector<16x1xf32>
    %cst_56 = arith.constant dense<0xFF800000> : vector<16xf32>
    %103 = vector.multi_reduction <maximumf>, %100, %cst_56 [1] : vector<16x16xf32> to vector<16xf32>
    %104 = vector.shape_cast %103 : vector<16xf32> to vector<16x1xf32>
    %105 = arith.maximumf %102, %104 : vector<16x1xf32>
    %106 = arith.subf %102, %105 : vector<16x1xf32>
    %107 = math.exp %106 : vector<16x1xf32>
    %108 = vector.broadcast %105 : vector<16x1xf32> to vector<16x16xf32>
    %109 = arith.subf %100, %108 : vector<16x16xf32>
    %110 = math.exp %109 : vector<16x16xf32>
    %c2_57 = arith.constant 2 : index
    %c0_58 = arith.constant 0 : index
    %c0_59 = arith.constant 0 : index
    %111 = vector.load %arg10[%c2_57, %c0_58, %c0_59] : memref<4x16x1xf32, #tpu.memory_space<vmem>>, vector<1x16x1xf32>
    %112 = vector.shape_cast %111 : vector<1x16x1xf32> to vector<16x1xf32>
    %113 = arith.mulf %107, %112 : vector<16x1xf32>
    %cst_60 = arith.constant dense<0.000000e+00> : vector<16xf32>
    %114 = vector.multi_reduction <add>, %110, %cst_60 [1] : vector<16x16xf32> to vector<16xf32>
    %115 = vector.shape_cast %114 : vector<16xf32> to vector<16x1xf32>
    %116 = arith.addf %113, %115 : vector<16x1xf32>
    %c2_61 = arith.constant 2 : index
    %c0_62 = arith.constant 0 : index
    %c0_63 = arith.constant 0 : index
    %117 = vector.load %arg10[%c2_61, %c0_62, %c0_63] : memref<4x16x1xf32, #tpu.memory_space<vmem>>, vector<1x16x1xf32>
    %118 = vector.shape_cast %117 : vector<1x16x1xf32> to vector<16x1xf32>
    %119 = vector.shape_cast %116 : vector<16x1xf32> to vector<1x16x1xf32>
    tpu.vector_store %arg10[%c2_61, %c0_62, %c0_63], %119 {strides = array<i32>} : memref<4x16x1xf32, #tpu.memory_space<vmem>>, vector<1x16x1xf32>,
    %120 = arith.truncf %110 : vector<16x16xf32> to vector<16x16xbf16>
    %121 = vector.extract_strided_slice %19 {offsets = [0, 64], sizes = [16, 32], strides = [1, 1]} : vector<16x128xbf16> to vector<16x32xbf16>
    %cst_64 = arith.constant dense<0.000000e+00> : vector<16x32xf32>
    %122 = tpu.matmul %120, %121, %cst_64 {dimension_numbers = #tpu.dot_dimension_numbers<[1], [0], [0], [1], [0, 0, 1, 1], [], []>} : vector<16x16xbf16>, vector<16x32xbf16>, vector<16x32xf32> -> vector<16x32xf32>
    %c2_65 = arith.constant 2 : index
    %c0_66 = arith.constant 0 : index
    %c0_67 = arith.constant 0 : index
    %123 = vector.load %arg11[%c2_65, %c0_66, %c0_67] : memref<4x16x32xf32, #tpu.memory_space<vmem>>, vector<1x16x32xf32>
    %124 = vector.shape_cast %123 : vector<1x16x32xf32> to vector<16x32xf32>
    %125 = vector.broadcast %107 : vector<16x1xf32> to vector<16x32xf32>
    %126 = arith.mulf %125, %124 : vector<16x32xf32>
    %127 = arith.addf %126, %122 : vector<16x32xf32>
    %c2_68 = arith.constant 2 : index
    %c0_69 = arith.constant 0 : index
    %c0_70 = arith.constant 0 : index
    %128 = vector.load %arg11[%c2_68, %c0_69, %c0_70] : memref<4x16x32xf32, #tpu.memory_space<vmem>>, vector<1x16x32xf32>
    %129 = vector.shape_cast %128 : vector<1x16x32xf32> to vector<16x32xf32>
    %130 = vector.shape_cast %127 : vector<16x32xf32> to vector<1x16x32xf32>
    tpu.vector_store %arg11[%c2_68, %c0_69, %c0_70], %130 {strides = array<i32>} : memref<4x16x32xf32, #tpu.memory_space<vmem>>, vector<1x16x32xf32>,
    %c2_71 = arith.constant 2 : index
    %c0_72 = arith.constant 0 : index
    %c0_73 = arith.constant 0 : index
    %131 = vector.load %arg9[%c2_71, %c0_72, %c0_73] : memref<4x16x1xf32, #tpu.memory_space<vmem>>, vector<1x16x1xf32>
    %132 = vector.shape_cast %131 : vector<1x16x1xf32> to vector<16x1xf32>
    %133 = vector.shape_cast %105 : vector<16x1xf32> to vector<1x16x1xf32>
    tpu.vector_store %arg9[%c2_71, %c0_72, %c0_73], %133 {strides = array<i32>} : memref<4x16x1xf32, #tpu.memory_space<vmem>>, vector<1x16x1xf32>,
    %134 = vector.extract_strided_slice %15 {offsets = [0, 96], sizes = [16, 32], strides = [1, 1]} : vector<16x128xbf16> to vector<16x32xbf16>
    %135 = vector.extract_strided_slice %17 {offsets = [0, 96], sizes = [16, 32], strides = [1, 1]} : vector<16x128xbf16> to vector<16x32xbf16>
    %cst_74 = arith.constant dense<0.000000e+00> : vector<16x16xf32>
    %136 = tpu.matmul %134, %135, %cst_74 {dimension_numbers = #tpu.dot_dimension_numbers<[1], [1], [0], [0], [0, 0, 1, 0], [], []>} : vector<16x32xbf16>, vector<16x32xbf16>, vector<16x16xf32> -> vector<16x16xf32>
    %137 = vector.broadcast %13 : vector<1x16xf32> to vector<16x16xf32>
    %138 = arith.addf %136, %137 : vector<16x16xf32>
    %c3 = arith.constant 3 : index
    %c0_75 = arith.constant 0 : index
    %c0_76 = arith.constant 0 : index
    %139 = vector.load %arg9[%c3, %c0_75, %c0_76] : memref<4x16x1xf32, #tpu.memory_space<vmem>>, vector<1x16x1xf32>
    %140 = vector.shape_cast %139 : vector<1x16x1xf32> to vector<16x1xf32>
    %cst_77 = arith.constant dense<0xFF800000> : vector<16xf32>
    %141 = vector.multi_reduction <maximumf>, %138, %cst_77 [1] : vector<16x16xf32> to vector<16xf32>
    %142 = vector.shape_cast %141 : vector<16xf32> to vector<16x1xf32>
    %143 = arith.maximumf %140, %142 : vector<16x1xf32>
    %144 = arith.subf %140, %143 : vector<16x1xf32>
    %145 = math.exp %144 : vector<16x1xf32>
    %146 = vector.broadcast %143 : vector<16x1xf32> to vector<16x16xf32>
    %147 = arith.subf %138, %146 : vector<16x16xf32>
    %148 = math.exp %147 : vector<16x16xf32>
    %c3_78 = arith.constant 3 : index
    %c0_79 = arith.constant 0 : index
    %c0_80 = arith.constant 0 : index
    %149 = vector.load %arg10[%c3_78, %c0_79, %c0_80] : memref<4x16x1xf32, #tpu.memory_space<vmem>>, vector<1x16x1xf32>
    %150 = vector.shape_cast %149 : vector<1x16x1xf32> to vector<16x1xf32>
    %151 = arith.mulf %145, %150 : vector<16x1xf32>
    %cst_81 = arith.constant dense<0.000000e+00> : vector<16xf32>
    %152 = vector.multi_reduction <add>, %148, %cst_81 [1] : vector<16x16xf32> to vector<16xf32>
    %153 = vector.shape_cast %152 : vector<16xf32> to vector<16x1xf32>
    %154 = arith.addf %151, %153 : vector<16x1xf32>
    %c3_82 = arith.constant 3 : index
    %c0_83 = arith.constant 0 : index
    %c0_84 = arith.constant 0 : index
    %155 = vector.load %arg10[%c3_82, %c0_83, %c0_84] : memref<4x16x1xf32, #tpu.memory_space<vmem>>, vector<1x16x1xf32>
    %156 = vector.shape_cast %155 : vector<1x16x1xf32> to vector<16x1xf32>
    %157 = vector.shape_cast %154 : vector<16x1xf32> to vector<1x16x1xf32>
    tpu.vector_store %arg10[%c3_82, %c0_83, %c0_84], %157 {strides = array<i32>} : memref<4x16x1xf32, #tpu.memory_space<vmem>>, vector<1x16x1xf32>,
    %158 = arith.truncf %148 : vector<16x16xf32> to vector<16x16xbf16>
    %159 = vector.extract_strided_slice %19 {offsets = [0, 96], sizes = [16, 32], strides = [1, 1]} : vector<16x128xbf16> to vector<16x32xbf16>
    %cst_85 = arith.constant dense<0.000000e+00> : vector<16x32xf32>
    %160 = tpu.matmul %158, %159, %cst_85 {dimension_numbers = #tpu.dot_dimension_numbers<[1], [0], [0], [1], [0, 0, 1, 1], [], []>} : vector<16x16xbf16>, vector<16x32xbf16>, vector<16x32xf32> -> vector<16x32xf32>
    %c3_86 = arith.constant 3 : index
    %c0_87 = arith.constant 0 : index
    %c0_88 = arith.constant 0 : index
    %161 = vector.load %arg11[%c3_86, %c0_87, %c0_88] : memref<4x16x32xf32, #tpu.memory_space<vmem>>, vector<1x16x32xf32>
    %162 = vector.shape_cast %161 : vector<1x16x32xf32> to vector<16x32xf32>
    %163 = vector.broadcast %145 : vector<16x1xf32> to vector<16x32xf32>
    %164 = arith.mulf %163, %162 : vector<16x32xf32>
    %165 = arith.addf %164, %160 : vector<16x32xf32>
    %c3_89 = arith.constant 3 : index
    %c0_90 = arith.constant 0 : index
    %c0_91 = arith.constant 0 : index
    %166 = vector.load %arg11[%c3_89, %c0_90, %c0_91] : memref<4x16x32xf32, #tpu.memory_space<vmem>>, vector<1x16x32xf32>
    %167 = vector.shape_cast %166 : vector<1x16x32xf32> to vector<16x32xf32>
    %168 = vector.shape_cast %165 : vector<16x32xf32> to vector<1x16x32xf32>
    tpu.vector_store %arg11[%c3_89, %c0_90, %c0_91], %168 {strides = array<i32>} : memref<4x16x32xf32, #tpu.memory_space<vmem>>, vector<1x16x32xf32>,
    %c3_92 = arith.constant 3 : index
    %c0_93 = arith.constant 0 : index
    %c0_94 = arith.constant 0 : index
    %169 = vector.load %arg9[%c3_92, %c0_93, %c0_94] : memref<4x16x1xf32, #tpu.memory_space<vmem>>, vector<1x16x1xf32>
    %170 = vector.shape_cast %169 : vector<1x16x1xf32> to vector<16x1xf32>
    %171 = vector.shape_cast %143 : vector<16x1xf32> to vector<1x16x1xf32>
    tpu.vector_store %arg9[%c3_92, %c0_93, %c0_94], %171 {strides = array<i32>} : memref<4x16x1xf32, #tpu.memory_space<vmem>>, vector<1x16x1xf32>,
    %c0_i32_95 = arith.constant 0 : i32
    %172 = arith.cmpi eq, %arg3, %c0_i32_95 : i32
    %173 = arith.extui %172 : i1 to i32
    %c0_i32_96 = arith.constant 0 : i32
    %174 = arith.cmpi ne, %173, %c0_i32_96 : i32
    scf.if %174 {
      %c0_97 = arith.constant 0 : index
      %c0_98 = arith.constant 0 : index
      %c0_99 = arith.constant 0 : index
      %175 = vector.load %arg11[%c0_97, %c0_98, %c0_99] : memref<4x16x32xf32, #tpu.memory_space<vmem>>, vector<1x16x32xf32>
      %176 = vector.shape_cast %175 : vector<1x16x32xf32> to vector<16x32xf32>
      %c0_100 = arith.constant 0 : index
      %c0_101 = arith.constant 0 : index
      %c0_102 = arith.constant 0 : index
      %177 = vector.load %arg10[%c0_100, %c0_101, %c0_102] : memref<4x16x1xf32, #tpu.memory_space<vmem>>, vector<1x16x1xf32>
      %178 = vector.shape_cast %177 : vector<1x16x1xf32> to vector<16x1xf32>
      %179 = vector.broadcast %178 : vector<16x1xf32> to vector<16x32xf32>
      %180 = arith.divf %176, %179 : vector<16x32xf32>
      %c1_103 = arith.constant 1 : index
      %c0_104 = arith.constant 0 : index
      %c0_105 = arith.constant 0 : index
      %181 = vector.load %arg11[%c1_103, %c0_104, %c0_105] : memref<4x16x32xf32, #tpu.memory_space<vmem>>, vector<1x16x32xf32>
      %182 = vector.shape_cast %181 : vector<1x16x32xf32> to vector<16x32xf32>
      %c1_106 = arith.constant 1 : index
      %c0_107 = arith.constant 0 : index
      %c0_108 = arith.constant 0 : index
      %183 = vector.load %arg10[%c1_106, %c0_107, %c0_108] : memref<4x16x1xf32, #tpu.memory_space<vmem>>, vector<1x16x1xf32>
      %184 = vector.shape_cast %183 : vector<1x16x1xf32> to vector<16x1xf32>
      %185 = vector.broadcast %184 : vector<16x1xf32> to vector<16x32xf32>
      %186 = arith.divf %182, %185 : vector<16x32xf32>
      %c2_109 = arith.constant 2 : index
      %c0_110 = arith.constant 0 : index
      %c0_111 = arith.constant 0 : index
      %187 = vector.load %arg11[%c2_109, %c0_110, %c0_111] : memref<4x16x32xf32, #tpu.memory_space<vmem>>, vector<1x16x32xf32>
      %188 = vector.shape_cast %187 : vector<1x16x32xf32> to vector<16x32xf32>
      %c2_112 = arith.constant 2 : index
      %c0_113 = arith.constant 0 : index
      %c0_114 = arith.constant 0 : index
      %189 = vector.load %arg10[%c2_112, %c0_113, %c0_114] : memref<4x16x1xf32, #tpu.memory_space<vmem>>, vector<1x16x1xf32>
      %190 = vector.shape_cast %189 : vector<1x16x1xf32> to vector<16x1xf32>
      %191 = vector.broadcast %190 : vector<16x1xf32> to vector<16x32xf32>
      %192 = arith.divf %188, %191 : vector<16x32xf32>
      %c3_115 = arith.constant 3 : index
      %c0_116 = arith.constant 0 : index
      %c0_117 = arith.constant 0 : index
      %193 = vector.load %arg11[%c3_115, %c0_116, %c0_117] : memref<4x16x32xf32, #tpu.memory_space<vmem>>, vector<1x16x32xf32>
      %194 = vector.shape_cast %193 : vector<1x16x32xf32> to vector<16x32xf32>
      %c3_118 = arith.constant 3 : index
      %c0_119 = arith.constant 0 : index
      %c0_120 = arith.constant 0 : index
      %195 = vector.load %arg10[%c3_118, %c0_119, %c0_120] : memref<4x16x1xf32, #tpu.memory_space<vmem>>, vector<1x16x1xf32>
      %196 = vector.shape_cast %195 : vector<1x16x1xf32> to vector<16x1xf32>
      %197 = vector.broadcast %196 : vector<16x1xf32> to vector<16x32xf32>
      %198 = arith.divf %194, %197 : vector<16x32xf32>
      %199 = tpu.concatenate %180, %186, %192, %198 in 1 : vector<16x32xf32>, vector<16x32xf32>, vector<16x32xf32>, vector<16x32xf32> -> vector<16x128xf32>
      %200 = arith.truncf %199 : vector<16x128xf32> to vector<16x128xbf16>
      %c0_121 = arith.constant 0 : index
      %c0_122 = arith.constant 0 : index
      %c0_123 = arith.constant 0 : index
      %201 = vector.load %arg8[%c0_121, %c0_122, %c0_123] : memref<1x16x128xbf16, #tpu.memory_space<vmem>>, vector<1x16x128xbf16>
      %202 = vector.shape_cast %201 : vector<1x16x128xbf16> to vector<16x128xbf16>
      %203 = vector.shape_cast %200 : vector<16x128xbf16> to vector<1x16x128xbf16>
      tpu.vector_store %arg8[%c0_121, %c0_122, %c0_123], %203 {strides = array<i32>} : memref<1x16x128xbf16, #tpu.memory_space<vmem>>, vector<1x16x128xbf16>,
    } else {
    }
    return
  }
  func.func @transform_0(%arg0: i32, %arg1: i32, %arg2: i32, %arg3: i32, %arg4: memref<2xi32, #tpu.memory_space<smem>>) -> (i32, i32, i32) {
    %c0_i32 = arith.constant 0 : i32
    return %arg0, %arg2, %arg1 : i32, i32, i32
  }
  func.func @transform_1(%arg0: i32, %arg1: i32, %arg2: i32, %arg3: i32, %arg4: memref<2xi32, #tpu.memory_space<smem>>) -> (i32, i32, i32) {
    %c1_i32 = arith.constant 1 : i32
    %0 = arith.addi %c1_i32, %arg1 : i32
    %c0_i32 = arith.constant 0 : i32
    return %arg0, %arg3, %0 : i32, i32, i32
  }
  func.func @transform_2(%arg0: i32, %arg1: i32, %arg2: i32, %arg3: i32, %arg4: memref<2xi32, #tpu.memory_space<smem>>) -> (i32, i32, i32) {
    %c2_i32 = arith.constant 2 : i32
    %0 = arith.addi %c2_i32, %arg1 : i32
    %c0_i32 = arith.constant 0 : i32
    return %arg0, %arg3, %0 : i32, i32, i32
  }
  func.func @transform_3(%arg0: i32, %arg1: i32, %arg2: i32, %arg3: i32, %arg4: memref<2xi32, #tpu.memory_space<smem>>) -> (i32, i32, i32) {
    %c0_i32 = arith.constant 0 : i32
    return %arg0, %arg2, %arg1 : i32, i32, i32
  }
}

module attributes {stable_mosaic.version = 11 : i64} {
  func.func @_ln_linear_kernel(%arg0: i32, %arg1: i32, %arg2: memref<32x128xbf16, #tpu.memory_space<vmem>>, %arg3: memref<1x128xf32, #tpu.memory_space<vmem>>, %arg4: memref<1x128xf32, #tpu.memory_space<vmem>>, %arg5: memref<128x384xbf16, #tpu.memory_space<vmem>>, %arg6: memref<1x384xf32, #tpu.memory_space<vmem>>, %arg7: memref<32x384xbf16, #tpu.memory_space<vmem>>, %arg8: memref<32x128xbf16, #tpu.memory_space<vmem>>) attributes {dimension_semantics = [#tpu.dimension_semantics<parallel>, #tpu.dimension_semantics<arbitrary>], iteration_bounds = array<i64: 1, 1>, scalar_prefetch = 0 : i64, scratch_operands = 1 : i64, tpu.core_type = #tpu.core_type<tc>, window_params = [{transform_indices = @transform_0, window_bounds = array<i64: 32, 128>}, {pipeline_mode = #tpu.pipeline_mode<synchronous>, transform_indices = @transform_1, window_bounds = array<i64: 1, 128>}, {pipeline_mode = #tpu.pipeline_mode<synchronous>, transform_indices = @transform_2, window_bounds = array<i64: 1, 128>}, {transform_indices = @transform_3, window_bounds = array<i64: 128, 384>}, {transform_indices = @transform_4, window_bounds = array<i64: 1, 384>}, {transform_indices = @transform_5, window_bounds = array<i64: 32, 384>}]} {
    %c0_i32 = arith.constant 0 : i32
    %0 = arith.cmpi eq, %arg1, %c0_i32 : i32
    %1 = arith.extui %0 : i1 to i32
    %c0_i32_0 = arith.constant 0 : i32
    %2 = arith.cmpi ne, %1, %c0_i32_0 : i32
    scf.if %2 {
      %c0_8 = arith.constant 0 : index
      %c0_9 = arith.constant 0 : index
      %11 = vector.load %arg2[%c0_8, %c0_9] : memref<32x128xbf16, #tpu.memory_space<vmem>>, vector<32x128xbf16>
      %12 = arith.extf %11 : vector<32x128xbf16> to vector<32x128xf32>
      %cst_10 = arith.constant dense<0.000000e+00> : vector<32xf32>
      %13 = vector.multi_reduction <add>, %12, %cst_10 [1] : vector<32x128xf32> to vector<32xf32>
      %14 = vector.shape_cast %13 : vector<32xf32> to vector<32x1xf32>
      %cst_11 = arith.constant 1.280000e+02 : f32
      %15 = vector.broadcast %cst_11 : f32 to vector<32x1xf32>
      %16 = arith.divf %14, %15 : vector<32x1xf32>
      %17 = vector.broadcast %16 : vector<32x1xf32> to vector<32x128xf32>
      %18 = arith.subf %12, %17 : vector<32x128xf32>
      %19 = arith.mulf %18, %18 : vector<32x128xf32>
      %cst_12 = arith.constant dense<0.000000e+00> : vector<32xf32>
      %20 = vector.multi_reduction <add>, %19, %cst_12 [1] : vector<32x128xf32> to vector<32xf32>
      %21 = vector.shape_cast %20 : vector<32xf32> to vector<32x1xf32>
      %cst_13 = arith.constant 1.280000e+02 : f32
      %22 = vector.broadcast %cst_13 : f32 to vector<32x1xf32>
      %23 = arith.divf %21, %22 : vector<32x1xf32>
      %24 = vector.broadcast %16 : vector<32x1xf32> to vector<32x128xf32>
      %25 = arith.subf %12, %24 : vector<32x128xf32>
      %cst_14 = arith.constant 9.99999974E-6 : f32
      %26 = vector.broadcast %cst_14 : f32 to vector<32x1xf32>
      %27 = arith.addf %23, %26 : vector<32x1xf32>
      %28 = math.rsqrt %27 : vector<32x1xf32>
      %29 = vector.broadcast %28 : vector<32x1xf32> to vector<32x128xf32>
      %30 = arith.mulf %25, %29 : vector<32x128xf32>
      %c0_15 = arith.constant 0 : index
      %c0_16 = arith.constant 0 : index
      %31 = vector.load %arg3[%c0_15, %c0_16] : memref<1x128xf32, #tpu.memory_space<vmem>>, vector<1x128xf32>
      %32 = vector.broadcast %31 : vector<1x128xf32> to vector<32x128xf32>
      %33 = arith.mulf %30, %32 : vector<32x128xf32>
      %c0_17 = arith.constant 0 : index
      %c0_18 = arith.constant 0 : index
      %34 = vector.load %arg4[%c0_17, %c0_18] : memref<1x128xf32, #tpu.memory_space<vmem>>, vector<1x128xf32>
      %35 = vector.broadcast %34 : vector<1x128xf32> to vector<32x128xf32>
      %36 = arith.addf %33, %35 : vector<32x128xf32>
      %37 = arith.truncf %36 : vector<32x128xf32> to vector<32x128xbf16>
      %c0_19 = arith.constant 0 : index
      %c0_20 = arith.constant 0 : index
      %38 = vector.load %arg8[%c0_19, %c0_20] : memref<32x128xbf16, #tpu.memory_space<vmem>>, vector<32x128xbf16>
      tpu.vector_store %arg8[%c0_19, %c0_20], %37 {strides = array<i32>} : memref<32x128xbf16, #tpu.memory_space<vmem>>, vector<32x128xbf16>,
    } else {
    }
    %c0 = arith.constant 0 : index
    %c0_1 = arith.constant 0 : index
    %3 = vector.load %arg8[%c0, %c0_1] : memref<32x128xbf16, #tpu.memory_space<vmem>>, vector<32x128xbf16>
    %c0_2 = arith.constant 0 : index
    %c0_3 = arith.constant 0 : index
    %4 = vector.load %arg5[%c0_2, %c0_3] : memref<128x384xbf16, #tpu.memory_space<vmem>>, vector<128x384xbf16>
    %cst = arith.constant dense<0.000000e+00> : vector<32x384xf32>
    %5 = tpu.matmul %3, %4, %cst {dimension_numbers = #tpu.dot_dimension_numbers<[1], [0], [0], [1], [0, 0, 1, 1], [], []>} : vector<32x128xbf16>, vector<128x384xbf16>, vector<32x384xf32> -> vector<32x384xf32>
    %c0_4 = arith.constant 0 : index
    %c0_5 = arith.constant 0 : index
    %6 = vector.load %arg6[%c0_4, %c0_5] : memref<1x384xf32, #tpu.memory_space<vmem>>, vector<1x384xf32>
    %7 = vector.broadcast %6 : vector<1x384xf32> to vector<32x384xf32>
    %8 = arith.addf %5, %7 : vector<32x384xf32>
    %9 = arith.truncf %8 : vector<32x384xf32> to vector<32x384xbf16>
    %c0_6 = arith.constant 0 : index
    %c0_7 = arith.constant 0 : index
    %10 = vector.load %arg7[%c0_6, %c0_7] : memref<32x384xbf16, #tpu.memory_space<vmem>>, vector<32x384xbf16>
    tpu.vector_store %arg7[%c0_6, %c0_7], %9 {strides = array<i32>} : memref<32x384xbf16, #tpu.memory_space<vmem>>, vector<32x384xbf16>,
    return
  }
  func.func @transform_0(%arg0: i32, %arg1: i32) -> (i32, i32) {
    %c0_i32 = arith.constant 0 : i32
    %c0_i32_0 = arith.constant 0 : i32
    return %arg0, %c0_i32 : i32, i32
  }
  func.func @transform_1(%arg0: i32, %arg1: i32) -> (i32, i32) {
    %c0_i32 = arith.constant 0 : i32
    %c0_i32_0 = arith.constant 0 : i32
    %c0_i32_1 = arith.constant 0 : i32
    return %c0_i32, %c0_i32_0 : i32, i32
  }
  func.func @transform_2(%arg0: i32, %arg1: i32) -> (i32, i32) {
    %c0_i32 = arith.constant 0 : i32
    %c0_i32_0 = arith.constant 0 : i32
    %c0_i32_1 = arith.constant 0 : i32
    return %c0_i32, %c0_i32_0 : i32, i32
  }
  func.func @transform_3(%arg0: i32, %arg1: i32) -> (i32, i32) {
    %c0_i32 = arith.constant 0 : i32
    %c0_i32_0 = arith.constant 0 : i32
    return %c0_i32, %arg1 : i32, i32
  }
  func.func @transform_4(%arg0: i32, %arg1: i32) -> (i32, i32) {
    %c0_i32 = arith.constant 0 : i32
    %c0_i32_0 = arith.constant 0 : i32
    return %c0_i32, %arg1 : i32, i32
  }
  func.func @transform_5(%arg0: i32, %arg1: i32) -> (i32, i32) {
    %c0_i32 = arith.constant 0 : i32
    return %arg0, %arg1 : i32, i32
  }
}

module attributes {stable_mosaic.version = 11 : i64} {
  func.func @_linear_kernel(%arg0: i32, %arg1: i32, %arg2: i32, %arg3: memref<32x128xbf16, #tpu.memory_space<vmem>>, %arg4: memref<128x128xbf16, #tpu.memory_space<vmem>>, %arg5: memref<1x128xf32, #tpu.memory_space<vmem>>, %arg6: memref<32x128xbf16, #tpu.memory_space<vmem>>, %arg7: memref<32x128xbf16, #tpu.memory_space<vmem>>, %arg8: memref<32x128xf32, #tpu.memory_space<vmem>>) attributes {dimension_semantics = [#tpu.dimension_semantics<parallel>, #tpu.dimension_semantics<parallel>, #tpu.dimension_semantics<arbitrary>], iteration_bounds = array<i64: 1, 1, 1>, scalar_prefetch = 0 : i64, scratch_operands = 1 : i64, tpu.core_type = #tpu.core_type<tc>, window_params = [{transform_indices = @transform_0, window_bounds = array<i64: 32, 128>}, {transform_indices = @transform_1, window_bounds = array<i64: 128, 128>}, {transform_indices = @transform_2, window_bounds = array<i64: 1, 128>}, {transform_indices = @transform_3, window_bounds = array<i64: 32, 128>}, {transform_indices = @transform_4, window_bounds = array<i64: 32, 128>}]} {
    %c0_i32 = arith.constant 0 : i32
    %0 = arith.cmpi eq, %arg2, %c0_i32 : i32
    %1 = arith.extui %0 : i1 to i32
    %c0_i32_0 = arith.constant 0 : i32
    %2 = arith.cmpi ne, %1, %c0_i32_0 : i32
    scf.if %2 {
      %cst_10 = arith.constant 0.000000e+00 : f32
      %12 = vector.broadcast %cst_10 : f32 to vector<32x128xf32>
      %c0_11 = arith.constant 0 : index
      %c0_12 = arith.constant 0 : index
      %13 = vector.load %arg8[%c0_11, %c0_12] : memref<32x128xf32, #tpu.memory_space<vmem>>, vector<32x128xf32>
      tpu.vector_store %arg8[%c0_11, %c0_12], %12 {strides = array<i32>} : memref<32x128xf32, #tpu.memory_space<vmem>>, vector<32x128xf32>,
    } else {
    }
    %c0 = arith.constant 0 : index
    %c0_1 = arith.constant 0 : index
    %3 = vector.load %arg8[%c0, %c0_1] : memref<32x128xf32, #tpu.memory_space<vmem>>, vector<32x128xf32>
    %c0_2 = arith.constant 0 : index
    %c0_3 = arith.constant 0 : index
    %4 = vector.load %arg3[%c0_2, %c0_3] : memref<32x128xbf16, #tpu.memory_space<vmem>>, vector<32x128xbf16>
    %c0_4 = arith.constant 0 : index
    %c0_5 = arith.constant 0 : index
    %5 = vector.load %arg4[%c0_4, %c0_5] : memref<128x128xbf16, #tpu.memory_space<vmem>>, vector<128x128xbf16>
    %cst = arith.constant dense<0.000000e+00> : vector<32x128xf32>
    %6 = tpu.matmul %4, %5, %cst {dimension_numbers = #tpu.dot_dimension_numbers<[1], [0], [0], [1], [0, 0, 1, 1], [], []>} : vector<32x128xbf16>, vector<128x128xbf16>, vector<32x128xf32> -> vector<32x128xf32>
    %7 = arith.addf %3, %6 : vector<32x128xf32>
    %c0_6 = arith.constant 0 : index
    %c0_7 = arith.constant 0 : index
    %8 = vector.load %arg8[%c0_6, %c0_7] : memref<32x128xf32, #tpu.memory_space<vmem>>, vector<32x128xf32>
    tpu.vector_store %arg8[%c0_6, %c0_7], %7 {strides = array<i32>} : memref<32x128xf32, #tpu.memory_space<vmem>>, vector<32x128xf32>,
    %c0_i32_8 = arith.constant 0 : i32
    %9 = arith.cmpi eq, %arg2, %c0_i32_8 : i32
    %10 = arith.extui %9 : i1 to i32
    %c0_i32_9 = arith.constant 0 : i32
    %11 = arith.cmpi ne, %10, %c0_i32_9 : i32
    scf.if %11 {
      %c0_10 = arith.constant 0 : index
      %c0_11 = arith.constant 0 : index
      %12 = vector.load %arg8[%c0_10, %c0_11] : memref<32x128xf32, #tpu.memory_space<vmem>>, vector<32x128xf32>
      %c0_12 = arith.constant 0 : index
      %c0_13 = arith.constant 0 : index
      %13 = vector.load %arg5[%c0_12, %c0_13] : memref<1x128xf32, #tpu.memory_space<vmem>>, vector<1x128xf32>
      %14 = vector.broadcast %13 : vector<1x128xf32> to vector<32x128xf32>
      %15 = arith.addf %12, %14 : vector<32x128xf32>
      %c0_14 = arith.constant 0 : index
      %c0_15 = arith.constant 0 : index
      %16 = vector.load %arg6[%c0_14, %c0_15] : memref<32x128xbf16, #tpu.memory_space<vmem>>, vector<32x128xbf16>
      %17 = arith.extf %16 : vector<32x128xbf16> to vector<32x128xf32>
      %18 = arith.addf %15, %17 : vector<32x128xf32>
      %19 = arith.truncf %18 : vector<32x128xf32> to vector<32x128xbf16>
      %c0_16 = arith.constant 0 : index
      %c0_17 = arith.constant 0 : index
      %20 = vector.load %arg7[%c0_16, %c0_17] : memref<32x128xbf16, #tpu.memory_space<vmem>>, vector<32x128xbf16>
      tpu.vector_store %arg7[%c0_16, %c0_17], %19 {strides = array<i32>} : memref<32x128xbf16, #tpu.memory_space<vmem>>, vector<32x128xbf16>,
    } else {
    }
    return
  }
  func.func @transform_0(%arg0: i32, %arg1: i32, %arg2: i32) -> (i32, i32) {
    %c0_i32 = arith.constant 0 : i32
    return %arg0, %arg2 : i32, i32
  }
  func.func @transform_1(%arg0: i32, %arg1: i32, %arg2: i32) -> (i32, i32) {
    %c0_i32 = arith.constant 0 : i32
    return %arg2, %arg1 : i32, i32
  }
  func.func @transform_2(%arg0: i32, %arg1: i32, %arg2: i32) -> (i32, i32) {
    %c0_i32 = arith.constant 0 : i32
    %c0_i32_0 = arith.constant 0 : i32
    return %c0_i32, %arg1 : i32, i32
  }
  func.func @transform_3(%arg0: i32, %arg1: i32, %arg2: i32) -> (i32, i32) {
    %c0_i32 = arith.constant 0 : i32
    return %arg0, %arg1 : i32, i32
  }
  func.func @transform_4(%arg0: i32, %arg1: i32, %arg2: i32) -> (i32, i32) {
    %c0_i32 = arith.constant 0 : i32
    return %arg0, %arg1 : i32, i32
  }
}

module attributes {stable_mosaic.version = 11 : i64} {
  func.func @_ffn_kernel(%arg0: i32, %arg1: i32, %arg2: memref<32x128xbf16, #tpu.memory_space<vmem>>, %arg3: memref<1x128xf32, #tpu.memory_space<vmem>>, %arg4: memref<1x128xf32, #tpu.memory_space<vmem>>, %arg5: memref<128x256xbf16, #tpu.memory_space<vmem>>, %arg6: memref<1x256xf32, #tpu.memory_space<vmem>>, %arg7: memref<256x128xbf16, #tpu.memory_space<vmem>>, %arg8: memref<1x128xf32, #tpu.memory_space<vmem>>, %arg9: memref<32x128xbf16, #tpu.memory_space<vmem>>, %arg10: memref<32x128xf32, #tpu.memory_space<vmem>>, %arg11: memref<32x128xbf16, #tpu.memory_space<vmem>>) attributes {dimension_semantics = [#tpu.dimension_semantics<parallel>, #tpu.dimension_semantics<arbitrary>], iteration_bounds = array<i64: 1, 1>, scalar_prefetch = 0 : i64, scratch_operands = 2 : i64, tpu.core_type = #tpu.core_type<tc>, window_params = [{transform_indices = @transform_0, window_bounds = array<i64: 32, 128>}, {pipeline_mode = #tpu.pipeline_mode<synchronous>, transform_indices = @transform_1, window_bounds = array<i64: 1, 128>}, {pipeline_mode = #tpu.pipeline_mode<synchronous>, transform_indices = @transform_2, window_bounds = array<i64: 1, 128>}, {transform_indices = @transform_3, window_bounds = array<i64: 128, 256>}, {transform_indices = @transform_4, window_bounds = array<i64: 1, 256>}, {transform_indices = @transform_5, window_bounds = array<i64: 256, 128>}, {pipeline_mode = #tpu.pipeline_mode<synchronous>, transform_indices = @transform_6, window_bounds = array<i64: 1, 128>}, {transform_indices = @transform_7, window_bounds = array<i64: 32, 128>}]} {
    %c0_i32 = arith.constant 0 : i32
    %0 = arith.cmpi eq, %arg1, %c0_i32 : i32
    %1 = arith.extui %0 : i1 to i32
    %c0_i32_0 = arith.constant 0 : i32
    %2 = arith.cmpi ne, %1, %c0_i32_0 : i32
    scf.if %2 {
      %cst_16 = arith.constant 0.000000e+00 : f32
      %20 = vector.broadcast %cst_16 : f32 to vector<32x128xf32>
      %c0_17 = arith.constant 0 : index
      %c0_18 = arith.constant 0 : index
      %21 = vector.load %arg10[%c0_17, %c0_18] : memref<32x128xf32, #tpu.memory_space<vmem>>, vector<32x128xf32>
      tpu.vector_store %arg10[%c0_17, %c0_18], %20 {strides = array<i32>} : memref<32x128xf32, #tpu.memory_space<vmem>>, vector<32x128xf32>,
      %c0_19 = arith.constant 0 : index
      %c0_20 = arith.constant 0 : index
      %22 = vector.load %arg2[%c0_19, %c0_20] : memref<32x128xbf16, #tpu.memory_space<vmem>>, vector<32x128xbf16>
      %23 = arith.extf %22 : vector<32x128xbf16> to vector<32x128xf32>
      %cst_21 = arith.constant dense<0.000000e+00> : vector<32xf32>
      %24 = vector.multi_reduction <add>, %23, %cst_21 [1] : vector<32x128xf32> to vector<32xf32>
      %25 = vector.shape_cast %24 : vector<32xf32> to vector<32x1xf32>
      %cst_22 = arith.constant 1.280000e+02 : f32
      %26 = vector.broadcast %cst_22 : f32 to vector<32x1xf32>
      %27 = arith.divf %25, %26 : vector<32x1xf32>
      %28 = vector.broadcast %27 : vector<32x1xf32> to vector<32x128xf32>
      %29 = arith.subf %23, %28 : vector<32x128xf32>
      %30 = arith.mulf %29, %29 : vector<32x128xf32>
      %cst_23 = arith.constant dense<0.000000e+00> : vector<32xf32>
      %31 = vector.multi_reduction <add>, %30, %cst_23 [1] : vector<32x128xf32> to vector<32xf32>
      %32 = vector.shape_cast %31 : vector<32xf32> to vector<32x1xf32>
      %cst_24 = arith.constant 1.280000e+02 : f32
      %33 = vector.broadcast %cst_24 : f32 to vector<32x1xf32>
      %34 = arith.divf %32, %33 : vector<32x1xf32>
      %35 = vector.broadcast %27 : vector<32x1xf32> to vector<32x128xf32>
      %36 = arith.subf %23, %35 : vector<32x128xf32>
      %cst_25 = arith.constant 9.99999974E-6 : f32
      %37 = vector.broadcast %cst_25 : f32 to vector<32x1xf32>
      %38 = arith.addf %34, %37 : vector<32x1xf32>
      %39 = math.rsqrt %38 : vector<32x1xf32>
      %40 = vector.broadcast %39 : vector<32x1xf32> to vector<32x128xf32>
      %41 = arith.mulf %36, %40 : vector<32x128xf32>
      %c0_26 = arith.constant 0 : index
      %c0_27 = arith.constant 0 : index
      %42 = vector.load %arg3[%c0_26, %c0_27] : memref<1x128xf32, #tpu.memory_space<vmem>>, vector<1x128xf32>
      %43 = vector.broadcast %42 : vector<1x128xf32> to vector<32x128xf32>
      %44 = arith.mulf %41, %43 : vector<32x128xf32>
      %c0_28 = arith.constant 0 : index
      %c0_29 = arith.constant 0 : index
      %45 = vector.load %arg4[%c0_28, %c0_29] : memref<1x128xf32, #tpu.memory_space<vmem>>, vector<1x128xf32>
      %46 = vector.broadcast %45 : vector<1x128xf32> to vector<32x128xf32>
      %47 = arith.addf %44, %46 : vector<32x128xf32>
      %48 = arith.truncf %47 : vector<32x128xf32> to vector<32x128xbf16>
      %c0_30 = arith.constant 0 : index
      %c0_31 = arith.constant 0 : index
      %49 = vector.load %arg11[%c0_30, %c0_31] : memref<32x128xbf16, #tpu.memory_space<vmem>>, vector<32x128xbf16>
      tpu.vector_store %arg11[%c0_30, %c0_31], %48 {strides = array<i32>} : memref<32x128xbf16, #tpu.memory_space<vmem>>, vector<32x128xbf16>,
    } else {
    }
    %c0 = arith.constant 0 : index
    %c0_1 = arith.constant 0 : index
    %3 = vector.load %arg11[%c0, %c0_1] : memref<32x128xbf16, #tpu.memory_space<vmem>>, vector<32x128xbf16>
    %c0_2 = arith.constant 0 : index
    %c0_3 = arith.constant 0 : index
    %4 = vector.load %arg5[%c0_2, %c0_3] : memref<128x256xbf16, #tpu.memory_space<vmem>>, vector<128x256xbf16>
    %cst = arith.constant dense<0.000000e+00> : vector<32x256xf32>
    %5 = tpu.matmul %3, %4, %cst {dimension_numbers = #tpu.dot_dimension_numbers<[1], [0], [0], [1], [0, 0, 1, 1], [], []>} : vector<32x128xbf16>, vector<128x256xbf16>, vector<32x256xf32> -> vector<32x256xf32>
    %c0_4 = arith.constant 0 : index
    %c0_5 = arith.constant 0 : index
    %6 = vector.load %arg6[%c0_4, %c0_5] : memref<1x256xf32, #tpu.memory_space<vmem>>, vector<1x256xf32>
    %7 = vector.broadcast %6 : vector<1x256xf32> to vector<32x256xf32>
    %8 = arith.addf %5, %7 : vector<32x256xf32>
    %cst_6 = arith.constant 0.000000e+00 : f32
    %9 = vector.broadcast %cst_6 : f32 to vector<32x256xf32>
    %10 = arith.maximumf %8, %9 : vector<32x256xf32>
    %c0_7 = arith.constant 0 : index
    %c0_8 = arith.constant 0 : index
    %11 = vector.load %arg10[%c0_7, %c0_8] : memref<32x128xf32, #tpu.memory_space<vmem>>, vector<32x128xf32>
    %12 = arith.truncf %10 : vector<32x256xf32> to vector<32x256xbf16>
    %c0_9 = arith.constant 0 : index
    %c0_10 = arith.constant 0 : index
    %13 = vector.load %arg7[%c0_9, %c0_10] : memref<256x128xbf16, #tpu.memory_space<vmem>>, vector<256x128xbf16>
    %cst_11 = arith.constant dense<0.000000e+00> : vector<32x128xf32>
    %14 = tpu.matmul %12, %13, %cst_11 {dimension_numbers = #tpu.dot_dimension_numbers<[1], [0], [0], [1], [0, 0, 1, 1], [], []>} : vector<32x256xbf16>, vector<256x128xbf16>, vector<32x128xf32> -> vector<32x128xf32>
    %15 = arith.addf %11, %14 : vector<32x128xf32>
    %c0_12 = arith.constant 0 : index
    %c0_13 = arith.constant 0 : index
    %16 = vector.load %arg10[%c0_12, %c0_13] : memref<32x128xf32, #tpu.memory_space<vmem>>, vector<32x128xf32>
    tpu.vector_store %arg10[%c0_12, %c0_13], %15 {strides = array<i32>} : memref<32x128xf32, #tpu.memory_space<vmem>>, vector<32x128xf32>,
    %c0_i32_14 = arith.constant 0 : i32
    %17 = arith.cmpi eq, %arg1, %c0_i32_14 : i32
    %18 = arith.extui %17 : i1 to i32
    %c0_i32_15 = arith.constant 0 : i32
    %19 = arith.cmpi ne, %18, %c0_i32_15 : i32
    scf.if %19 {
      %c0_16 = arith.constant 0 : index
      %c0_17 = arith.constant 0 : index
      %20 = vector.load %arg10[%c0_16, %c0_17] : memref<32x128xf32, #tpu.memory_space<vmem>>, vector<32x128xf32>
      %c0_18 = arith.constant 0 : index
      %c0_19 = arith.constant 0 : index
      %21 = vector.load %arg8[%c0_18, %c0_19] : memref<1x128xf32, #tpu.memory_space<vmem>>, vector<1x128xf32>
      %22 = vector.broadcast %21 : vector<1x128xf32> to vector<32x128xf32>
      %23 = arith.addf %20, %22 : vector<32x128xf32>
      %c0_20 = arith.constant 0 : index
      %c0_21 = arith.constant 0 : index
      %24 = vector.load %arg2[%c0_20, %c0_21] : memref<32x128xbf16, #tpu.memory_space<vmem>>, vector<32x128xbf16>
      %25 = arith.extf %24 : vector<32x128xbf16> to vector<32x128xf32>
      %26 = arith.addf %23, %25 : vector<32x128xf32>
      %27 = arith.truncf %26 : vector<32x128xf32> to vector<32x128xbf16>
      %c0_22 = arith.constant 0 : index
      %c0_23 = arith.constant 0 : index
      %28 = vector.load %arg9[%c0_22, %c0_23] : memref<32x128xbf16, #tpu.memory_space<vmem>>, vector<32x128xbf16>
      tpu.vector_store %arg9[%c0_22, %c0_23], %27 {strides = array<i32>} : memref<32x128xbf16, #tpu.memory_space<vmem>>, vector<32x128xbf16>,
    } else {
    }
    return
  }
  func.func @transform_0(%arg0: i32, %arg1: i32) -> (i32, i32) {
    %c0_i32 = arith.constant 0 : i32
    %c0_i32_0 = arith.constant 0 : i32
    return %arg0, %c0_i32 : i32, i32
  }
  func.func @transform_1(%arg0: i32, %arg1: i32) -> (i32, i32) {
    %c0_i32 = arith.constant 0 : i32
    %c0_i32_0 = arith.constant 0 : i32
    %c0_i32_1 = arith.constant 0 : i32
    return %c0_i32, %c0_i32_0 : i32, i32
  }
  func.func @transform_2(%arg0: i32, %arg1: i32) -> (i32, i32) {
    %c0_i32 = arith.constant 0 : i32
    %c0_i32_0 = arith.constant 0 : i32
    %c0_i32_1 = arith.constant 0 : i32
    return %c0_i32, %c0_i32_0 : i32, i32
  }
  func.func @transform_3(%arg0: i32, %arg1: i32) -> (i32, i32) {
    %c0_i32 = arith.constant 0 : i32
    %c0_i32_0 = arith.constant 0 : i32
    return %c0_i32, %arg1 : i32, i32
  }
  func.func @transform_4(%arg0: i32, %arg1: i32) -> (i32, i32) {
    %c0_i32 = arith.constant 0 : i32
    %c0_i32_0 = arith.constant 0 : i32
    return %c0_i32, %arg1 : i32, i32
  }
  func.func @transform_5(%arg0: i32, %arg1: i32) -> (i32, i32) {
    %c0_i32 = arith.constant 0 : i32
    %c0_i32_0 = arith.constant 0 : i32
    return %arg1, %c0_i32 : i32, i32
  }
  func.func @transform_6(%arg0: i32, %arg1: i32) -> (i32, i32) {
    %c0_i32 = arith.constant 0 : i32
    %c0_i32_0 = arith.constant 0 : i32
    %c0_i32_1 = arith.constant 0 : i32
    return %c0_i32, %c0_i32_0 : i32, i32
  }
  func.func @transform_7(%arg0: i32, %arg1: i32) -> (i32, i32) {
    %c0_i32 = arith.constant 0 : i32
    %c0_i32_0 = arith.constant 0 : i32
    return %arg0, %c0_i32 : i32, i32
  }
}

module attributes {stable_mosaic.version = 11 : i64} {
  func.func @_ffn_kernel(%arg0: i32, %arg1: i32, %arg2: memref<32x128xbf16, #tpu.memory_space<vmem>>, %arg3: memref<1x128xf32, #tpu.memory_space<vmem>>, %arg4: memref<1x128xf32, #tpu.memory_space<vmem>>, %arg5: memref<128x256xbf16, #tpu.memory_space<vmem>>, %arg6: memref<1x256xf32, #tpu.memory_space<vmem>>, %arg7: memref<256x128xbf16, #tpu.memory_space<vmem>>, %arg8: memref<1x128xf32, #tpu.memory_space<vmem>>, %arg9: memref<32x128xbf16, #tpu.memory_space<vmem>>, %arg10: memref<32x128xf32, #tpu.memory_space<vmem>>, %arg11: memref<32x128xbf16, #tpu.memory_space<vmem>>) attributes {dimension_semantics = [#tpu.dimension_semantics<parallel>, #tpu.dimension_semantics<arbitrary>], iteration_bounds = array<i64: 1, 1>, scalar_prefetch = 0 : i64, scratch_operands = 2 : i64, tpu.core_type = #tpu.core_type<tc>, window_params = [{transform_indices = @transform_0, window_bounds = array<i64: 32, 128>}, {pipeline_mode = #tpu.pipeline_mode<synchronous>, transform_indices = @transform_1, window_bounds = array<i64: 1, 128>}, {pipeline_mode = #tpu.pipeline_mode<synchronous>, transform_indices = @transform_2, window_bounds = array<i64: 1, 128>}, {transform_indices = @transform_3, window_bounds = array<i64: 128, 256>}, {transform_indices = @transform_4, window_bounds = array<i64: 1, 256>}, {transform_indices = @transform_5, window_bounds = array<i64: 256, 128>}, {pipeline_mode = #tpu.pipeline_mode<synchronous>, transform_indices = @transform_6, window_bounds = array<i64: 1, 128>}, {transform_indices = @transform_7, window_bounds = array<i64: 32, 128>}]} {
    %c0_i32 = arith.constant 0 : i32
    %0 = arith.cmpi eq, %arg1, %c0_i32 : i32
    %1 = arith.extui %0 : i1 to i32
    %c0_i32_0 = arith.constant 0 : i32
    %2 = arith.cmpi ne, %1, %c0_i32_0 : i32
    scf.if %2 {
      %cst_16 = arith.constant 0.000000e+00 : f32
      %20 = vector.broadcast %cst_16 : f32 to vector<32x128xf32>
      %c0_17 = arith.constant 0 : index
      %c0_18 = arith.constant 0 : index
      %21 = vector.load %arg10[%c0_17, %c0_18] : memref<32x128xf32, #tpu.memory_space<vmem>>, vector<32x128xf32>
      tpu.vector_store %arg10[%c0_17, %c0_18], %20 {strides = array<i32>} : memref<32x128xf32, #tpu.memory_space<vmem>>, vector<32x128xf32>,
      %c0_19 = arith.constant 0 : index
      %c0_20 = arith.constant 0 : index
      %22 = vector.load %arg2[%c0_19, %c0_20] : memref<32x128xbf16, #tpu.memory_space<vmem>>, vector<32x128xbf16>
      %23 = arith.extf %22 : vector<32x128xbf16> to vector<32x128xf32>
      %cst_21 = arith.constant dense<0.000000e+00> : vector<32xf32>
      %24 = vector.multi_reduction <add>, %23, %cst_21 [1] : vector<32x128xf32> to vector<32xf32>
      %25 = vector.shape_cast %24 : vector<32xf32> to vector<32x1xf32>
      %cst_22 = arith.constant 1.280000e+02 : f32
      %26 = vector.broadcast %cst_22 : f32 to vector<32x1xf32>
      %27 = arith.divf %25, %26 : vector<32x1xf32>
      %28 = vector.broadcast %27 : vector<32x1xf32> to vector<32x128xf32>
      %29 = arith.subf %23, %28 : vector<32x128xf32>
      %30 = arith.mulf %29, %29 : vector<32x128xf32>
      %cst_23 = arith.constant dense<0.000000e+00> : vector<32xf32>
      %31 = vector.multi_reduction <add>, %30, %cst_23 [1] : vector<32x128xf32> to vector<32xf32>
      %32 = vector.shape_cast %31 : vector<32xf32> to vector<32x1xf32>
      %cst_24 = arith.constant 1.280000e+02 : f32
      %33 = vector.broadcast %cst_24 : f32 to vector<32x1xf32>
      %34 = arith.divf %32, %33 : vector<32x1xf32>
      %35 = vector.broadcast %27 : vector<32x1xf32> to vector<32x128xf32>
      %36 = arith.subf %23, %35 : vector<32x128xf32>
      %cst_25 = arith.constant 9.99999974E-6 : f32
      %37 = vector.broadcast %cst_25 : f32 to vector<32x1xf32>
      %38 = arith.addf %34, %37 : vector<32x1xf32>
      %39 = math.rsqrt %38 : vector<32x1xf32>
      %40 = vector.broadcast %39 : vector<32x1xf32> to vector<32x128xf32>
      %41 = arith.mulf %36, %40 : vector<32x128xf32>
      %c0_26 = arith.constant 0 : index
      %c0_27 = arith.constant 0 : index
      %42 = vector.load %arg3[%c0_26, %c0_27] : memref<1x128xf32, #tpu.memory_space<vmem>>, vector<1x128xf32>
      %43 = vector.broadcast %42 : vector<1x128xf32> to vector<32x128xf32>
      %44 = arith.mulf %41, %43 : vector<32x128xf32>
      %c0_28 = arith.constant 0 : index
      %c0_29 = arith.constant 0 : index
      %45 = vector.load %arg4[%c0_28, %c0_29] : memref<1x128xf32, #tpu.memory_space<vmem>>, vector<1x128xf32>
      %46 = vector.broadcast %45 : vector<1x128xf32> to vector<32x128xf32>
      %47 = arith.addf %44, %46 : vector<32x128xf32>
      %48 = arith.truncf %47 : vector<32x128xf32> to vector<32x128xbf16>
      %c0_30 = arith.constant 0 : index
      %c0_31 = arith.constant 0 : index
      %49 = vector.load %arg11[%c0_30, %c0_31] : memref<32x128xbf16, #tpu.memory_space<vmem>>, vector<32x128xbf16>
      tpu.vector_store %arg11[%c0_30, %c0_31], %48 {strides = array<i32>} : memref<32x128xbf16, #tpu.memory_space<vmem>>, vector<32x128xbf16>,
    } else {
    }
    %c0 = arith.constant 0 : index
    %c0_1 = arith.constant 0 : index
    %3 = vector.load %arg11[%c0, %c0_1] : memref<32x128xbf16, #tpu.memory_space<vmem>>, vector<32x128xbf16>
    %c0_2 = arith.constant 0 : index
    %c0_3 = arith.constant 0 : index
    %4 = vector.load %arg5[%c0_2, %c0_3] : memref<128x256xbf16, #tpu.memory_space<vmem>>, vector<128x256xbf16>
    %cst = arith.constant dense<0.000000e+00> : vector<32x256xf32>
    %5 = tpu.matmul %3, %4, %cst {dimension_numbers = #tpu.dot_dimension_numbers<[1], [0], [0], [1], [0, 0, 1, 1], [], []>} : vector<32x128xbf16>, vector<128x256xbf16>, vector<32x256xf32> -> vector<32x256xf32>
    %c0_4 = arith.constant 0 : index
    %c0_5 = arith.constant 0 : index
    %6 = vector.load %arg6[%c0_4, %c0_5] : memref<1x256xf32, #tpu.memory_space<vmem>>, vector<1x256xf32>
    %7 = vector.broadcast %6 : vector<1x256xf32> to vector<32x256xf32>
    %8 = arith.addf %5, %7 : vector<32x256xf32>
    %cst_6 = arith.constant 0.000000e+00 : f32
    %9 = vector.broadcast %cst_6 : f32 to vector<32x256xf32>
    %10 = arith.maximumf %8, %9 : vector<32x256xf32>
    %c0_7 = arith.constant 0 : index
    %c0_8 = arith.constant 0 : index
    %11 = vector.load %arg10[%c0_7, %c0_8] : memref<32x128xf32, #tpu.memory_space<vmem>>, vector<32x128xf32>
    %12 = arith.truncf %10 : vector<32x256xf32> to vector<32x256xbf16>
    %c0_9 = arith.constant 0 : index
    %c0_10 = arith.constant 0 : index
    %13 = vector.load %arg7[%c0_9, %c0_10] : memref<256x128xbf16, #tpu.memory_space<vmem>>, vector<256x128xbf16>
    %cst_11 = arith.constant dense<0.000000e+00> : vector<32x128xf32>
    %14 = tpu.matmul %12, %13, %cst_11 {dimension_numbers = #tpu.dot_dimension_numbers<[1], [0], [0], [1], [0, 0, 1, 1], [], []>} : vector<32x256xbf16>, vector<256x128xbf16>, vector<32x128xf32> -> vector<32x128xf32>
    %15 = arith.addf %11, %14 : vector<32x128xf32>
    %c0_12 = arith.constant 0 : index
    %c0_13 = arith.constant 0 : index
    %16 = vector.load %arg10[%c0_12, %c0_13] : memref<32x128xf32, #tpu.memory_space<vmem>>, vector<32x128xf32>
    tpu.vector_store %arg10[%c0_12, %c0_13], %15 {strides = array<i32>} : memref<32x128xf32, #tpu.memory_space<vmem>>, vector<32x128xf32>,
    %c0_i32_14 = arith.constant 0 : i32
    %17 = arith.cmpi eq, %arg1, %c0_i32_14 : i32
    %18 = arith.extui %17 : i1 to i32
    %c0_i32_15 = arith.constant 0 : i32
    %19 = arith.cmpi ne, %18, %c0_i32_15 : i32
    scf.if %19 {
      %c0_16 = arith.constant 0 : index
      %c0_17 = arith.constant 0 : index
      %20 = vector.load %arg10[%c0_16, %c0_17] : memref<32x128xf32, #tpu.memory_space<vmem>>, vector<32x128xf32>
      %c0_18 = arith.constant 0 : index
      %c0_19 = arith.constant 0 : index
      %21 = vector.load %arg8[%c0_18, %c0_19] : memref<1x128xf32, #tpu.memory_space<vmem>>, vector<1x128xf32>
      %22 = vector.broadcast %21 : vector<1x128xf32> to vector<32x128xf32>
      %23 = arith.addf %20, %22 : vector<32x128xf32>
      %c0_20 = arith.constant 0 : index
      %c0_21 = arith.constant 0 : index
      %24 = vector.load %arg2[%c0_20, %c0_21] : memref<32x128xbf16, #tpu.memory_space<vmem>>, vector<32x128xbf16>
      %25 = arith.extf %24 : vector<32x128xbf16> to vector<32x128xf32>
      %26 = arith.addf %23, %25 : vector<32x128xf32>
      %27 = arith.truncf %26 : vector<32x128xf32> to vector<32x128xbf16>
      %c0_22 = arith.constant 0 : index
      %c0_23 = arith.constant 0 : index
      %28 = vector.load %arg9[%c0_22, %c0_23] : memref<32x128xbf16, #tpu.memory_space<vmem>>, vector<32x128xbf16>
      tpu.vector_store %arg9[%c0_22, %c0_23], %27 {strides = array<i32>} : memref<32x128xbf16, #tpu.memory_space<vmem>>, vector<32x128xbf16>,
    } else {
    }
    return
  }
  func.func @transform_0(%arg0: i32, %arg1: i32) -> (i32, i32) {
    %c0_i32 = arith.constant 0 : i32
    %c0_i32_0 = arith.constant 0 : i32
    return %arg0, %c0_i32 : i32, i32
  }
  func.func @transform_1(%arg0: i32, %arg1: i32) -> (i32, i32) {
    %c0_i32 = arith.constant 0 : i32
    %c0_i32_0 = arith.constant 0 : i32
    %c0_i32_1 = arith.constant 0 : i32
    return %c0_i32, %c0_i32_0 : i32, i32
  }
  func.func @transform_2(%arg0: i32, %arg1: i32) -> (i32, i32) {
    %c0_i32 = arith.constant 0 : i32
    %c0_i32_0 = arith.constant 0 : i32
    %c0_i32_1 = arith.constant 0 : i32
    return %c0_i32, %c0_i32_0 : i32, i32
  }
  func.func @transform_3(%arg0: i32, %arg1: i32) -> (i32, i32) {
    %c0_i32 = arith.constant 0 : i32
    %c0_i32_0 = arith.constant 0 : i32
    return %c0_i32, %arg1 : i32, i32
  }
  func.func @transform_4(%arg0: i32, %arg1: i32) -> (i32, i32) {
    %c0_i32 = arith.constant 0 : i32
    %c0_i32_0 = arith.constant 0 : i32
    return %c0_i32, %arg1 : i32, i32
  }
  func.func @transform_5(%arg0: i32, %arg1: i32) -> (i32, i32) {
    %c0_i32 = arith.constant 0 : i32
    %c0_i32_0 = arith.constant 0 : i32
    return %arg1, %c0_i32 : i32, i32
  }
  func.func @transform_6(%arg0: i32, %arg1: i32) -> (i32, i32) {
    %c0_i32 = arith.constant 0 : i32
    %c0_i32_0 = arith.constant 0 : i32
    %c0_i32_1 = arith.constant 0 : i32
    return %c0_i32, %c0_i32_0 : i32, i32
  }
  func.func @transform_7(%arg0: i32, %arg1: i32) -> (i32, i32) {
    %c0_i32 = arith.constant 0 : i32
    %c0_i32_0 = arith.constant 0 : i32
    return %arg0, %c0_i32 : i32, i32
  }
}

module attributes {stable_mosaic.version = 11 : i64} {
  func.func @_layernorm_kernel(%arg0: i32, %arg1: memref<32x128xbf16, #tpu.memory_space<vmem>>, %arg2: memref<1x128xf32, #tpu.memory_space<vmem>>, %arg3: memref<1x128xf32, #tpu.memory_space<vmem>>, %arg4: memref<32x128xf32, #tpu.memory_space<vmem>>) attributes {dimension_semantics = [#tpu.dimension_semantics<parallel>], iteration_bounds = array<i64: 1>, scalar_prefetch = 0 : i64, scratch_operands = 0 : i64, tpu.core_type = #tpu.core_type<tc>, window_params = [{transform_indices = @transform_0, window_bounds = array<i64: 32, 128>}, {pipeline_mode = #tpu.pipeline_mode<synchronous>, transform_indices = @transform_1, window_bounds = array<i64: 1, 128>}, {pipeline_mode = #tpu.pipeline_mode<synchronous>, transform_indices = @transform_2, window_bounds = array<i64: 1, 128>}, {transform_indices = @transform_3, window_bounds = array<i64: 32, 128>}]} {
    %c0 = arith.constant 0 : index
    %c0_0 = arith.constant 0 : index
    %0 = vector.load %arg1[%c0, %c0_0] : memref<32x128xbf16, #tpu.memory_space<vmem>>, vector<32x128xbf16>
    %1 = arith.extf %0 : vector<32x128xbf16> to vector<32x128xf32>
    %cst = arith.constant dense<0.000000e+00> : vector<32xf32>
    %2 = vector.multi_reduction <add>, %1, %cst [1] : vector<32x128xf32> to vector<32xf32>
    %3 = vector.shape_cast %2 : vector<32xf32> to vector<32x1xf32>
    %cst_1 = arith.constant 1.280000e+02 : f32
    %4 = vector.broadcast %cst_1 : f32 to vector<32x1xf32>
    %5 = arith.divf %3, %4 : vector<32x1xf32>
    %6 = vector.broadcast %5 : vector<32x1xf32> to vector<32x128xf32>
    %7 = arith.subf %1, %6 : vector<32x128xf32>
    %8 = arith.mulf %7, %7 : vector<32x128xf32>
    %cst_2 = arith.constant dense<0.000000e+00> : vector<32xf32>
    %9 = vector.multi_reduction <add>, %8, %cst_2 [1] : vector<32x128xf32> to vector<32xf32>
    %10 = vector.shape_cast %9 : vector<32xf32> to vector<32x1xf32>
    %cst_3 = arith.constant 1.280000e+02 : f32
    %11 = vector.broadcast %cst_3 : f32 to vector<32x1xf32>
    %12 = arith.divf %10, %11 : vector<32x1xf32>
    %13 = vector.broadcast %5 : vector<32x1xf32> to vector<32x128xf32>
    %14 = arith.subf %1, %13 : vector<32x128xf32>
    %cst_4 = arith.constant 9.99999974E-6 : f32
    %15 = vector.broadcast %cst_4 : f32 to vector<32x1xf32>
    %16 = arith.addf %12, %15 : vector<32x1xf32>
    %17 = math.rsqrt %16 : vector<32x1xf32>
    %18 = vector.broadcast %17 : vector<32x1xf32> to vector<32x128xf32>
    %19 = arith.mulf %14, %18 : vector<32x128xf32>
    %c0_5 = arith.constant 0 : index
    %c0_6 = arith.constant 0 : index
    %20 = vector.load %arg2[%c0_5, %c0_6] : memref<1x128xf32, #tpu.memory_space<vmem>>, vector<1x128xf32>
    %21 = vector.broadcast %20 : vector<1x128xf32> to vector<32x128xf32>
    %22 = arith.mulf %19, %21 : vector<32x128xf32>
    %c0_7 = arith.constant 0 : index
    %c0_8 = arith.constant 0 : index
    %23 = vector.load %arg3[%c0_7, %c0_8] : memref<1x128xf32, #tpu.memory_space<vmem>>, vector<1x128xf32>
    %24 = vector.broadcast %23 : vector<1x128xf32> to vector<32x128xf32>
    %25 = arith.addf %22, %24 : vector<32x128xf32>
    %c0_9 = arith.constant 0 : index
    %c0_10 = arith.constant 0 : index
    %26 = vector.load %arg4[%c0_9, %c0_10] : memref<32x128xf32, #tpu.memory_space<vmem>>, vector<32x128xf32>
    tpu.vector_store %arg4[%c0_9, %c0_10], %25 {strides = array<i32>} : memref<32x128xf32, #tpu.memory_space<vmem>>, vector<32x128xf32>,
    return
  }
  func.func @transform_0(%arg0: i32) -> (i32, i32) {
    %c0_i32 = arith.constant 0 : i32
    %c0_i32_0 = arith.constant 0 : i32
    return %arg0, %c0_i32 : i32, i32
  }
  func.func @transform_1(%arg0: i32) -> (i32, i32) {
    %c0_i32 = arith.constant 0 : i32
    %c0_i32_0 = arith.constant 0 : i32
    %c0_i32_1 = arith.constant 0 : i32
    return %c0_i32, %c0_i32_0 : i32, i32
  }
  func.func @transform_2(%arg0: i32) -> (i32, i32) {
    %c0_i32 = arith.constant 0 : i32
    %c0_i32_0 = arith.constant 0 : i32
    %c0_i32_1 = arith.constant 0 : i32
    return %c0_i32, %c0_i32_0 : i32, i32
  }
  func.func @transform_3(%arg0: i32) -> (i32, i32) {
    %c0_i32 = arith.constant 0 : i32
    %c0_i32_0 = arith.constant 0 : i32
    return %arg0, %c0_i32 : i32, i32
  }
}

</mosaic_0001>

<bundles_post_ra>
// kernel: speech_encoder_forward.11
= control target key start
LH: loop header
LB: loop body
LE: loop exit
PB: predicated region body
PF: predicated region fallthrough
CT: control target
= control target key end

     0   :  { %vm71_vm0 = vcmask 392192   ;;  %s300_s1 = inlined_call_operand.vmem [shape: bf16[48,128], index: 1, kind: input, shape index: {}]   ;;  %s301_s0 = inlined_call_operand.vmem [shape: f32[64,48], index: 0, kind: input, shape index: {}]   ;;  %s302_s2 = inlined_call_operand.vmem [shape: f32[1,128], index: 2, kind: input, shape index: {}]   ;;  %s303_s3 = inlined_call_operand.vmem [shape: bf16[64,128], index: 3, kind: output, shape index: {}]  }
   0x1   :  { %v198_v0 = vld [vmem:[%s300_s1 + $0x10] sm:$0xff]  ;;  %v197_v1 = vld [vmem:[%s300_s1 + $0x8] sm:$0xff]  ;;  %v196_v2 = vld [vmem:[%s300_s1] sm:$0xff] }
   0x2   :  { %89 = vmatpush.bf16.msra.mxu0 %v198_v0  ;;  %222 = vmatpush.bf16.msra.mxu1 %v198_v0  ;;  %v35_v3 = vld [vmem:[%s301_s0] sm:$0xff]  ;;  %v36_v4 = vld [vmem:[%s301_s0 + $0x8] sm:$0xff]  ;;  %v37_v5 = vld [vmem:[%s301_s0 + $0x10] sm:$0xff] }
   0x3   :  { %223 = vmatpush.bf16.msra.mxu2 %v198_v0  ;;  %224 = vmatpush.bf16.msra.mxu3 %v198_v0  ;;  %v38_v6 = vld [vmem:[%s301_s0 + $0x18] sm:$0xff]  ;;  %v39_v7 = vld [vmem:[%s301_s0 + $0x20] sm:$0xff]  ;;  %v40_v8 = vld [vmem:[%s301_s0 + $0x28] sm:$0xff]  ;;  %v43_v11 = vpack.c.bf16 %v36_v4, %v35_v3 }
   0x4   :  { %v41_v9 = vld [vmem:[%s301_s0 + $0x30] sm:$0xff]  ;;  %v42_v10 = vld [vmem:[%s301_s0 + $0x38] sm:$0xff]  ;;  %v44_v12 = vpack.c.bf16 %v38_v6, %v37_v5  ;;  %v45_v13 = vpack.c.bf16 %v40_v8, %v39_v7  ;;  %v231_v17 = vld [vmem:[%s302_s2] ss:$0 sm:$0xff] }
   0x5   :  { %v46_v14 = vpack.c.bf16 %v42_v10, %v41_v9 }
   0x6   :  { %90 = vmatpush.bf16.msra.mxu0 %v197_v1  ;;  %225 = vmatpush.bf16.msra.mxu1 %v197_v1 }
   0x7   :  { %226 = vmatpush.bf16.msra.mxu2 %v197_v1  ;;  %227 = vmatpush.bf16.msra.mxu3 %v197_v1 }
   0xa   :  { %91 = vmatpush.bf16.msra.mxu0 %v196_v2  ;;  %228 = vmatpush.bf16.msra.mxu1 %v196_v2 }
   0xb   :  { %229 = vmatpush.bf16.msra.mxu2 %v196_v2  ;;  %230 = vmatpush.bf16.msra.mxu3 %v196_v2 }
   0xd   :  { %192 = vmatmul.msk.bf16.vlgmr.msra.gmra.mxu0 %vm71_vm0, %v43_v11  ;;  %193 = vmatmul.msk.bf16.vlgmr.msra.gmra.mxu1 %vm71_vm0, %v44_v12 }
   0xe   :  { %194 = vmatmul.msk.bf16.vlgmr.msra.gmra.mxu2 %vm71_vm0, %v45_v13  ;;  %195 = vmatmul.msk.bf16.vlgmr.msra.gmra.mxu3 %vm71_vm0, %v46_v14 }
  0x8a   :  { %v93_v15 = vpop.f32.mrf.mxu0  ;;  %v98_v16 = vpop.f32.mrf.mxu1 }
  0x8b   :  { %v144_v18 = vadd.f32 %v231_v17, %v93_v15  ;;  %v146_v19 = vadd.f32 %v231_v17, %v98_v16 }
  0x8d   :  { %v152_v26 = vmax.f32 %v144_v18, 0.0  ;;  %v154_v27 = vmax.f32 %v146_v19, 0.0 }
  0x91   :  { %v103_v20 = vpop.f32.mrf.mxu2  ;;  %v108_v21 = vpop.f32.mrf.mxu3 }
  0x92   :  { %v95_v22 = vpop.f32.mrf.mxu0  ;;  %v100_v23 = vpop.f32.mrf.mxu1  ;;  %v148_v32 = vadd.f32 %v231_v17, %v103_v20  ;;  %v150_v33 = vadd.f32 %v231_v17, %v108_v21 }
  0x93   :  { %v145_v24 = vadd.f32 %v231_v17, %v95_v22  ;;  %v147_v25 = vadd.f32 %v231_v17, %v100_v23 }
  0x94   :  { %v156_v38 = vmax.f32 %v148_v32, 0.0  ;;  %v158_v39 = vmax.f32 %v150_v33, 0.0 }
  0x95   :  { %v153_v28 = vmax.f32 %v145_v24, 0.0  ;;  %v155_v29 = vmax.f32 %v147_v25, 0.0 }
  0x97   :  { %v202_v30 = vpack.c.bf16 %v153_v28, %v152_v26  ;;  %v207_v31 = vpack.c.bf16 %v155_v29, %v154_v27 }
  0x99   :  { %203 = vst [vmem:[%s303_s3] sm:$0xff] %v202_v30   ;;  %v105_v34 = vpop.f32.mrf.mxu2  ;;  %v110_v35 = vpop.f32.mrf.mxu3 }
  0x9a   :  { %219 = vst [vmem:[%s303_s3 + $0x8] sm:$0xff] %v207_v31   ;;  %v149_v36 = vadd.f32 %v231_v17, %v105_v34  ;;  %v151_v37 = vadd.f32 %v231_v17, %v110_v35 }
  0x9c   :  { %v157_v40 = vmax.f32 %v149_v36, 0.0  ;;  %v159_v41 = vmax.f32 %v151_v37, 0.0 }
  0x9e   :  { %v212_v42 = vpack.c.bf16 %v157_v40, %v156_v38  ;;  %v217_v43 = vpack.c.bf16 %v159_v41, %v158_v39 }
  0xa0   :  { %220 = vst [vmem:[%s303_s3 + $0x10] sm:$0xff] %v212_v42  }
  0xa1   :  { %221 = vst [vmem:[%s303_s3 + $0x18] sm:$0xff] %v217_v43  }

// kernel: speech_encoder_forward.12
= control target key start
LH: loop header
LB: loop body
LE: loop exit
PB: predicated region body
PF: predicated region fallthrough
CT: control target
= control target key end

     0   :  { %s661_s1 = inlined_call_operand.vmem [shape: bf16[384,128], index: 1, kind: input, shape index: {}]   ;;  %s662_s0 = inlined_call_operand.vmem [shape: bf16[32,384], index: 0, kind: input, shape index: {}]   ;;  %s663_s2 = inlined_call_operand.vmem [shape: f32[1,128], index: 2, kind: input, shape index: {}]   ;;  %s664_s3 = inlined_call_operand.vmem [shape: bf16[32,128], index: 3, kind: output, shape index: {}]  }
   0x1   :  { %v487_v0 = vld [vmem:[%s661_s1 + $0x38] sm:$0xff]  ;;  %v486_v3 = vld [vmem:[%s661_s1 + $0x30] sm:$0xff]  ;;  %v485_v6 = vld [vmem:[%s661_s1 + $0x28] sm:$0xff] }
   0x2   :  { %v495_v1 = vld [vmem:[%s661_s1 + $0x78] sm:$0xff]  ;;  %258 = vmatpush.bf16.msra.mxu0 %v487_v0  ;;  %v494_v4 = vld [vmem:[%s661_s1 + $0x70] sm:$0xff]  ;;  %515 = vmatpush.bf16.msra.mxu3 %v487_v0  ;;  %v493_v7 = vld [vmem:[%s661_s1 + $0x68] sm:$0xff] }
   0x3   :  { %v503_v2 = vld [vmem:[%s661_s1 + $0xb8] sm:$0xff]  ;;  %277 = vmatpush.bf16.msra.mxu1 %v495_v1  ;;  %v502_v5 = vld [vmem:[%s661_s1 + $0xb0] sm:$0xff]  ;;  %v501_v8 = vld [vmem:[%s661_s1 + $0xa8] sm:$0xff] }
   0x4   :  { %296 = vmatpush.bf16.msra.mxu2 %v503_v2  ;;  %v484_v9 = vld [vmem:[%s661_s1 + $0x20] sm:$0xff]  ;;  %v483_v12 = vld [vmem:[%s661_s1 + $0x18] sm:$0xff]  ;;  %v482_v15 = vld [vmem:[%s661_s1 + $0x10] sm:$0xff] }
   0x5   :  { %v492_v10 = vld [vmem:[%s661_s1 + $0x60] sm:$0xff]  ;;  %v491_v13 = vld [vmem:[%s661_s1 + $0x58] sm:$0xff]  ;;  %v490_v16 = vld [vmem:[%s661_s1 + $0x50] sm:$0xff] }
   0x6   :  { %259 = vmatpush.bf16.msra.mxu0 %v486_v3  ;;  %516 = vmatpush.bf16.msra.mxu3 %v486_v3  ;;  %v500_v11 = vld [vmem:[%s661_s1 + $0xa0] sm:$0xff]  ;;  %v499_v14 = vld [vmem:[%s661_s1 + $0x98] sm:$0xff]  ;;  %v498_v17 = vld [vmem:[%s661_s1 + $0x90] sm:$0xff] }
   0x7   :  { %278 = vmatpush.bf16.msra.mxu1 %v494_v4  ;;  %v481_v18 = vld [vmem:[%s661_s1 + $0x8] sm:$0xff]  ;;  %v480_v21 = vld [vmem:[%s661_s1] sm:$0xff]  ;;  %v358_v27 = vld [vmem:[%s662_s0 + $0xc] sm:$0xf0] }
   0x8   :  { %297 = vmatpush.bf16.msra.mxu2 %v502_v5  ;;  %v489_v19 = vld [vmem:[%s661_s1 + $0x48] sm:$0xff]  ;;  %v488_v22 = vld [vmem:[%s661_s1 + $0x40] sm:$0xff]  ;;  %v476_v29 = vld [vmem:[%s662_s0 + $0x10] sm:$0xf0] }
   0x9   :  { %v497_v20 = vld [vmem:[%s661_s1 + $0x88] sm:$0xff]  ;;  %v496_v23 = vld [vmem:[%s661_s1 + $0x80] sm:$0xff]  ;;  %v368_v30 = vld [vmem:[%s662_s0 + $0x18] sm:$0xf] }
   0xa   :  { %260 = vmatpush.bf16.msra.mxu0 %v485_v6  ;;  %517 = vmatpush.bf16.msra.mxu3 %v485_v6  ;;  %v356_v24 = vld [vmem:[%s662_s0] sm:$0xf]  ;;  %v475_v25 = vld [vmem:[%s662_s0 + $0x8] sm:$0xf0]  ;;  %v474_v26 = vld [vmem:[%s662_s0 + $0x4] sm:$0xf] }
   0xb   :  { %279 = vmatpush.bf16.msra.mxu1 %v493_v7  ;;  %v364_v28 = vld [vmem:[%s662_s0 + $0x8] sm:$0xf]  ;;  %v478_v31 = vld [vmem:[%s662_s0 + $0x20] sm:$0xf0]  ;;  %v357_v32 = vor.u32 %v475_v25, %v356_v24  ;;  %v361_v33 = vor.u32 %v474_v26, %v358_v27  ;;  %v477_v36 = vld [vmem:[%s662_s0 + $0x1c] sm:$0xf] }
   0xc   :  { %298 = vmatpush.bf16.msra.mxu2 %v501_v8  ;;  %v365_v34 = vor.u32 %v476_v29, %v364_v28  ;;  %v369_v35 = vor.u32 %v478_v31, %v368_v30  ;;  %v370_v37 = vld [vmem:[%s662_s0 + $0x24] sm:$0xf0]  ;;  %v376_v38 = vld [vmem:[%s662_s0 + $0x20] sm:$0xf]  ;;  %v479_v39 = vld [vmem:[%s662_s0 + $0x28] sm:$0xf0] }
   0xd   :  { %v373_v40 = vor.u32 %v477_v36, %v370_v37  ;;  %v377_v41 = vor.u32 %v479_v39, %v376_v38  ;;  %v523_v49 = vld [vmem:[%s663_s2] ss:$0 sm:$0xff] }
   0xe   :  { %261 = vmatpush.bf16.msra.mxu0 %v484_v9  ;;  %518 = vmatpush.bf16.msra.mxu3 %v484_v9 }
   0xf   :  { %280 = vmatpush.bf16.msra.mxu1 %v492_v10 }
  0x10   :  { %299 = vmatpush.bf16.msra.mxu2 %v500_v11 }
  0x12   :  { %262 = vmatpush.bf16.msra.mxu0 %v483_v12  ;;  %519 = vmatpush.bf16.msra.mxu3 %v483_v12 }
  0x13   :  { %281 = vmatpush.bf16.msra.mxu1 %v491_v13 }
  0x14   :  { %300 = vmatpush.bf16.msra.mxu2 %v499_v14 }
  0x16   :  { %263 = vmatpush.bf16.msra.mxu0 %v482_v15  ;;  %520 = vmatpush.bf16.msra.mxu3 %v482_v15 }
  0x17   :  { %282 = vmatpush.bf16.msra.mxu1 %v490_v16 }
  0x18   :  { %301 = vmatpush.bf16.msra.mxu2 %v498_v17 }
  0x1a   :  { %264 = vmatpush.bf16.msra.mxu0 %v481_v18  ;;  %521 = vmatpush.bf16.msra.mxu3 %v481_v18 }
  0x1b   :  { %283 = vmatpush.bf16.msra.mxu1 %v489_v19 }
  0x1c   :  { %302 = vmatpush.bf16.msra.mxu2 %v497_v20 }
  0x1e   :  { %265 = vmatpush.bf16.msra.mxu0 %v480_v21  ;;  %522 = vmatpush.bf16.msra.mxu3 %v480_v21 }
  0x1f   :  { %284 = vmatpush.bf16.msra.mxu1 %v488_v22 }
  0x20   :  { %303 = vmatpush.bf16.msra.mxu2 %v496_v23 }
  0x21   :  { %266 = vmatmul.bf16.vlgmr.msra.gmra.mxu0 %v357_v32  ;;  %271 = vmatmul.bf16.vlgmr.msra.gmra.mxu3 %v369_v35 }
  0x22   :  { %285 = vmatmul.bf16.vlgmr.msra.gmra.mxu1 %v361_v33 }
  0x23   :  { %304 = vmatmul.bf16.vlgmr.msra.gmra.mxu2 %v365_v34 }
  0x32   :  { %290 = vmatmul.bf16.gmra.mxu1 %v373_v40 }
  0x33   :  { %309 = vmatmul.bf16.gmra.mxu2 %v377_v41 }
  0x9e   :  { %v267_v43 = vpop.f32.mrf.mxu0 }
  0x9f   :  { %v286_v42 = vpop.f32.mrf.mxu1 }
  0xa0   :  { %v287_v45 = vadd.f32 %v286_v42, %v267_v43 }
  0xa4   :  { %v272_v56 = vpop.f32.mrf.mxu3 }
  0xa6   :  { %v305_v44 = vpop.f32.mrf.mxu2  ;;  %v269_v47 = vpop.f32.mrf.mxu0 }
  0xa7   :  { %v288_v46 = vpop.f32.mrf.mxu1  ;;  %v306_v48 = vadd.f32 %v305_v44, %v287_v45 }
  0xa8   :  { %v289_v50 = vadd.f32 %v288_v46, %v269_v47 }
  0xa9   :  { %v334_v52 = vadd.f32 %v523_v49, %v306_v48 }
  0xab   :  { %v338_v57 = vmax.f32 %v334_v52, 0.0 }
  0xac   :  { %v274_v0 = vpop.f32.mrf.mxu3 }
  0xae   :  { %v307_v51 = vpop.f32.mrf.mxu2 }
  0xaf   :  { %v308_v53 = vadd.f32 %v307_v51, %v289_v50  ;;  %v291_v54 = vpop.f32.mrf.mxu1 }
  0xb0   :  { %v292_v61 = vadd.f32 %v291_v54, %v272_v56 }
  0xb1   :  { %v335_v55 = vadd.f32 %v523_v49, %v308_v53 }
  0xb3   :  { %v339_v58 = vmax.f32 %v335_v55, 0.0 }
  0xb5   :  { %v507_v59 = vpack.c.bf16 %v339_v58, %v338_v57 }
  0xb6   :  { %v310_v60 = vpop.f32.mrf.mxu2 }
  0xb7   :  { %508 = vst [vmem:[%s664_s3] sm:$0xff] %v507_v59   ;;  %v293_v62 = vpop.f32.mrf.mxu1  ;;  %v311_v63 = vadd.f32 %v310_v60, %v292_v61 }
  0xb8   :  { %v294_v1 = vadd.f32 %v293_v62, %v274_v0 }
  0xb9   :  { %v336_v3 = vadd.f32 %v523_v49, %v311_v63 }
  0xbb   :  { %v340_v6 = vmax.f32 %v336_v3, 0.0 }
  0xbe   :  { %v312_v2 = vpop.f32.mrf.mxu2 }
  0xbf   :  { %v313_v4 = vadd.f32 %v312_v2, %v294_v1 }
  0xc1   :  { %v337_v5 = vadd.f32 %v523_v49, %v313_v4 }
  0xc3   :  { %v341_v7 = vmax.f32 %v337_v5, 0.0 }
  0xc5   :  { %v512_v8 = vpack.c.bf16 %v341_v7, %v340_v6 }
  0xc7   :  { %514 = vst [vmem:[%s664_s3 + $0x8] sm:$0xff] %v512_v8  }

// kernel: speech_encoder_forward.13
= control target key start
LH: loop header
LB: loop body
LE: loop exit
PB: predicated region body
PF: predicated region fallthrough
CT: control target
= control target key end

     0   :  { %v575_v6 = vmov 128.0   ;;  %s829_s0 = inlined_call_operand.vmem [shape: bf16[32,128], index: 0, kind: input, shape index: {}]   ;;  %s830_s1 = inlined_call_operand.vmem [shape: f32[1,128], index: 1, kind: input, shape index: {}]   ;;  %s831_s2 = inlined_call_operand.vmem [shape: f32[1,128], index: 2, kind: input, shape index: {}]   ;;  %s832_s3 = inlined_call_operand.vmem [shape: bf16[128,384], index: 3, kind: input, shape index: {}]   ;;  %s833_s4 = inlined_call_operand.vmem [shape: f32[1,384], index: 4, kind: input, shape index: {}]   ;;  %s834_s5 = inlined_call_operand.vmem [shape: bf16[32,384], index: 5, kind: output, shape index: {}]  }
   0x1   :  { %v552_v0 = vld [vmem:[%s829_s0 + $0x8] sm:$0xff]   ;;  %v535_v1 = vld [vmem:[%s829_s0] sm:$0xff]   ;;  %565 = vrcp.f32 %v575_v6  ;;  %v532_v30 = vld [vmem:[%s832_s3 + $0xb0] sm:$0xf0] }
   0x2   :  { %v540_v2 = vunpack.c.l.bf16 %v552_v0  ;;  %v536_v3 = vunpack.c.l.bf16 %v535_v1  ;;  %v541_v4 = vunpack.c.h.bf16 %v552_v0  ;;  %v537_v5 = vunpack.c.h.bf16 %v535_v1  ;;  %v498_v29 = vld [vmem:[%s832_s3 + $0xa8] sm:$0xf]  ;;  %v531_v31 = vld [vmem:[%s832_s3 + $0xac] sm:$0xf]  ;;  %v500_v33 = vld [vmem:[%s832_s3 + $0xb4] sm:$0xf0] }
   0x3   :  { %v499_v32 = vor.u32 %v532_v30, %v498_v29  ;;  %v506_v34 = vld [vmem:[%s832_s3 + $0xb0] sm:$0xf]  ;;  %v533_v35 = vld [vmem:[%s832_s3 + $0xb8] sm:$0xf0]  ;;  %v503_v36 = vor.u32 %v531_v31, %v500_v33  ;;  %v528_v40 = vld [vmem:[%s832_s3 + $0x94] sm:$0xf] }
   0x4   :  { %36 = vadd.xlane.f32.xlu1 %v540_v2  ;;  %32 = vadd.xlane.f32.xlu0 %v536_v3  ;;  %v507_v37 = vor.u32 %v533_v35, %v506_v34  ;;  %v486_v38 = vld [vmem:[%s832_s3 + $0x90] sm:$0xf]  ;;  %v529_v39 = vld [vmem:[%s832_s3 + $0x98] sm:$0xf0]  ;;  %v488_v42 = vld [vmem:[%s832_s3 + $0x9c] sm:$0xf0] }
   0x5   :  { %327 = vmatpush.bf16.msra.mxu0 %v499_v32  ;;  %554 = vmatpush.bf16.msra.mxu3 %v499_v32  ;;  %v487_v41 = vor.u32 %v529_v39, %v486_v38  ;;  %v494_v43 = vld [vmem:[%s832_s3 + $0x98] sm:$0xf]  ;;  %v530_v44 = vld [vmem:[%s832_s3 + $0xa0] sm:$0xf0]  ;;  %v491_v45 = vor.u32 %v528_v40, %v488_v42  ;;  %v525_v49 = vld [vmem:[%s832_s3 + $0x7c] sm:$0xf] }
   0x6   :  { %346 = vmatpush.bf16.msra.mxu1 %v503_v36  ;;  %365 = vmatpush.bf16.msra.mxu2 %v507_v37  ;;  %v495_v46 = vor.u32 %v530_v44, %v494_v43  ;;  %v474_v47 = vld [vmem:[%s832_s3 + $0x78] sm:$0xf]  ;;  %v526_v48 = vld [vmem:[%s832_s3 + $0x80] sm:$0xf0]  ;;  %v476_v51 = vld [vmem:[%s832_s3 + $0x84] sm:$0xf0] }
   0x7   :  { %v566_v7 = vpop.eup %565  ;;  %v475_v50 = vor.u32 %v526_v48, %v474_v47  ;;  %v482_v52 = vld [vmem:[%s832_s3 + $0x80] sm:$0xf]  ;;  %v527_v53 = vld [vmem:[%s832_s3 + $0x88] sm:$0xf0]  ;;  %v479_v54 = vor.u32 %v525_v49, %v476_v51  ;;  %v522_v58 = vld [vmem:[%s832_s3 + $0x64] sm:$0xf] }
   0x8   :  { %v41_v8 = vmul.f32 128.0, %v566_v7  ;;  %vm45_vm0 = vweird.f32 %v566_v7  ;;  %v483_v55 = vor.u32 %v527_v53, %v482_v52  ;;  %v462_v56 = vld [vmem:[%s832_s3 + $0x60] sm:$0xf]  ;;  %v523_v57 = vld [vmem:[%s832_s3 + $0x68] sm:$0xf0] }
   0x9   :  { %328 = vmatpush.bf16.msra.mxu0 %v487_v41  ;;  %555 = vmatpush.bf16.msra.mxu3 %v487_v41  ;;  %v463_v59 = vor.u32 %v523_v57, %v462_v56  ;;  %v464_v60 = vld [vmem:[%s832_s3 + $0x6c] sm:$0xf0]  ;;  %v470_v61 = vld [vmem:[%s832_s3 + $0x68] sm:$0xf]  ;;  %v524_v62 = vld [vmem:[%s832_s3 + $0x70] sm:$0xf0] }
   0xa   :  { %v42_v9 = vsub.f32 1.0, %v41_v8  ;;  %347 = vmatpush.bf16.msra.mxu1 %v491_v45  ;;  %366 = vmatpush.bf16.msra.mxu2 %v495_v46  ;;  %v467_v63 = vor.u32 %v522_v58, %v464_v60  ;;  %v471_v0 = vor.u32 %v524_v62, %v470_v61  ;;  %v450_v1 = vld [vmem:[%s832_s3 + $0x48] sm:$0xf]  ;;  %v458_v8 = vld [vmem:[%s832_s3 + $0x50] sm:$0xf] }
   0xb   :  { %v426_v30 = vld [vmem:[%s832_s3 + $0x18] sm:$0xf]  ;;  %v514_v31 = vld [vmem:[%s832_s3 + $0x20] sm:$0xf0]  ;;  %v513_v32 = vld [vmem:[%s832_s3 + $0x1c] sm:$0xf] }
   0xc   :  { %38 = vadd.xlane.f32.xlu1 %v541_v4  ;;  %34 = vadd.xlane.f32.xlu0 %v537_v5  ;;  %v43_v10 = vmul.f32 %v566_v7, %v42_v9  ;;  %v521_v9 = vld [vmem:[%s832_s3 + $0x58] sm:$0xf0]  ;;  %v427_v35 = vor.u32 %v514_v31, %v426_v30  ;;  %v428_v36 = vld [vmem:[%s832_s3 + $0x24] sm:$0xf0]  ;;  %v434_v37 = vld [vmem:[%s832_s3 + $0x20] sm:$0xf] }
   0xd   :  { %329 = vmatpush.bf16.msra.mxu0 %v475_v50  ;;  %556 = vmatpush.bf16.msra.mxu3 %v475_v50  ;;  %v515_v38 = vld [vmem:[%s832_s3 + $0x28] sm:$0xf0]  ;;  %v431_v41 = vor.u32 %v513_v32, %v428_v36  ;;  %v414_v43 = vld [vmem:[%s832_s3] sm:$0xf]  ;;  %v510_v45 = vld [vmem:[%s832_s3 + $0x4] sm:$0xf] }
   0xe   :  { %v44_v11 = vadd.f32 %v566_v7, %v43_v10  ;;  %348 = vmatpush.bf16.msra.mxu1 %v479_v54  ;;  %367 = vmatpush.bf16.msra.mxu2 %v483_v55  ;;  %v435_v42 = vor.u32 %v515_v38, %v434_v37  ;;  %v511_v44 = vld [vmem:[%s832_s3 + $0x8] sm:$0xf0]  ;;  %v416_v46 = vld [vmem:[%s832_s3 + $0xc] sm:$0xf0]  ;;  %v512_v47 = vld [vmem:[%s832_s3 + $0x10] sm:$0xf0] }
   0xf   :  { %v415_v51 = vor.u32 %v511_v44, %v414_v43  ;;  %v419_v54 = vor.u32 %v510_v45, %v416_v46 }
  0x10   :  { %v612_v12 = vsel %vm45_vm0, %v566_v7, %v44_v11  ;;  %v452_v7 = vld [vmem:[%s832_s3 + $0x54] sm:$0xf0] }
  0x11   :  { %330 = vmatpush.bf16.msra.mxu0 %v463_v59  ;;  %557 = vmatpush.bf16.msra.mxu3 %v463_v59 }
  0x12   :  { %349 = vmatpush.bf16.msra.mxu1 %v467_v63  ;;  %368 = vmatpush.bf16.msra.mxu2 %v471_v0 }
  0x77   :  { %v37_v13 = vpop.xlane.xlu1 %36  ;;  %v33_v14 = vpop.xlane.xlu0 %32 }
  0x78   :  { %v49_v15 = vmul.f32 %v612_v12, %v37_v13  ;;  %v47_v16 = vmul.f32 %v612_v12, %v33_v14  ;;  %v459_v14 = vor.u32 %v521_v9, %v458_v8 }
  0x7a   :  { %v616_v17 = vsub.f32 %v540_v2, %v49_v15  ;;  %v618_v18 = vsub.f32 %v536_v3, %v47_v16  ;;  %v520_v2 = vld [vmem:[%s832_s3 + $0x50] sm:$0xf0]  ;;  %v519_v3 = vld [vmem:[%s832_s3 + $0x4c] sm:$0xf]  ;;  %369 = vmatpush.bf16.msra.mxu2 %v459_v14 }
  0x7b   :  { %v451_v6 = vor.u32 %v520_v2, %v450_v1  ;;  %v455_v13 = vor.u32 %v519_v3, %v452_v7 }
  0x7c   :  { %v57_v19 = vmul.f32 %v616_v17, %v616_v17  ;;  %v55_v20 = vmul.f32 %v618_v18, %v618_v18 }
  0x7d   :  { %331 = vmatpush.bf16.msra.mxu0 %v451_v6  ;;  %558 = vmatpush.bf16.msra.mxu3 %v451_v6 }
  0x7e   :  { %63 = vadd.xlane.f32.xlu0 %v57_v19  ;;  %59 = vadd.xlane.f32.xlu2 %v55_v20  ;;  %v438_v19 = vld [vmem:[%s832_s3 + $0x30] sm:$0xf]  ;;  %v517_v20 = vld [vmem:[%s832_s3 + $0x38] sm:$0xf0] }
  0x7f   :  { %v39_v21 = vpop.xlane.xlu1 %38  ;;  %v35_v22 = vpop.xlane.xlu0 %34  ;;  %350 = vmatpush.bf16.msra.mxu1 %v455_v13  ;;  %v563_v13 = vld [vmem:[%s830_s1] ss:$0 sm:$0xff] }
  0x80   :  { %v50_v23 = vmul.f32 %v612_v12, %v39_v21  ;;  %v48_v24 = vmul.f32 %v612_v12, %v35_v22  ;;  %v516_v21 = vld [vmem:[%s832_s3 + $0x34] sm:$0xf]  ;;  %v440_v22 = vld [vmem:[%s832_s3 + $0x3c] sm:$0xf0] }
  0x82   :  { %v626_v25 = vsub.f32 %v541_v4, %v50_v23  ;;  %v628_v26 = vsub.f32 %v537_v5, %v48_v24  ;;  %v439_v23 = vor.u32 %v517_v20, %v438_v19  ;;  %v446_v24 = vld [vmem:[%s832_s3 + $0x38] sm:$0xf] }
  0x84   :  { %v58_v27 = vmul.f32 %v626_v25, %v626_v25  ;;  %v56_v28 = vmul.f32 %v628_v26, %v628_v26  ;;  %332 = vmatpush.bf16.msra.mxu0 %v439_v23  ;;  %559 = vmatpush.bf16.msra.mxu3 %v439_v23 }
  0x86   :  { %65 = vadd.xlane.f32.xlu1 %v58_v27  ;;  %61 = vadd.xlane.f32.xlu2 %v56_v28  ;;  %v518_v27 = vld [vmem:[%s832_s3 + $0x40] sm:$0xf0]  ;;  %v443_v28 = vor.u32 %v516_v21, %v440_v22  ;;  %v564_v22 = vld [vmem:[%s831_s2] ss:$0 sm:$0xff] }
  0x87   :  { %v447_v29 = vor.u32 %v518_v27, %v446_v24 }
  0x88   :  { %351 = vmatpush.bf16.msra.mxu1 %v443_v28  ;;  %333 = vmatpush.bf16.msra.mxu0 %v427_v35 }
  0x89   :  { %370 = vmatpush.bf16.msra.mxu2 %v447_v29  ;;  %560 = vmatpush.bf16.msra.mxu3 %v427_v35 }
  0x8c   :  { %352 = vmatpush.bf16.msra.mxu1 %v431_v41  ;;  %334 = vmatpush.bf16.msra.mxu0 %v415_v51 }
  0x8d   :  { %371 = vmatpush.bf16.msra.mxu2 %v435_v42  ;;  %561 = vmatpush.bf16.msra.mxu3 %v415_v51 }
  0x90   :  { %353 = vmatpush.bf16.msra.mxu1 %v419_v54 }
  0xf1   :  { %v60_v4 = vpop.xlane.xlu2 %59  ;;  %v64_v5 = vpop.xlane.xlu0 %63 }
  0xf2   :  { %v67_v10 = vmul.f32 %v60_v4, %v612_v12  ;;  %v69_v11 = vmul.f32 %v64_v5, %v612_v12 }
  0xf4   :  { %v726_v15 = vadd.f32 1e-05, %v67_v10  ;;  %v728_v16 = vadd.f32 1e-05, %v69_v11 }
  0xf6   :  { %567 = vrsqrt.f32 %v726_v15  ;;  %vm101_vm1 = vweird.f32 %v728_v16  ;;  %vm81_vm5 = vweird.f32 %v726_v15 }
  0xf7   :  { %569 = vrsqrt.f32 %v728_v16 }
  0xf9   :  { %v66_v33 = vpop.xlane.xlu1 %65  ;;  %v62_v34 = vpop.xlane.xlu2 %61 }
  0xfa   :  { %v70_v39 = vmul.f32 %v66_v33, %v612_v12  ;;  %v68_v40 = vmul.f32 %v62_v34, %v612_v12  ;;  %v422_v12 = vld [vmem:[%s832_s3 + $0x8] sm:$0xf] }
  0xfb   :  { %v423_v55 = vor.u32 %v512_v47, %v422_v12 }
  0xfc   :  { %v568_v48 = vpop.eup %567  ;;  %v74_v49 = vadd.f32 1e-05, %v70_v39  ;;  %v72_v50 = vadd.f32 1e-05, %v68_v40 }
  0xfd   :  { %v570_v52 = vpop.eup %569  ;;  %v76_v53 = vmul.f32 %v568_v48, %v726_v15  ;;  %372 = vmatpush.bf16.msra.mxu2 %v423_v55  ;;  %vm82_vm3 = vweird.f32 %v568_v48 }
  0xfe   :  { %v96_v56 = vmul.f32 %v570_v52, %v728_v16  ;;  %571 = vrsqrt.f32 %v74_v49  ;;  %vm102_vm2 = vweird.f32 %v570_v52  ;;  %vm83_vm6 = vmor %vm81_vm5, %vm82_vm3  ;;  %vm111_vm7 = vweird.f32 %v74_v49 }
  0xff   :  { %v77_v57 = vmul.f32 %v568_v48, %v76_v53  ;;  %573 = vrsqrt.f32 %v72_v50  ;;  %vm103_vm4 = vmor %vm101_vm1, %vm102_vm2  ;;  %vm91_vm11 = vweird.f32 %v72_v50 }
 0x100   :  { %v97_v58 = vmul.f32 %v570_v52, %v96_v56 }
 0x101   :  { %v78_v59 = vmul.f32 0.5, %v77_v57 }
 0x102   :  { %v98_v60 = vmul.f32 0.5, %v97_v58 }
 0x103   :  { %v79_v61 = vsub.f32 1.5, %v78_v59 }
 0x104   :  { %v572_v62 = vpop.eup %571  ;;  %v99_v63 = vsub.f32 1.5, %v98_v60 }
 0x105   :  { %v574_v0 = vpop.eup %573  ;;  %v106_v1 = vmul.f32 %v572_v62, %v74_v49  ;;  %v80_v2 = vmul.f32 %v568_v48, %v79_v61  ;;  %vm112_vm8 = vweird.f32 %v572_v62 }
 0x106   :  { %v100_v3 = vmul.f32 %v570_v52, %v99_v63  ;;  %v86_v4 = vmul.f32 %v574_v0, %v72_v50  ;;  %vm113_vm9 = vmor %vm111_vm7, %vm112_vm8  ;;  %vm92_vm10 = vweird.f32 %v574_v0 }
 0x107   :  { %v107_v5 = vmul.f32 %v572_v62, %v106_v1  ;;  %v84_v9 = vsel %vm83_vm6, %v568_v48, %v80_v2  ;;  %vm93_vm12 = vmor %vm91_vm11, %vm92_vm10 }
 0x108   :  { %v87_v6 = vmul.f32 %v574_v0, %v86_v4  ;;  %v104_v7 = vsel %vm103_vm4, %v570_v52, %v100_v3  ;;  %v115_v15 = vmul.f32 %v84_v9, %v618_v18 }
 0x109   :  { %v108_v8 = vmul.f32 0.5, %v107_v5  ;;  %v117_v14 = vmul.f32 %v104_v7, %v616_v17 }
 0x10a   :  { %v88_v10 = vmul.f32 0.5, %v87_v6  ;;  %v123_v28 = vmul.f32 %v563_v13, %v115_v15 }
 0x10b   :  { %v109_v11 = vsub.f32 1.5, %v108_v8  ;;  %v125_v23 = vmul.f32 %v563_v13, %v117_v14 }
 0x10c   :  { %v89_v16 = vsub.f32 1.5, %v88_v10  ;;  %v131_v32 = vadd.f32 %v564_v22, %v123_v28 }
 0x10d   :  { %v110_v19 = vmul.f32 %v572_v62, %v109_v11  ;;  %v133_v31 = vadd.f32 %v564_v22, %v125_v23 }
 0x10e   :  { %v90_v20 = vmul.f32 %v574_v0, %v89_v16 }
 0x10f   :  { %v114_v21 = vsel %vm113_vm9, %v572_v62, %v110_v19 }
 0x110   :  { %v118_v24 = vmul.f32 %v114_v21, %v626_v25  ;;  %v94_v27 = vsel %vm93_vm12, %v574_v0, %v90_v20  ;;  %v179_v25 = vld [vmem:[%s833_s4] sm:$0x7] }
 0x111   :  { %v116_v17 = vmul.f32 %v94_v27, %v628_v26  ;;  %v181_v26 = vperm.slane %v179_v25, 0  ;;  %v182_v38 = vperm.slane %v179_v25, 1  ;;  %v183_v44 = vperm.slane %v179_v25, 2 }
 0x112   :  { %v126_v29 = vmul.f32 %v563_v13, %v118_v24 }
 0x113   :  { %v124_v30 = vmul.f32 %v563_v13, %v116_v17 }
 0x114   :  { %v134_v18 = vadd.f32 %v564_v22, %v126_v29 }
 0x115   :  { %v132_v33 = vadd.f32 %v564_v22, %v124_v30 }
 0x116   :  { %v550_v34 = vpack.c.bf16 %v134_v18, %v133_v31 }
 0x117   :  { %v545_v35 = vpack.c.bf16 %v132_v33, %v131_v32 }
 0x118   :  { %553 = vst [vmem:[#allocation2 + $0x8] sm:$0xff] %v550_v34  }
 0x119   :  { %546 = vst [vmem:[#allocation2] sm:$0xff] %v545_v35  }
 0x11f   :  { %v509_v36 = vld [vmem:[#allocation2 + $0x8] sm:$0xff] }
 0x120   :  { %v508_v37 = vld [vmem:[#allocation2] sm:$0xff]  ;;  %340 = vmatmul.bf16.vlgmr.msra.gmra.mxu3 %v509_v36 }
 0x121   :  { %335 = vmatmul.bf16.vlgmr.msra.gmra.mxu0 %v508_v37  ;;  %354 = vmatmul.bf16.vlgmr.msra.gmra.mxu1 %v508_v37 }
 0x122   :  { %373 = vmatmul.bf16.vlgmr.msra.gmra.mxu2 %v508_v37 }
 0x131   :  { %359 = vmatmul.bf16.gmra.mxu1 %v509_v36 }
 0x132   :  { %378 = vmatmul.bf16.gmra.mxu2 %v509_v36 }
 0x19e   :  { %v336_v39 = vpop.f32.mrf.mxu0  ;;  %v355_v40 = vpop.f32.mrf.mxu1 }
 0x19f   :  { %v337_v41 = vadd.f32 %v336_v39, %v181_v26  ;;  %v356_v42 = vadd.f32 %v355_v40, %v182_v38 }
 0x1a1   :  { %v384_v43 = vpack.c.bf16 %v356_v42, %v337_v41 }
 0x1a3   :  { %392 = vst [vmem:[%s834_s5] sm:$0xff] %v384_v43  ;;  %v341_v52 = vpop.f32.mrf.mxu3 }
 0x1a4   :  { %v342_v56 = vadd.f32 %v341_v52, %v181_v26 }
 0x1a5   :  { %v374_v45 = vpop.f32.mrf.mxu2 }
 0x1a6   :  { %v375_v46 = vadd.f32 %v374_v45, %v183_v44  ;;  %v338_v12 = vpop.f32.mrf.mxu0  ;;  %v357_v47 = vpop.f32.mrf.mxu1 }
 0x1a7   :  { %v339_v48 = vadd.f32 %v338_v12, %v181_v26  ;;  %v358_v49 = vadd.f32 %v357_v47, %v182_v38 }
 0x1a8   :  { %v385_v50 = vpack.c.bf16 %v375_v46, %v375_v46 }
 0x1a9   :  { %v386_v51 = vpack.c.bf16 %v358_v49, %v339_v48 }
 0x1aa   :  { %393 = vst [vmem:[%s834_s5 + $0x8] sm:$0xf] %v385_v50 }
 0x1ab   :  { %394 = vst [vmem:[%s834_s5 + $0xc] sm:$0xff] %v386_v51  ;;  %v343_v60 = vpop.f32.mrf.mxu3 }
 0x1ac   :  { %v344_v0 = vadd.f32 %v343_v60, %v181_v26 }
 0x1ad   :  { %v376_v53 = vpop.f32.mrf.mxu2 }
 0x1ae   :  { %v377_v54 = vadd.f32 %v376_v53, %v183_v44  ;;  %v360_v55 = vpop.f32.mrf.mxu1 }
 0x1af   :  { %v361_v57 = vadd.f32 %v360_v55, %v182_v38 }
 0x1b0   :  { %v387_v58 = vpack.c.bf16 %v377_v54, %v377_v54 }
 0x1b1   :  { %v388_v59 = vpack.c.bf16 %v361_v57, %v342_v56 }
 0x1b2   :  { %395 = vst [vmem:[%s834_s5 + $0x14] sm:$0xf] %v387_v58 }
 0x1b3   :  { %396 = vst [vmem:[%s834_s5 + $0x18] sm:$0xff] %v388_v59 }
 0x1b5   :  { %v379_v61 = vpop.f32.mrf.mxu2 }
 0x1b6   :  { %v380_v62 = vadd.f32 %v379_v61, %v183_v44  ;;  %v362_v63 = vpop.f32.mrf.mxu1 }
 0x1b7   :  { %v363_v1 = vadd.f32 %v362_v63, %v182_v38 }
 0x1b8   :  { %v389_v2 = vpack.c.bf16 %v380_v62, %v380_v62 }
 0x1b9   :  { %v390_v3 = vpack.c.bf16 %v363_v1, %v344_v0 }
 0x1ba   :  { %397 = vst [vmem:[%s834_s5 + $0x20] sm:$0xf] %v389_v2 }
 0x1bb   :  { %398 = vst [vmem:[%s834_s5 + $0x24] sm:$0xff] %v390_v3 }
 0x1bd   :  { %v381_v4 = vpop.f32.mrf.mxu2 }
 0x1be   :  { %v382_v5 = vadd.f32 %v381_v4, %v183_v44 }
 0x1c0   :  { %v391_v6 = vpack.c.bf16 %v382_v5, %v382_v5 }
 0x1c2   :  { %399 = vst [vmem:[%s834_s5 + $0x2c] sm:$0xf] %v391_v6 }

// kernel: speech_encoder_forward.15
= control target key start
LH: loop header
LB: loop body
LE: loop exit
PB: predicated region body
PF: predicated region fallthrough
CT: control target
= control target key end

     0   :  { %9 = vsyncpa [#allocation4], 0  ;;  %s300_s18 = smov [#allocation3]   ;;  %s301_s20 = smov 64   ;;  %s352_s0 = inlined_call_operand.vmem [shape: bf16[32,128], index: 0, kind: input, shape index: {}]   ;;  %s353_s1 = inlined_call_operand.hbm [shape: bf16[128,128], index: 1, kind: input, shape index: {}]   ;;  %s354_s2 = inlined_call_operand.vmem [shape: f32[1,128], index: 2, kind: input, shape index: {}]   ;;  %s355_s3 = inlined_call_operand.vmem [shape: bf16[32,128], index: 3, kind: input, shape index: {}]   ;;  %s356_s4 = inlined_call_operand.vmem [shape: bf16[32,128], index: 4, kind: output, shape index: {}]  }
   0x1   :  { %s16_s17 = sshll.u32 %s353_s1, 4  ;;  %s18_s19 = sshll.u32 %s300_s18, 4  ;;  %s17_s17 = int_to_ptr.hbm [resolvable:$true] %s16_s17  ;;  %s19_s19 = int_to_ptr.vmem [resolvable:$true] %s18_s19 }
   0x2   :  { %s302_s21 = smov 4  }
   0x3   :  { %24 = dma.hbm_to_vmem [thread:$0]  %s17_s17, 1024, %s19_s19, [#allocation4], %s301_s20, %s301_s20, %s302_s21  }
   0x4   :  { %298 = dma.done.wait [#allocation4], 1024  }
   0x5   :  { %299 = vsyncadd [#allocation4], 4294966272  ;;  %v241_v0 = vld [vmem:[#allocation3 + $0x38] sm:$0xff]  ;;  %v240_v1 = vld [vmem:[#allocation3 + $0x30] sm:$0xff] }
   0x6   :  { %125 = vmatpush.bf16.msra.mxu0 %v241_v0  ;;  %262 = vmatpush.bf16.msra.mxu1 %v241_v0  ;;  %v239_v2 = vld [vmem:[#allocation3 + $0x28] sm:$0xff]  ;;  %v238_v3 = vld [vmem:[#allocation3 + $0x20] sm:$0xff]  ;;  %v237_v4 = vld [vmem:[#allocation3 + $0x18] sm:$0xff] }
   0x7   :  { %v236_v5 = vld [vmem:[#allocation3 + $0x10] sm:$0xff]  ;;  %v235_v6 = vld [vmem:[#allocation3 + $0x8] sm:$0xff]  ;;  %v234_v7 = vld [vmem:[#allocation3] sm:$0xff] }
   0x8   :  { %v232_v8 = vld [vmem:[%s352_s0] sm:$0xff]  ;;  %v233_v9 = vld [vmem:[%s352_s0 + $0x8] sm:$0xff] }
   0x9   :  { %v273_v12 = vld [vmem:[%s354_s2] ss:$0 sm:$0xff]  ;;  %v260_v14 = vld [vmem:[%s355_s3 + $0x8] sm:$0xff]  }
   0xa   :  { %126 = vmatpush.bf16.msra.mxu0 %v240_v1  ;;  %263 = vmatpush.bf16.msra.mxu1 %v240_v1  ;;  %v243_v13 = vld [vmem:[%s355_s3] sm:$0xff]   ;;  %v248_v16 = vunpack.c.l.bf16 %v260_v14  ;;  %v249_v20 = vunpack.c.h.bf16 %v260_v14 }
   0xb   :  { %v244_v15 = vunpack.c.l.bf16 %v243_v13  ;;  %v245_v19 = vunpack.c.h.bf16 %v243_v13 }
   0xe   :  { %127 = vmatpush.bf16.msra.mxu0 %v239_v2  ;;  %264 = vmatpush.bf16.msra.mxu1 %v239_v2 }
  0x12   :  { %128 = vmatpush.bf16.msra.mxu0 %v238_v3  ;;  %265 = vmatpush.bf16.msra.mxu1 %v238_v3 }
  0x16   :  { %129 = vmatpush.bf16.msra.mxu0 %v237_v4  ;;  %266 = vmatpush.bf16.msra.mxu1 %v237_v4 }
  0x1a   :  { %130 = vmatpush.bf16.msra.mxu0 %v236_v5  ;;  %267 = vmatpush.bf16.msra.mxu1 %v236_v5 }
  0x1e   :  { %131 = vmatpush.bf16.msra.mxu0 %v235_v6  ;;  %268 = vmatpush.bf16.msra.mxu1 %v235_v6 }
  0x22   :  { %132 = vmatpush.bf16.msra.mxu0 %v234_v7  ;;  %269 = vmatpush.bf16.msra.mxu1 %v234_v7 }
  0x25   :  { %133 = vmatmul.bf16.vlgmr.msra.gmra.mxu0 %v232_v8  ;;  %138 = vmatmul.bf16.vlgmr.msra.gmra.mxu1 %v233_v9 }
  0xa2   :  { %v134_v10 = vpop.f32.mrf.mxu0  ;;  %v139_v11 = vpop.f32.mrf.mxu1 }
  0xa3   :  { %v163_v17 = vadd.f32 %v273_v12, %v134_v10  ;;  %v165_v18 = vadd.f32 %v273_v12, %v139_v11 }
  0xa5   :  { %v175_v25 = vadd.f32 %v244_v15, %v163_v17  ;;  %v177_v26 = vadd.f32 %v248_v16, %v165_v18 }
  0xaa   :  { %v136_v21 = vpop.f32.mrf.mxu0  ;;  %v141_v22 = vpop.f32.mrf.mxu1 }
  0xab   :  { %v164_v23 = vadd.f32 %v273_v12, %v136_v21  ;;  %v166_v24 = vadd.f32 %v273_v12, %v141_v22 }
  0xad   :  { %v176_v27 = vadd.f32 %v245_v19, %v164_v23  ;;  %v178_v28 = vadd.f32 %v249_v20, %v166_v24 }
  0xaf   :  { %v253_v29 = vpack.c.bf16 %v176_v27, %v175_v25  ;;  %v258_v30 = vpack.c.bf16 %v178_v28, %v177_v26 }
  0xb1   :  { %254 = vst [vmem:[%s356_s4] sm:$0xff] %v253_v29  }
  0xb2   :  { %261 = vst [vmem:[%s356_s4 + $0x8] sm:$0xff] %v258_v30  }
  0xb3   :  { %191 = vsyncpa [#allocation4], 1 }

// kernel: speech_encoder_forward.14
= control target key start
LH: loop header
LB: loop body
LE: loop exit
PB: predicated region body
PF: predicated region fallthrough
CT: control target
= control target key end

     0   :  { %s1542_s18 = smov [#allocation6]   ;;  %s1917_s0 = inlined_call_operand.vmem [shape: s32[2], index: 0, kind: input, shape index: {}]   ;;  %s1918_s1 = inlined_call_operand.vmem [shape: bf16[2,16,384], index: 1, kind: input, shape index: {}, may-alias: {1,2,3}]   ;;  %s1919_s2 = inlined_call_operand.vmem [shape: bf16[2,16,384], index: 2, kind: input, shape index: {}, may-alias: {1,2,3}]   ;;  %s1920_s3 = inlined_call_operand.vmem [shape: bf16[2,16,384], index: 3, kind: input, shape index: {}, may-alias: {1,2,3}]   ;;  %s1921_s4 = inlined_call_operand.vmem [shape: bf16[2,16,128], index: 4, kind: output, shape index: {}]  }
   0x1   :  { %s10_s17 = sshll.u32 %s1917_s0, 4  ;;  %s11_s17 = int_to_ptr.vmem [resolvable:$true] %s10_s17 }
   0x2   :  { %13 = dma.vmem_to_smem %s11_s17, 16, %s1542_s18, [#allocation5] }
   0x3   :  { %1520 = dma.done.wait [#allocation5], 16 }
   0x4   :  { %1521 = vsyncadd [#allocation5], 4294967280 }
   0x5   :  { %16 = sfence }
   0x6   :  { %s1577_s19 = smov 0   ;;  %s1579_s20 = smov 0  }
   0x7   :  { %s1581_s21 = smov 0   ;;  %s1583_s22 = smov 0  }
   0x8   :  { %s1585_s23 = smov 0  }
   0x9 LB: > { %s48_s0 = sadd.s32 1, %s1536_s22  ;;  %p66_p1 = scmp.ne.s32.totalorder %s1528_s20, %s1524_s19  ;;  %s1540_s23 = sphi %s1585_s23, %s22_s23   ;;  %s1536_s22 = sphi %s1583_s22, %s1932_s22   ;;  %s1532_s21 = sphi %s1581_s21, %s1931_s21   ;;  %s1528_s20 = sphi %s1579_s20, %s1930_s20   ;;  %s1524_s19 = sphi %s1577_s19, %s1929_s19  }
   0xa   : > { %p50_p0 = scmp.ge.s32.totalorder %s48_s0, 2  ;;  %p67_p2 = scmp.eq.s32.totalorder %s1540_s23, 0 }
   0xb   : > { %s59_s26 = sadd.s32 1, %s1528_s20  ;;  %p1326_p5 = scmp.ge.s32.totalorder %s1540_s23, 2 }
   0xc   : > { %s1934_s0 = smov (%p50_p0, %s48_s0), 0  ;;  %p1608_p3 = por %p67_p2, %p66_p1 }
   0xd   : > { %s52_s25 = ssub.s32 %s1536_s22, %s1934_s0  ;;  %186 = sbr.rel (%p1326_p5) target bundleno = 39 (0x27), region = 16 }
   0xe   : > { %p57_p4 = scmp.eq.s32.totalorder %s52_s25, 0 }
  0x10   : > { %s1616_s27 = scalar_select %p57_p4, %s1528_s20, %s59_s26  }
  0x12   : > { %189 = sbr.rel (!%p1608_p3) target bundleno = 25 (0x19), region = 20  ;;  %s191_s28 = sand.u32 (%p1608_p3), 1, %s1528_s20  }
  0x13   : > { %s1374_s29 = smul.u32 (%p1608_p3), 24, %s1536_s22  ;;  %s1327_s30 = sshll.u32 (%p1608_p3), %s191_s28, 3 }
  0x14   : > { %s193_s8 = scalar_lea.vmem (%p1608_p3), [#allocation7], %s1327_s30 }
  0x15   : > { %s200_s7 = scalar_lea.vmem (%p1608_p3), %s1918_s1, %s1374_s29 }
  0x16   : > { %v217_v0 = vld [vmem:[%s200_s7] sm:$0xf] (%p1608_p3)  ;;  %v219_v1 = vld [vmem:[%s200_s7 + $0xc] sm:$0xf] (%p1608_p3) }
  0x17   : > { %218 = vst [vmem:[%s193_s8] sm:$0xf] %v217_v0 }
  0x18   : > { %220 = vst [vmem:[%s193_s8 + $0x4] sm:$0xf] %v219_v1 }
  0x19 PF: > { %248 = sbr.rel (!%p1608_p3) target bundleno = 32 (0x20), region = 61  ;;  %s250_s9 = sand.u32 (%p1608_p3), 1, %s1528_s20  }
  0x1a   : > { %s1330_s10 = smul.u32 (%p1608_p3), 24, %s1536_s22  ;;  %s1329_s11 = sshll.u32 (%p1608_p3), %s250_s9, 3 }
  0x1b   : > { %s252_s15 = scalar_lea.vmem (%p1608_p3), [#allocation8], %s1329_s11 }
  0x1c   : > { %s1221_s14 = scalar_lea.vmem (%p1608_p3), %s1919_s2, %s1330_s10 }
  0x1d   : > { %v1331_v2 = vld [vmem:[%s1221_s14 + $0x4] sm:$0xf] (%p1608_p3)  ;;  %v1332_v3 = vld [vmem:[%s1221_s14 + $0x10] sm:$0xf] (%p1608_p3) }
  0x1e   : > { %278 = vst [vmem:[%s252_s15] sm:$0xf] %v1331_v2 }
  0x1f   : > { %280 = vst [vmem:[%s252_s15 + $0x4] sm:$0xf] %v1332_v3 }
  0x20 PF: > { %308 = sbr.rel (!%p1608_p3) target bundleno = 39 (0x27), region = 102  ;;  %s310_s16 = sand.u32 (%p1608_p3), 1, %s1528_s20  }
  0x21   : > { %s1334_s17 = smul.u32 (%p1608_p3), 24, %s1536_s22  ;;  %s1333_s18 = sshll.u32 (%p1608_p3), %s310_s16, 3 }
  0x22   : > { %s312_s29 = scalar_lea.vmem (%p1608_p3), [#allocation9], %s1333_s18 }
  0x23   : > { %s1230_s28 = scalar_lea.vmem (%p1608_p3), %s1920_s3, %s1334_s17 }
  0x24   : > { %v1335_v4 = vld [vmem:[%s1230_s28 + $0x8] sm:$0xf] (%p1608_p3)  ;;  %v1336_v5 = vld [vmem:[%s1230_s28 + $0x14] sm:$0xf] (%p1608_p3) }
  0x25   : > { %338 = vst [vmem:[%s312_s29] sm:$0xf] %v1335_v4 }
  0x26   : > { %340 = vst [vmem:[%s312_s29 + $0x4] sm:$0xf] %v1336_v5 }
  0x27 PF: > { %p1337_p6 = scmp.ge.s32.totalorder %s1540_s23, 1  ;;  %p367_p7 = scmp.lt.s32.totalorder %s1540_s23, 3 }
  0x29   : > { %p368_p8 = pnand %p1337_p6, %p367_p7 }
  0x2a   : > { %s374_s24 = sand.u32 (!%p368_p8), 1, %s1524_s19   ;;  %s1543_s19 = smov (!%p368_p8), 96  }
  0x2b   : > { %371 = sbr.rel (%p368_p8) target bundleno = 1345 (0x541), region = 143  ;;  %s1643_s30 = sshll.u32 (!%p368_p8), %s374_s24, 3 }
  0x2c   : > { %s383_s5 = scalar_lea.vmem (!%p368_p8), [#allocation8], %s1643_s30  ;;  %s376_s6 = scalar_lea.vmem (!%p368_p8), [#allocation7], %s1643_s30 }
  0x2d   : > { %s475_s7 = sld [smem:[#allocation6 + %s1532_s21]] (!%p368_p8)  ;;  %s1545_s8 = smov (!%p368_p8), 64  }
  0x2e   : > { %s1548_s9 = smov (!%p368_p8), 32   ;;  %s390_s10 = scalar_lea.vmem (!%p368_p8), [#allocation9], %s1643_s30 }
  0x2f   : > { %p432_p9 = scmp.lt.s32.totalorder (!%p368_p8), %s1532_s21, 1 }
  0x30   : > { %vm466_vm0 = vcmask 261120   ;;  %v1646_v6 = vld [vmem:[%s383_s5] sm:$0xff]  ;;  %v1651_v8 = vld [vmem:[%s376_s6] sm:$0xff]  ;;  %vm449_vm1 = vcmask 7168   ;;  %v1544_v9 = vmov -1e+30   ;;  %v477_v10 = vlaneseq }
  0x31   : > { %v505_v7 = vsel %vm466_vm0, %v1646_v6, 0  ;;  %615 = vrot.lane.b32.xlu1 %v1646_v6, %s1543_s19  ;;  %450 = vst.msk [vmem:[#allocation2] sm:$0xff] %vm449_vm1, %v1544_v9  ;;  %vm523_vm3 = vcmask 130048   ;;  %v1546_v20 = vmov 0   ;;  %v1547_v21 = vmov 0.0   ;;  %v1705_v32 = vld [vmem:[%s390_s10] sm:$0xff] }
  0x32   : > { %514 = vmatpush.bf16.xpose.msra.mxu0 %v505_v7  ;;  %451 = vst.msk [vmem:[#allocation2 + $0x8] sm:$0xff] %vm449_vm1, %v1544_v9  ;;  %v478_v11 = vand.u32 127, %v477_v10  ;;  %1422 = vset.pattern.permute.xlu1 %v1546_v20  ;;  %s1936_s21 = smov (!%p432_p9, %s1532_s21), 1 }
  0x33   : > { %452 = vst.msk [vmem:[#allocation2 + $0x10] sm:$0xff] %vm449_vm1, %v1544_v9  ;;  %v481_v12 = vstv %s475_s7  ;;  %1423 = vset.pattern.permute.xlu2 %v1546_v20  ;;  %1424 = vset.pattern.permute.xlu0 %v1546_v20  ;;  %s1365_s11 = sshll.u32 %s1936_s21, 3 }
  0x34   : > { %453 = vst.msk [vmem:[#allocation2 + $0x18] sm:$0xff] %vm449_vm1, %v1544_v9  ;;  %vm482_vm2 = vcmp.lt.s32.totalorder %v478_v11, %v481_v12  ;;  %586 = vmatpush.bf16.msra.mxu1 %v1705_v32  ;;  %s442_s14 = scalar_lea.vmem %s1921_s4, %s1365_s11 }
  0x35   : > { %454 = vst.msk [vmem:[#allocation2 + $0x20] sm:$0xff] %vm449_vm1, %v1544_v9  ;;  %v1666_v13 = vsel %vm482_vm2, 0.0, %v1544_v9 }
  0x36   : > { %455 = vst.msk [vmem:[#allocation2 + $0x28] sm:$0xff] %vm449_vm1, %v1544_v9 }
  0x37   : > { %456 = vst.msk [vmem:[#allocation2 + $0x30] sm:$0xff] %vm449_vm1, %v1544_v9 }
  0x38   : > { %457 = vst.msk [vmem:[#allocation2 + $0x38] sm:$0xff] %vm449_vm1, %v1544_v9  ;;  %v521_v22 = vld [vmem:[#allocation2] sm:$0xff] }
  0x39   : > { %1351 = vmatmul.msk.bf16.vlgmr.msra.gmra.mxu0 %vm466_vm0, %v1651_v8  ;;  %467 = vst.msk [vmem:[#allocation4] sm:$0xff] %vm466_vm0, %v1547_v21  ;;  %v522_v26 = vld [vmem:[#allocation2 + $0x8] sm:$0xff] }
  0x3a   : > { %458 = vst.msk [vmem:[#allocation3] sm:$0xff] %vm449_vm1, %v1547_v21  ;;  %v638_v7 = vld [vmem:[#allocation2 + $0x10] sm:$0xff] }
  0x3b   : > { %459 = vst.msk [vmem:[#allocation3 + $0x8] sm:$0xff] %vm449_vm1, %v1547_v21  ;;  %v1764_v20 = vld [vmem:[#allocation2 + $0x18] sm:$0xff] }
  0x3c   : > { %460 = vst.msk [vmem:[#allocation3 + $0x10] sm:$0xff] %vm449_vm1, %v1547_v21 }
  0x3d   : > { %461 = vst.msk [vmem:[#allocation3 + $0x18] sm:$0xff] %vm449_vm1, %v1547_v21 }
  0x3e   : > { %462 = vst.msk [vmem:[#allocation3 + $0x20] sm:$0xff] %vm449_vm1, %v1547_v21  ;;  %v1753_v10 = vld [vmem:[#allocation2 + $0x30] sm:$0xff] }
  0x3f   : > { %463 = vst.msk [vmem:[#allocation3 + $0x28] sm:$0xff] %vm449_vm1, %v1547_v21 }
  0x40   : > { %464 = vst.msk [vmem:[#allocation3 + $0x30] sm:$0xff] %vm449_vm1, %v1547_v21  ;;  %v593_v11 = vld [vmem:[#allocation4] sm:$0xff] }
  0x41   : > { %465 = vst.msk [vmem:[#allocation3 + $0x38] sm:$0xff] %vm449_vm1, %v1547_v21 }
  0x42   : > { %468 = vst.msk [vmem:[#allocation4 + $0x8] sm:$0xff] %vm466_vm0, %v1547_v21 }
  0x43   : > { %469 = vst.msk [vmem:[#allocation4 + $0x10] sm:$0xff] %vm466_vm0, %v1547_v21 }
  0x44   : > { %470 = vst.msk [vmem:[#allocation4 + $0x18] sm:$0xff] %vm466_vm0, %v1547_v21 }
  0x45   : > { %471 = vst.msk [vmem:[#allocation4 + $0x20] sm:$0xff] %vm466_vm0, %v1547_v21 }
  0x46   : > { %472 = vst.msk [vmem:[#allocation4 + $0x28] sm:$0xff] %vm466_vm0, %v1547_v21 }
  0x47   : > { %473 = vst.msk [vmem:[#allocation4 + $0x30] sm:$0xff] %vm466_vm0, %v1547_v21 }
  0x48   : > { %474 = vst.msk [vmem:[#allocation4 + $0x38] sm:$0xff] %vm466_vm0, %v1547_v21  ;;  %v1766_v21 = vld [vmem:[#allocation2 + $0x38] sm:$0xff] }
  0xa3   : > { %v616_v30 = vpop.permute.xlu1 %615 }
  0xa4   : > { %v621_v31 = vsel %vm466_vm0, %v616_v30, 0 }
  0xa5   : > { %630 = vmatpush.bf16.xpose.msra.mxu2 %v621_v31 }
  0xb6   : > { %v516_v14 = vpop.f32.mrf.mxu0 }
  0xb7   : > { %v1669_v15 = vadd.f32 %v516_v14, %v1666_v13 }
  0xb9   : > { %v524_v16 = vsel %vm523_vm3, %v1669_v15, -inf }
  0xba   : > { %525 = vmax.xlane.f32.xlu0 %v524_v16 }
  0xbe   : > { %v518_v17 = vpop.f32.mrf.mxu0 }
  0xbf   : > { %v519_v18 = vadd.f32 %v518_v17, %v1666_v13 }
  0xc1   : > { %v527_v19 = vsel %vm523_vm3, %v519_v18, -inf }
  0xc2   : > { %528 = vmax.xlane.f32.xlu0 %v527_v19 }
  0xd6   : > { %729 = vrot.lane.b32.xlu0 %v1646_v6, %s1545_s8 }
 0x12d   : > { %v526_v23 = vpop.xlane.xlu0 %525 }
 0x12e   : > { %v530_v24 = vmax.f32 %v521_v22, %v526_v23 }
 0x130   : > { %v532_v25 = vsub.f32 %v521_v22, %v530_v24  ;;  %611 = vst.msk [vmem:[#allocation2] sm:$0xff] %vm449_vm1, %v530_v24  ;;  %540 = vperm.xlu1 %1422, %v530_v24  }
 0x132   : > { %v534_v52 = vmul.f32 1.442695, %v532_v25 }
 0x135   : > { %v529_v27 = vpop.xlane.xlu0 %528 }
 0x136   : > { %v531_v28 = vmax.f32 %v522_v26, %v529_v27 }
 0x138   : > { %v533_v29 = vsub.f32 %v522_v26, %v531_v28  ;;  %612 = vst.msk [vmem:[#allocation2 + $0x8] sm:$0xff] %vm449_vm1, %v531_v28  ;;  %843 = vrot.lane.b32.xlu1 %v1646_v6, %s1548_s9  ;;  %545 = vperm.xlu2 %1423, %v531_v28   ;;  %v594_v28 = vld [vmem:[#allocation4 + $0x8] sm:$0xff] }
 0x13a   : > { %v536_v63 = vmul.f32 1.442695, %v533_v29 }
 0x140   : > { %841 = vrot.lane.b32.xlu1 %v1651_v8, %s1548_s9  ;;  %613 = vrot.lane.b32.xlu2 %v1651_v8, %s1543_s19 }
 0x148   : > { %727 = vrot.lane.b32.xlu2 %v1651_v8, %s1545_s8  ;;  %v730_v34 = vpop.permute.xlu0 %729 }
 0x149   : > { %v735_v35 = vsel %vm466_vm0, %v730_v34, 0 }
 0x14a   : > { %744 = vmatpush.bf16.xpose.msrb.mxu1 %v735_v35 }
 0x192   : > { %v546_v33 = vpop.permute.xlu2 %545 }
 0x193   : > { %v549_v37 = vsub.f32 %v519_v18, %v546_v33 }
 0x195   : > { %v552_v38 = vmul.f32 1.442695, %v549_v37 }
 0x197   : > { %1440 = vpow2.f32 %v552_v38  ;;  %v554_v38 = vld [vmem:[#allocation3] sm:$0xff] }
 0x19a   : > { %v614_v36 = vpop.permute.xlu2 %613 }
 0x19b   : > { %1357 = vmatmul.msk.bf16.vlgmr.msra.gmra.mxu2 %vm466_vm0, %v614_v36 }
 0x19d   : > { %v1712_v44 = vpop.eup %1440 }
 0x19e   : > { %v561_v34 = vsel %vm523_vm3, %v1712_v44, 0.0 }
 0x1a2   : > { %v541_v39 = vpop.permute.xlu1 %540  ;;  %v728_v48 = vpop.permute.xlu2 %727 }
 0x1a3   : > { %v548_v40 = vsub.f32 %v1669_v15, %v541_v39 }
 0x1a5   : > { %v550_v41 = vmul.f32 1.442695, %v548_v40 }
 0x1a7   : > { %1442 = vpow2.f32 %v550_v41 }
 0x1a8   : > { %1444 = vpow2.f32 %v534_v52 }
 0x1a9   : > { %1446 = vpow2.f32 %v536_v63 }
 0x1aa   : > { %v844_v42 = vpop.permute.xlu1 %843 }
 0x1ab   : > { %v849_v43 = vsel %vm466_vm0, %v844_v42, 0  ;;  %v752_v42 = vld [vmem:[#allocation2 + $0x20] sm:$0xff] }
 0x1ac   : > { %858 = vmatpush.bf16.xpose.msrb.mxu0 %v849_v43 }
 0x1ad   : > { %v1443_v45 = vpop.eup %1442 }
 0x1ae   : > { %v569_v46 = vpack.c.bf16 %v1712_v44, %v1443_v45  ;;  %v1728_v57 = vpop.eup %1444  ;;  %v558_v4 = vsel %vm523_vm3, %v1443_v45, 0.0 }
 0x1af   : > { %v1741_v0 = vpop.eup %1446  ;;  %v556_v39 = vmul.f32 %v1728_v57, %v554_v38  ;;  %v899_v38 = vld [vmem:[#allocation3 + $0x30] sm:$0xff] }
 0x1b0   : > { %1356 = vmatmul.msk.bf16.vlgmr.msra.gmra.mxu1 %vm523_vm3, %v569_v46 }
 0x1b2   : > { %v842_v47 = vpop.permute.xlu1 %841 }
 0x1b3   : > { %1361 = vmatmul.msk.bf16.vlgmr.msrb.gmra.mxu0 %vm466_vm0, %v842_v47 }
 0x1c0   : > { %1359 = vmatmul.msk.bf16.vlgmr.msrb.gmra.mxu1 %vm466_vm0, %v728_v48 }
 0x21e   : > { %v632_v49 = vpop.f32.mrf.mxu2 }
 0x21f   : > { %v1719_v50 = vadd.f32 %v632_v49, %v1666_v13 }
 0x221   : > { %v640_v51 = vsel %vm523_vm3, %v1719_v50, -inf }
 0x222   : > { %641 = vmax.xlane.f32.xlu0 %v640_v51 }
 0x226   : > { %v634_v56 = vpop.f32.mrf.mxu2 }
 0x227   : > { %v1732_v58 = vadd.f32 %v634_v56, %v1666_v13 }
 0x229   : > { %v643_v61 = vsel %vm523_vm3, %v1732_v58, -inf }
 0x22d   : > { %v588_v1 = vpop.f32.mrf.mxu1 }
 0x230   : > { %v860_v53 = vpop.f32.mrf.mxu0 }
 0x231   : > { %v1724_v54 = vadd.f32 %v860_v53, %v1666_v13 }
 0x233   : > { %v868_v55 = vsel %vm523_vm3, %v1724_v54, -inf }
 0x234   : > { %869 = vmax.xlane.f32.xlu2 %v868_v55 }
 0x235   : > { %v590_v2 = vpop.f32.mrf.mxu1 }
 0x236   : > { %597 = vperm.xlu0 %1424, %v1728_v57  }
 0x238   : > { %v862_v59 = vpop.f32.mrf.mxu0 }
 0x239   : > { %v1735_v60 = vadd.f32 %v862_v59, %v1666_v13 }
 0x23b   : > { %v871_v62 = vsel %vm523_vm3, %v1735_v60, -inf }
 0x23c   : > { %644 = vmax.xlane.f32.xlu2 %v643_v61  ;;  %872 = vmax.xlane.f32.xlu1 %v871_v62 }
 0x23d   : > { %v746_v3 = vpop.f32.mrf.mxu1 }
 0x23e   : > { %v1746_v5 = vadd.f32 %v746_v3, %v1666_v13 }
 0x240   : > { %v754_v6 = vsel %vm523_vm3, %v1746_v5, -inf }
 0x245   : > { %v748_v35 = vpop.f32.mrf.mxu1 }
 0x246   : > { %v1790_v36 = vadd.f32 %v748_v35, %v1666_v13  ;;  %v671_v35 = vld [vmem:[#allocation3 + $0x10] sm:$0xff] }
 0x248   : > { %v757_v37 = vsel %vm523_vm3, %v1790_v36, -inf }
 0x254   : > { %602 = vperm.xlu2 %1423, %v1741_v0  }
 0x27d   : > { %559 = vadd.xlane.f32.xlu2 %v558_v4  ;;  %v753_v4 = vld [vmem:[#allocation2 + $0x28] sm:$0xff] }
 0x285   : > { %755 = vmax.xlane.f32.xlu2 %v754_v6 }
 0x295   : > { %v642_v8 = vpop.xlane.xlu0 %641 }
 0x296   : > { %v646_v9 = vmax.f32 %v638_v7, %v642_v8 }
 0x298   : > { %725 = vst.msk [vmem:[#allocation2 + $0x10] sm:$0xff] %vm449_vm1, %v646_v9  ;;  %656 = vperm.xlu1 %1422, %v646_v9   ;;  %v648_v18 = vsub.f32 %v638_v7, %v646_v9 }
 0x29a   : > { %v650_v22 = vmul.f32 1.442695, %v648_v18 }
 0x29c   : > { %1448 = vpow2.f32 %v650_v22 }
 0x29d   : > { %686 = vrot.lane.b32.xlu2 %v1705_v32, %s1543_s19 }
 0x2a2   : > { %v1783_v31 = vpop.eup %1448 }
 0x2a7   : > { %v870_v12 = vpop.xlane.xlu2 %869 }
 0x2a8   : > { %v1756_v14 = vmax.f32 %v1753_v10, %v870_v12  ;;  %v598_v15 = vpop.permute.xlu0 %597 }
 0x2a9   : > { %v605_v16 = vmul.f32 %v598_v15, %v593_v11 }
 0x2aa   : > { %v876_v17 = vsub.f32 %v1753_v10, %v1756_v14  ;;  %953 = vst.msk [vmem:[#allocation2 + $0x30] sm:$0xff] %vm449_vm1, %v1756_v14  ;;  %884 = vperm.xlu2 %1423, %v1756_v14   ;;  %v707_v10 = vld [vmem:[#allocation4 + $0x10] sm:$0xff] }
 0x2ab   : > { %v607_v19 = vadd.f32 %v605_v16, %v588_v1 }
 0x2ad   : > { %609 = vst.msk [vmem:[#allocation4] sm:$0xff] %vm466_vm0, %v607_v19 }
 0x2af   : > { %v645_v23 = vpop.xlane.xlu2 %644  ;;  %v873_v24 = vpop.xlane.xlu1 %872 }
 0x2b0   : > { %v1769_v25 = vmax.f32 %v1764_v20, %v645_v23  ;;  %v1772_v26 = vmax.f32 %v1766_v21, %v873_v24 }
 0x2b2   : > { %v649_v27 = vsub.f32 %v1764_v20, %v1769_v25  ;;  %726 = vst.msk [vmem:[#allocation2 + $0x18] sm:$0xff] %vm449_vm1, %v1769_v25  ;;  %661 = vperm.xlu0 %1424, %v1769_v25   ;;  %914 = vrot.lane.b32.xlu2 %v1705_v32, %s1548_s9  ;;  %v673_v20 = vmul.f32 %v1783_v31, %v671_v35 }
 0x2b3   : > { %954 = vst.msk [vmem:[#allocation2 + $0x38] sm:$0xff] %vm449_vm1, %v1772_v26 }
 0x2b7   : > { %v603_v29 = vpop.permute.xlu2 %602 }
 0x2b8   : > { %v606_v30 = vmul.f32 %v603_v29, %v594_v28 }
 0x2ba   : > { %v608_v33 = vadd.f32 %v606_v30, %v590_v2  ;;  %711 = vperm.xlu2 %1423, %v1783_v31   ;;  %v555_v2 = vld [vmem:[#allocation3 + $0x8] sm:$0xff] }
 0x2bc   : > { %610 = vst.msk [vmem:[#allocation4 + $0x8] sm:$0xff] %vm466_vm0, %v608_v33 }
 0x2c2   : > { %562 = vadd.xlane.f32.xlu1 %v561_v34  ;;  %v878_v34 = vmul.f32 1.442695, %v876_v17 }
 0x2ca   : > { %758 = vmax.xlane.f32.xlu1 %v757_v37 }
 0x2f0   : > { %v560_v40 = vpop.xlane.xlu2 %559 }
 0x2f1   : > { %v564_v41 = vadd.f32 %v560_v40, %v556_v39 }
 0x2f3   : > { %567 = vst.msk [vmem:[#allocation3] sm:$0xff] %vm449_vm1, %v564_v41 }
 0x2f8   : > { %v756_v43 = vpop.xlane.xlu2 %755 }
 0x2f9   : > { %v760_v45 = vmax.f32 %v752_v42, %v756_v43 }
 0x2fb   : > { %v762_v44 = vsub.f32 %v752_v42, %v760_v45  ;;  %839 = vst.msk [vmem:[#allocation2 + $0x20] sm:$0xff] %vm449_vm1, %v760_v45  ;;  %770 = vperm.xlu0 %1424, %v760_v45  }
 0x2fd   : > { %v764_v24 = vmul.f32 1.442695, %v762_v44 }
 0x300   : > { %v687_v13 = vpop.permute.xlu2 %686 }
 0x301   : > { %699 = vmatpush.bf16.msra.mxu3 %v687_v13 }
 0x303   : > { %889 = vperm.xlu0 %1424, %v1772_v26  }
 0x308   : > { %v885_v46 = vpop.permute.xlu2 %884 }
 0x309   : > { %v892_v52 = vsub.f32 %v1724_v54, %v885_v46  ;;  %v557_v54 = vmul.f32 %v1741_v0, %v555_v2 }
 0x30a   : > { %v657_v48 = vpop.permute.xlu1 %656 }
 0x30b   : > { %v664_v49 = vsub.f32 %v1719_v50, %v657_v48  ;;  %v894_v56 = vmul.f32 1.442695, %v892_v52 }
 0x30d   : > { %v666_v51 = vmul.f32 1.442695, %v664_v49 }
 0x30f   : > { %1450 = vpow2.f32 %v666_v51 }
 0x310   : > { %v915_v47 = vpop.permute.xlu2 %914 }
 0x311   : > { %927 = vmatpush.bf16.msrb.mxu2 %v915_v47  ;;  %v960_v47 = vld [vmem:[#allocation3] sm:$0xff] }
 0x315   : > { %v1451_v59 = vpop.eup %1450 }
 0x316   : > { %v675_v61 = vsel %vm523_vm3, %v1451_v59, 0.0 }
 0x318   : > { %v712_v14 = vpop.permute.xlu2 %711 }
 0x319   : > { %v719_v31 = vmul.f32 %v712_v14, %v707_v10 }
 0x324   : > { %v662_v53 = vpop.permute.xlu0 %661 }
 0x325   : > { %v665_v55 = vsub.f32 %v1732_v58, %v662_v53  ;;  %v877_v53 = vsub.f32 %v1766_v21, %v1772_v26 }
 0x327   : > { %v668_v57 = vmul.f32 1.442695, %v665_v55 }
 0x329   : > { %1452 = vpow2.f32 %v668_v57 }
 0x32a   : > { %1454 = vpow2.f32 %v894_v56 }
 0x32d   : > { %676 = vadd.xlane.f32.xlu0 %v675_v61  ;;  %v785_v61 = vld [vmem:[#allocation3 + $0x20] sm:$0xff] }
 0x32f   : > { %v1453_v62 = vpop.eup %1452 }
 0x330   : > { %v685_v63 = vpack.c.bf16 %v1453_v62, %v1451_v59  ;;  %v1455_v1 = vpop.eup %1454  ;;  %v678_v0 = vsel %vm523_vm3, %v1453_v62, 0.0  ;;  %v880_v59 = vmul.f32 1.442695, %v877_v53 }
 0x331   : > { %v903_v50 = vsel %vm523_vm3, %v1455_v1, 0.0 }
 0x332   : > { %1358 = vmatmul.msk.bf16.vlgmr.msra.gmra.mxu3 %vm523_vm3, %v685_v63 }
 0x335   : > { %904 = vadd.xlane.f32.xlu0 %v903_v50  ;;  %v563_v58 = vpop.xlane.xlu1 %562 }
 0x336   : > { %v565_v3 = vadd.f32 %v563_v58, %v557_v54  ;;  %v900_v54 = vld [vmem:[#allocation3 + $0x38] sm:$0xff] }
 0x337   : > { %v708_v58 = vld [vmem:[#allocation4 + $0x18] sm:$0xff] }
 0x338   : > { %568 = vst.msk [vmem:[#allocation3 + $0x8] sm:$0xff] %vm449_vm1, %v565_v3 }
 0x33d   : > { %v759_v6 = vpop.xlane.xlu1 %758 }
 0x33e   : > { %v761_v7 = vmax.f32 %v753_v4, %v759_v6 }
 0x340   : > { %v763_v8 = vsub.f32 %v753_v4, %v761_v7  ;;  %840 = vst.msk [vmem:[#allocation2 + $0x28] sm:$0xff] %vm449_vm1, %v761_v7  ;;  %775 = vperm.xlu1 %1422, %v761_v7  }
 0x342   : > { %v766_v29 = vmul.f32 1.442695, %v763_v8 }
 0x348   : > { %800 = vrot.lane.b32.xlu1 %v1705_v32, %s1545_s8 }
 0x36d   : > { %v771_v9 = vpop.permute.xlu0 %770 }
 0x36e   : > { %v778_v11 = vsub.f32 %v1746_v5, %v771_v9  ;;  %v652_v5 = vmul.f32 1.442695, %v649_v27 }
 0x370   : > { %v780_v12 = vmul.f32 1.442695, %v778_v11 }
 0x372   : > { %1456 = vpow2.f32 %v780_v12  ;;  %679 = vadd.xlane.f32.xlu1 %v678_v0  ;;  %v961_v12 = vld [vmem:[#allocation3 + $0x8] sm:$0xff] }
 0x373   : > { %v786_v0 = vld [vmem:[#allocation3 + $0x28] sm:$0xff] }
 0x375   : > { %v890_v15 = vpop.permute.xlu0 %889 }
 0x376   : > { %v893_v16 = vsub.f32 %v1735_v60, %v890_v15 }
 0x378   : > { %v1457_v18 = vpop.eup %1456  ;;  %v896_v19 = vmul.f32 1.442695, %v893_v16 }
 0x379   : > { %v789_v22 = vsel %vm523_vm3, %v1457_v18, 0.0 }
 0x37a   : > { %1458 = vpow2.f32 %v896_v19  ;;  %790 = vadd.xlane.f32.xlu2 %v789_v22  ;;  %v821_v22 = vld [vmem:[#allocation4 + $0x20] sm:$0xff] }
 0x37b   : > { %1460 = vpow2.f32 %v764_v24 }
 0x37c   : > { %1462 = vpow2.f32 %v652_v5 }
 0x37d   : > { %1464 = vpow2.f32 %v766_v29 }
 0x37e   : > { %1466 = vpow2.f32 %v878_v34 }
 0x380   : > { %v1459_v23 = vpop.eup %1458 }
 0x381   : > { %v906_v32 = vsel %vm523_vm3, %v1459_v23, 0.0  ;;  %v913_v28 = vpack.c.bf16 %v1459_v23, %v1455_v1  ;;  %v1461_v60 = vpop.eup %1460 }
 0x382   : > { %907 = vadd.xlane.f32.xlu0 %v906_v32  ;;  %v1463_v30 = vpop.eup %1462  ;;  %v787_v62 = vmul.f32 %v1461_v60, %v785_v61 }
 0x383   : > { %1362 = vmatmul.msk.bf16.vlgmr.msrb.gmra.mxu2 %vm523_vm3, %v913_v28  ;;  %v1818_v33 = vpop.eup %1464  ;;  %v935_v28 = vld [vmem:[#allocation4 + $0x30] sm:$0xff] }
 0x384   : > { %v1467_v37 = vpop.eup %1466  ;;  %v788_v15 = vmul.f32 %v1818_v33, %v786_v0 }
 0x385   : > { %v901_v39 = vmul.f32 %v1467_v37, %v899_v38 }
 0x38b   : > { %825 = vperm.xlu1 %1422, %v1461_v60  }
 0x392   : > { %716 = vperm.xlu2 %1423, %v1463_v30  }
 0x39a   : > { %830 = vperm.xlu2 %1423, %v1818_v33  }
 0x3a0   : > { %v677_v25 = vpop.xlane.xlu0 %676 }
 0x3a1   : > { %v681_v27 = vadd.f32 %v677_v25, %v673_v20 }
 0x3a3   : > { %683 = vst.msk [vmem:[#allocation3 + $0x10] sm:$0xff] %vm449_vm1, %v681_v27 }
 0x3a8   : > { %v905_v40 = vpop.xlane.xlu0 %904 }
 0x3a9   : > { %v909_v41 = vadd.f32 %v905_v40, %v901_v39 }
 0x3aa   : > { %v1004_v42 = vld [vmem:[#allocation3 + $0x10] sm:$0xff] }
 0x3ab   : > { %911 = vst.msk [vmem:[#allocation3 + $0x30] sm:$0xff] %vm449_vm1, %v909_v41  ;;  %1008 = vperm.xlu1 %1422, %v1004_v42  }
 0x3b2   : > { %v776_v17 = vpop.permute.xlu1 %775  ;;  %v1092_v43 = vld [vmem:[#allocation3 + $0x30] sm:$0xff] }
 0x3b3   : > { %v779_v45 = vsub.f32 %v1790_v36, %v776_v17  ;;  %1096 = vperm.xlu2 %1423, %v1092_v43   ;;  %v672_v36 = vld [vmem:[#allocation3 + $0x18] sm:$0xff] }
 0x3b4   : > { %v674_v55 = vmul.f32 %v1463_v30, %v672_v36  ;;  %v822_v30 = vld [vmem:[#allocation4 + $0x28] sm:$0xff] }
 0x3b5   : > { %v782_v44 = vmul.f32 1.442695, %v779_v45  ;;  %v701_v13 = vpop.f32.mrf.mxu3 }
 0x3b6   : > { %v721_v46 = vadd.f32 %v719_v31, %v701_v13 }
 0x3b7   : > { %1468 = vpow2.f32 %v782_v44 }
 0x3b8   : > { %723 = vst.msk [vmem:[#allocation4 + $0x10] sm:$0xff] %vm466_vm0, %v721_v46  ;;  %1470 = vpow2.f32 %v880_v59 }
 0x3ba   : > { %v801_v48 = vpop.permute.xlu1 %800 }
 0x3bb   : > { %964 = vperm.xlu2 %1423, %v960_v47   ;;  %813 = vmatpush.bf16.msrb.mxu3 %v801_v48 }
 0x3bd   : > { %v1469_v49 = vpop.eup %1468  ;;  %v703_v7 = vpop.f32.mrf.mxu3 }
 0x3be   : > { %v792_v51 = vsel %vm523_vm3, %v1469_v49, 0.0  ;;  %v799_v52 = vpack.c.bf16 %v1469_v49, %v1457_v18  ;;  %v1471_v50 = vpop.eup %1470 }
 0x3bf   : > { %793 = vadd.xlane.f32.xlu0 %v792_v51  ;;  %v902_v3 = vmul.f32 %v1471_v50, %v900_v54  ;;  %v1002_v53 = vld [vmem:[#allocation4 + $0x10] sm:$0xff] }
 0x3c0   : > { %1360 = vmatmul.msk.bf16.vlgmr.msrb.gmra.mxu3 %vm523_vm3, %v799_v52 }
 0x3d3   : > { %939 = vperm.xlu0 %1424, %v1467_v37  }
 0x3e5   : > { %v680_v56 = vpop.xlane.xlu1 %679 }
 0x3e6   : > { %v682_v57 = vadd.f32 %v680_v56, %v674_v55 }
 0x3e8   : > { %684 = vst.msk [vmem:[#allocation3 + $0x18] sm:$0xff] %vm449_vm1, %v682_v57 }
 0x3ed   : > { %v791_v63 = vpop.xlane.xlu2 %790 }
 0x3ee   : > { %v795_v1 = vadd.f32 %v791_v63, %v787_v62 }
 0x3ef   : > { %v1005_v2 = vld [vmem:[#allocation3 + $0x18] sm:$0xff] }
 0x3f0   : > { %797 = vst.msk [vmem:[#allocation3 + $0x20] sm:$0xff] %vm449_vm1, %v795_v1  ;;  %1013 = vperm.xlu1 %1422, %v1005_v2  }
 0x3f5   : > { %v717_v21 = vpop.permute.xlu2 %716  ;;  %v908_v26 = vpop.xlane.xlu0 %907 }
 0x3f6   : > { %v720_v4 = vmul.f32 %v717_v21, %v708_v58  ;;  %v910_v6 = vadd.f32 %v908_v26, %v902_v3 }
 0x3f7   : > { %v1048_v8 = vld [vmem:[#allocation3 + $0x20] sm:$0xff] }
 0x3f8   : > { %v722_v9 = vadd.f32 %v720_v4, %v703_v7  ;;  %912 = vst.msk [vmem:[#allocation3 + $0x38] sm:$0xff] %vm449_vm1, %v910_v6  ;;  %1052 = vperm.xlu1 %1422, %v1048_v8  }
 0x3fa   : > { %724 = vst.msk [vmem:[#allocation4 + $0x18] sm:$0xff] %vm466_vm0, %v722_v9  ;;  %v936_v9 = vld [vmem:[#allocation4 + $0x38] sm:$0xff] }
 0x3fd   : > { %v826_v23 = vpop.permute.xlu1 %825  ;;  %v831_v34 = vpop.permute.xlu2 %830 }
 0x3fe   : > { %v833_v24 = vmul.f32 %v826_v23, %v821_v22  ;;  %v834_v20 = vmul.f32 %v831_v34, %v822_v30 }
 0x3ff   : > { %v1093_v11 = vld [vmem:[#allocation3 + $0x38] sm:$0xff] }
 0x400   : > { %1101 = vperm.xlu1 %1422, %v1093_v11  }
 0x401   : > { %v1003_v55 = vld [vmem:[#allocation4 + $0x18] sm:$0xff] }
 0x406   : > { %v929_v33 = vpop.f32.mrf.mxu2 }
 0x408   : > { %969 = vperm.xlu1 %1422, %v961_v12  }
 0x40d   : > { %v1843_v63 = vpop.permute.xlu2 %1096 }
 0x40e   : > { %vm1109_vm12 = vweird.f32 %v1843_v63  ;;  %v1113_v23 = vand.u32 2147483647, %v1843_v63 }
 0x41d   : > { %v1009_v37 = vpop.permute.xlu1 %1008 }
 0x41e   : > { %1472 = vrcp.f32 %v1009_v37  ;;  %v1027_v43 = vand.u32 2147483648, %v1009_v37  ;;  %vm1021_vm5 = vweird.f32 %v1009_v37  ;;  %v1025_v31 = vand.u32 2147483647, %v1009_v37 }
 0x420   : > { %v1028_v48 = vor.u32 1.1754944e-38, %v1027_v43  ;;  %vm1026_vm9 = vcmp.eq.f32.partialorder %v1025_v31, 8.507059e+37 }
 0x424   : > { %v1473_v38 = vpop.eup %1472 }
 0x425   : > { %v1017_v39 = vmul.f32 %v1473_v38, %v1009_v37  ;;  %vm1022_vm4 = vweird.f32 %v1473_v38 }
 0x426   : > { %vm1023_vm6 = vmor %vm1021_vm5, %vm1022_vm4 }
 0x427   : > { %v1018_v41 = vsub.f32 1.0, %v1017_v39 }
 0x429   : > { %v1019_v42 = vmul.f32 %v1473_v38, %v1018_v41 }
 0x42b   : > { %v1020_v17 = vadd.f32 %v1473_v38, %v1019_v42 }
 0x42d   : > { %v1024_v47 = vsel %vm1023_vm6, %v1473_v38, %v1020_v17 }
 0x42e   : > { %v1029_v52 = vsel %vm1026_vm9, %v1028_v48, %v1024_v47 }
 0x42f   : > { %v1030_v57 = vmul.f32 %v1029_v52, %v1002_v53 }
 0x432   : > { %v794_v16 = vpop.xlane.xlu0 %793 }
 0x433   : > { %v796_v18 = vadd.f32 %v794_v16, %v788_v15 }
 0x435   : > { %798 = vst.msk [vmem:[#allocation3 + $0x28] sm:$0xff] %vm449_vm1, %v796_v18 }
 0x43c   : > { %v1049_v19 = vld [vmem:[#allocation3 + $0x28] sm:$0xff] }
 0x43d   : > { %1057 = vperm.xlu0 %1424, %v1049_v19  }
 0x443   : > { %v815_v32 = vpop.f32.mrf.mxu3 }
 0x444   : > { %v835_v5 = vadd.f32 %v833_v24, %v815_v32  ;;  %v931_v24 = vpop.f32.mrf.mxu2 }
 0x445   : > { %944 = vperm.xlu0 %1424, %v1471_v50   ;;  %v940_v60 = vpop.permute.xlu0 %939 }
 0x446   : > { %837 = vst.msk [vmem:[#allocation4 + $0x20] sm:$0xff] %vm466_vm0, %v835_v5  ;;  %v947_v29 = vmul.f32 %v940_v60, %v935_v28  ;;  %v1115_v5 = vand.u32 2147483648, %v1843_v63 }
 0x448   : > { %v949_v35 = vadd.f32 %v947_v29, %v929_v33 }
 0x44a   : > { %951 = vst.msk [vmem:[#allocation4 + $0x30] sm:$0xff] %vm466_vm0, %v949_v35 }
 0x44b   : > { %v817_v25 = vpop.f32.mrf.mxu3 }
 0x44c   : > { %v836_v27 = vadd.f32 %v834_v20, %v817_v25 }
 0x44d   : > { %v1046_v17 = vld [vmem:[#allocation4 + $0x20] sm:$0xff] }
 0x44e   : > { %838 = vst.msk [vmem:[#allocation4 + $0x28] sm:$0xff] %vm466_vm0, %v836_v27 }
 0x455   : > { %v1047_v43 = vld [vmem:[#allocation4 + $0x28] sm:$0xff] }
 0x462   : > { %v1014_v40 = vpop.permute.xlu1 %1013 }
 0x463   : > { %1474 = vrcp.f32 %v1014_v40  ;;  %v1042_v13 = vand.u32 2147483648, %v1014_v40  ;;  %v1040_v46 = vand.u32 2147483647, %v1014_v40  ;;  %vm1036_vm8 = vweird.f32 %v1014_v40 }
 0x465   : > { %v1043_v51 = vor.u32 1.1754944e-38, %v1042_v13  ;;  %vm1041_vm11 = vcmp.eq.f32.partialorder %v1040_v46, 8.507059e+37  ;;  %v1116_v13 = vor.u32 1.1754944e-38, %v1115_v5 }
 0x469   : > { %v1475_v10 = vpop.eup %1474 }
 0x46a   : > { %v1032_v14 = vmul.f32 %v1475_v10, %v1014_v40  ;;  %vm1037_vm7 = vweird.f32 %v1475_v10  ;;  %v1053_v62 = vpop.permute.xlu1 %1052 }
 0x46b   : > { %vm1038_vm10 = vmor %vm1036_vm8, %vm1037_vm7  ;;  %1476 = vrcp.f32 %v1053_v62  ;;  %v1071_v18 = vand.u32 2147483648, %v1053_v62  ;;  %vm1065_vm14 = vweird.f32 %v1053_v62  ;;  %v1069_v32 = vand.u32 2147483647, %v1053_v62 }
 0x46c   : > { %v1033_v45 = vsub.f32 1.0, %v1032_v14  ;;  %1478 = vrcp.f32 %v1843_v63 }
 0x46d   : > { %v1072_v25 = vor.u32 1.1754944e-38, %v1071_v18  ;;  %vm1070_vm5 = vcmp.eq.f32.partialorder %v1069_v32, 8.507059e+37  ;;  %v959_v32 = vld [vmem:[#allocation4 + $0x8] sm:$0xff] }
 0x46e   : > { %v1034_v44 = vmul.f32 %v1475_v10, %v1033_v45 }
 0x470   : > { %v1035_v49 = vadd.f32 %v1475_v10, %v1034_v44 }
 0x471   : > { %v1477_v2 = vpop.eup %1476 }
 0x472   : > { %v1039_v36 = vsel %vm1038_vm10, %v1475_v10, %v1035_v49  ;;  %v1845_v1 = vpop.permute.xlu1 %1101  ;;  %v1061_v50 = vmul.f32 %v1477_v2, %v1053_v62  ;;  %v1849_v54 = vpop.eup %1478  ;;  %vm1066_vm13 = vweird.f32 %v1477_v2  ;;  %v1090_v49 = vld [vmem:[#allocation4 + $0x30] sm:$0xff] }
 0x473   : > { %v1044_v56 = vsel %vm1041_vm11, %v1043_v51, %v1039_v36  ;;  %1480 = vrcp.f32 %v1845_v1  ;;  %v1105_v26 = vmul.f32 %v1849_v54, %v1843_v63  ;;  %vm1110_vm15 = vweird.f32 %v1849_v54  ;;  %vm1863_vm1 = vmor %vm1065_vm14, %vm1066_vm13 }
 0x474   : > { %v1045_v59 = vmul.f32 %v1044_v56, %v1003_v55  ;;  %v1062_v3 = vsub.f32 1.0, %v1061_v50  ;;  %vm1875_vm4 = vmor %vm1109_vm12, %vm1110_vm15  ;;  %v1130_v38 = vand.u32 2147483648, %v1845_v1  ;;  %vm1124_vm7 = vweird.f32 %v1845_v1 }
 0x475   : > { %v1106_v7 = vsub.f32 1.0, %v1105_v26  ;;  %v1128_v40 = vand.u32 2147483647, %v1845_v1  ;;  %vm1114_vm11 = vcmp.eq.f32.partialorder %v1113_v23, 8.507059e+37 }
 0x476   : > { %v1425_v61 = vpack.i.bf16 %v1045_v59, %v1030_v57  ;;  %v1063_v6 = vmul.f32 %v1477_v2, %v1062_v3  ;;  %v1131_v46 = vor.u32 1.1754944e-38, %v1130_v38  ;;  %v965_v59 = vpop.permute.xlu2 %964 }
 0x477   : > { %v1107_v16 = vmul.f32 %v1849_v54, %v1106_v7  ;;  %vm1129_vm12 = vcmp.eq.f32.partialorder %v1128_v40, 8.507059e+37  ;;  %vm977_vm15 = vweird.f32 %v965_v59  ;;  %v981_v7 = vand.u32 2147483647, %v965_v59 }
 0x478   : > { %1426 = vrot.lane.b32.xlu0 %v1425_v61, %s1548_s9  ;;  %v1064_v12 = vadd.f32 %v1477_v2, %v1063_v6 }
 0x479   : > { %v1851_v58 = vpop.eup %1480  ;;  %v1108_v20 = vadd.f32 %v1849_v54, %v1107_v16 }
 0x47a   : > { %v1120_v4 = vmul.f32 %v1851_v58, %v1845_v1  ;;  %v1068_v35 = vsel %vm1863_vm1, %v1477_v2, %v1064_v12  ;;  %vm1125_vm3 = vweird.f32 %v1851_v58  ;;  %v970_v61 = vpop.permute.xlu1 %969 }
 0x47b   : > { %v1073_v42 = vsel %vm1070_vm5, %v1072_v25, %v1068_v35  ;;  %vm1883_vm9 = vmor %vm1124_vm7, %vm1125_vm3  ;;  %v1112_v31 = vsel %vm1875_vm4, %v1849_v54, %v1108_v20  ;;  %v998_v6 = vand.u32 2147483648, %v970_v61  ;;  %vm982_vm4 = vcmp.eq.f32.partialorder %v981_v7, 8.507059e+37 }
 0x47c   : > { %v1121_v8 = vsub.f32 1.0, %v1120_v4  ;;  %v1074_v47 = vmul.f32 %v1073_v42, %v1046_v17  ;;  %v1117_v36 = vsel %vm1114_vm11, %v1116_v13, %v1112_v31  ;;  %v983_v4 = vand.u32 2147483648, %v965_v59 }
 0x47d   : > { %v1118_v55 = vmul.f32 %v1117_v36, %v1090_v49  ;;  %vm1163_vm7 = vcmask 785408  }
 0x47e   : > { %v1122_v19 = vmul.f32 %v1851_v58, %v1121_v8  ;;  %v996_v8 = vand.u32 2147483647, %v970_v61  ;;  %v984_v12 = vor.u32 1.1754944e-38, %v983_v4 }
 0x480   : > { %v1123_v27 = vadd.f32 %v1851_v58, %v1122_v19  ;;  %vm997_vm5 = vcmp.eq.f32.partialorder %v996_v8, 8.507059e+37 }
 0x482   : > { %v1127_v44 = vsel %vm1883_vm9, %v1851_v58, %v1123_v27 }
 0x483   : > { %v1132_v53 = vsel %vm1129_vm12, %v1131_v46, %v1127_v44 }
 0x4af   : > { %v1058_v21 = vpop.permute.xlu0 %1057 }
 0x4b0   : > { %1482 = vrcp.f32 %v1058_v21  ;;  %v1086_v29 = vand.u32 2147483648, %v1058_v21  ;;  %v1084_v33 = vand.u32 2147483647, %v1058_v21  ;;  %vm1080_vm6 = vweird.f32 %v1058_v21 }
 0x4b1   : > { %1484 = vrcp.f32 %v965_v59 }
 0x4b2   : > { %v1087_v41 = vor.u32 1.1754944e-38, %v1086_v29  ;;  %vm1085_vm10 = vcmp.eq.f32.partialorder %v1084_v33, 8.507059e+37  ;;  %1486 = vrcp.f32 %v970_v61 }
 0x4b6   : > { %v1483_v11 = vpop.eup %1482 }
 0x4b7   : > { %v1076_v0 = vmul.f32 %v1483_v11, %v1058_v21  ;;  %v945_v15 = vpop.permute.xlu0 %944  ;;  %vm1081_vm2 = vweird.f32 %v1483_v11  ;;  %v1485_v62 = vpop.eup %1484 }
 0x4b8   : > { %v948_v22 = vmul.f32 %v945_v15, %v936_v9  ;;  %vm1082_vm8 = vmor %vm1080_vm6, %vm1081_vm2  ;;  %v1487_v63 = vpop.eup %1486  ;;  %v973_v1 = vmul.f32 %v1485_v62, %v965_v59  ;;  %vm978_vm13 = vweird.f32 %v1485_v62  ;;  %vm992_vm2 = vweird.f32 %v970_v61 }
 0x4b9   : > { %v1077_v28 = vsub.f32 1.0, %v1076_v0  ;;  %v988_v2 = vmul.f32 %v1487_v63, %v970_v61  ;;  %vm993_vm14 = vweird.f32 %v1487_v63  ;;  %vm979_vm1 = vmor %vm977_vm15, %vm978_vm13  ;;  %v999_v0 = vor.u32 1.1754944e-38, %v998_v6 }
 0x4ba   : > { %v950_v30 = vadd.f32 %v948_v22, %v931_v24  ;;  %v974_v50 = vsub.f32 1.0, %v973_v1  ;;  %vm994_vm3 = vmor %vm992_vm2, %vm993_vm14  ;;  %v958_v24 = vld [vmem:[#allocation4] sm:$0xff]  ;;  %vm1160_vm6 = vcmask 523264  }
 0x4bb   : > { %v1078_v34 = vmul.f32 %v1483_v11, %v1077_v28  ;;  %v989_v54 = vsub.f32 1.0, %v988_v2 }
 0x4bc   : > { %952 = vst.msk [vmem:[#allocation4 + $0x38] sm:$0xff] %vm466_vm0, %v950_v30  ;;  %v975_v58 = vmul.f32 %v1485_v62, %v974_v50 }
 0x4bd   : > { %v1079_v39 = vadd.f32 %v1483_v11, %v1078_v34  ;;  %v990_v3 = vmul.f32 %v1487_v63, %v989_v54 }
 0x4be   : > { %v976_v21 = vadd.f32 %v1485_v62, %v975_v58 }
 0x4bf   : > { %v1083_v14 = vsel %vm1082_vm8, %v1483_v11, %v1079_v39  ;;  %v991_v26 = vadd.f32 %v1487_v63, %v990_v3 }
 0x4c0   : > { %v1088_v45 = vsel %vm1085_vm10, %v1087_v41, %v1083_v14  ;;  %v980_v9 = vsel %vm979_vm1, %v1485_v62, %v976_v21 }
 0x4c1   : > { %v1089_v48 = vmul.f32 %v1088_v45, %v1047_v43  ;;  %v995_v11 = vsel %vm994_vm3, %v1487_v63, %v991_v26  ;;  %v985_v18 = vsel %vm982_vm4, %v984_v12, %v980_v9 }
 0x4c2   : > { %v1000_v19 = vsel %vm997_vm5, %v999_v0, %v995_v11  ;;  %v986_v60 = vmul.f32 %v985_v18, %v958_v24 }
 0x4c3   : > { %v1430_v51 = vpack.i.bf16 %v1089_v48, %v1074_v47  ;;  %v1091_v52 = vld [vmem:[#allocation4 + $0x38] sm:$0xff]  ;;  %v1001_v29 = vmul.f32 %v1000_v19, %v959_v32 }
 0x4c4   : > { %v1133_v56 = vmul.f32 %v1132_v53, %v1091_v52 }
 0x4c5   : > { %1431 = vrot.lane.b32.xlu2 %v1430_v51, %s1545_s8 }
 0x4c6   : > { %v1435_v57 = vpack.i.bf16 %v1133_v56, %v1118_v55 }
 0x4c8   : > { %1436 = vrot.lane.b32.xlu1 %v1435_v57, %s1543_s19 }
 0x4ea   : > { %v1427_v15 = vpop.permute.xlu0 %1426 }
 0x4eb   : > { %v1429_v22 = vunpack.i.h.bf16 %v1427_v15  ;;  %v1428_v23 = vunpack.i.l.bf16 %v1427_v15 }
 0x4ed   : > { %v1159_v34 = vsel %vm466_vm0, %v1001_v29, %v1429_v22  ;;  %v1158_v33 = vsel %vm466_vm0, %v986_v60, %v1428_v23 }
 0x51f   : > { %v1432_v16 = vpop.permute.xlu2 %1431 }
 0x520   : > { %v1434_v28 = vunpack.i.h.bf16 %v1432_v16  ;;  %v1433_v5 = vunpack.i.l.bf16 %v1432_v16 }
 0x522   : > { %v1161_v25 = vsel %vm1160_vm6, %v1158_v33, %v1433_v5  ;;  %v1162_v27 = vsel %vm1160_vm6, %v1159_v34, %v1434_v28 }
 0x53a   : > { %v1437_v30 = vpop.permute.xlu1 %1436 }
 0x53b   : > { %v1439_v35 = vunpack.i.h.bf16 %v1437_v30  ;;  %v1438_v20 = vunpack.i.l.bf16 %v1437_v30 }
 0x53d   : > { %v1164_v37 = vsel %vm1163_vm7, %v1161_v25, %v1438_v20  ;;  %v1165_v38 = vsel %vm1163_vm7, %v1162_v27, %v1439_v35 }
 0x53e   : > { %v1372_v39 = vpack.c.bf16 %v1165_v38, %v1164_v37 }
 0x540   : > { %1373 = vst [vmem:[%s442_s14] sm:$0xff] %v1372_v39  }
 0x541 PF: > { %s22_s23 = sadd.s32 1, %s1540_s23   ;;  %s1929_s19 = smov %s1528_s20 }
 0x542   : > { %p19_p10 = scmp.ge.s32.totalorder %s22_s23, 4   ;;  %s1930_s20 = smov %s1616_s27 }
 0x543   : > { %s1931_s21 = smov %s1536_s22  ;;  %s1932_s22 = smov %s1934_s0 }
 0x544   :  { %21 = sbr.rel (!%p19_p10) target bundleno = 9 (0x9), region = 223 }

// kernel: speech_encoder_forward.16
= control target key start
LH: loop header
LB: loop body
LE: loop exit
PB: predicated region body
PF: predicated region fallthrough
CT: control target
= control target key end

     0   :  { %v762_v6 = vmov 128.0   ;;  %s1021_s0 = inlined_call_operand.vmem [shape: bf16[32,128], index: 0, kind: input, shape index: {}]   ;;  %s1022_s1 = inlined_call_operand.vmem [shape: f32[1,128], index: 1, kind: input, shape index: {}]   ;;  %s1023_s2 = inlined_call_operand.vmem [shape: f32[1,128], index: 2, kind: input, shape index: {}]   ;;  %s1024_s3 = inlined_call_operand.vmem [shape: bf16[128,256], index: 3, kind: input, shape index: {}]   ;;  %s1025_s5 = inlined_call_operand.vmem [shape: bf16[256,128], index: 5, kind: input, shape index: {}]   ;;  %s1026_s4 = inlined_call_operand.vmem [shape: f32[1,256], index: 4, kind: input, shape index: {}]   ;;  %s1027_s6 = inlined_call_operand.vmem [shape: f32[1,128], index: 6, kind: input, shape index: {}]   ;;  %s1028_s7 = inlined_call_operand.vmem [shape: bf16[32,128], index: 7, kind: output, shape index: {}]  }
   0x1   :  { %v744_v0 = vld [vmem:[%s1021_s0 + $0x8] sm:$0xff]   ;;  %v709_v1 = vld [vmem:[%s1021_s0] sm:$0xff]   ;;  %752 = vrcp.f32 %v762_v6  ;;  %v604_v29 = vld [vmem:[%s1024_s3 + $0x70] sm:$0xf] }
   0x2   :  { %v809_v2 = vunpack.c.l.bf16 %v744_v0  ;;  %v811_v3 = vunpack.c.l.bf16 %v709_v1  ;;  %v815_v4 = vunpack.c.h.bf16 %v744_v0  ;;  %v817_v5 = vunpack.c.h.bf16 %v709_v1  ;;  %v691_v30 = vld [vmem:[%s1024_s3 + $0x74] sm:$0xf0]  ;;  %v690_v31 = vld [vmem:[%s1024_s3 + $0x74] sm:$0xf]  ;;  %v606_v33 = vld [vmem:[%s1024_s3 + $0x78] sm:$0xf0] }
   0x3   :  { %v605_v32 = vor.u32 %v691_v30, %v604_v29  ;;  %v609_v34 = vor.u32 %v690_v31, %v606_v33  ;;  %v596_v35 = vld [vmem:[%s1024_s3 + $0x60] sm:$0xf]  ;;  %v689_v36 = vld [vmem:[%s1024_s3 + $0x64] sm:$0xf0]  ;;  %v688_v37 = vld [vmem:[%s1024_s3 + $0x64] sm:$0xf] }
   0x4   :  { %46 = vadd.xlane.f32.xlu1 %v809_v2  ;;  %42 = vadd.xlane.f32.xlu0 %v811_v3  ;;  %v597_v38 = vor.u32 %v689_v36, %v596_v35  ;;  %v598_v39 = vld [vmem:[%s1024_s3 + $0x68] sm:$0xf0]  ;;  %v588_v41 = vld [vmem:[%s1024_s3 + $0x50] sm:$0xf]  ;;  %v687_v42 = vld [vmem:[%s1024_s3 + $0x54] sm:$0xf0] }
   0x5   :  { %271 = vmatpush.bf16.msra.mxu0 %v605_v32  ;;  %290 = vmatpush.bf16.msra.mxu1 %v609_v34  ;;  %v601_v40 = vor.u32 %v688_v37, %v598_v39  ;;  %v686_v43 = vld [vmem:[%s1024_s3 + $0x54] sm:$0xf]  ;;  %v589_v44 = vor.u32 %v687_v42, %v588_v41  ;;  %v590_v45 = vld [vmem:[%s1024_s3 + $0x58] sm:$0xf0]  ;;  %v580_v47 = vld [vmem:[%s1024_s3 + $0x40] sm:$0xf] }
   0x6   :  { %v593_v46 = vor.u32 %v686_v43, %v590_v45  ;;  %v685_v48 = vld [vmem:[%s1024_s3 + $0x44] sm:$0xf0]  ;;  %v684_v49 = vld [vmem:[%s1024_s3 + $0x44] sm:$0xf]  ;;  %v582_v51 = vld [vmem:[%s1024_s3 + $0x48] sm:$0xf0] }
   0x7   :  { %v753_v7 = vpop.eup %752  ;;  %v581_v50 = vor.u32 %v685_v48, %v580_v47  ;;  %v585_v52 = vor.u32 %v684_v49, %v582_v51  ;;  %v572_v53 = vld [vmem:[%s1024_s3 + $0x30] sm:$0xf]  ;;  %v683_v54 = vld [vmem:[%s1024_s3 + $0x34] sm:$0xf0]  ;;  %v682_v55 = vld [vmem:[%s1024_s3 + $0x34] sm:$0xf] }
   0x8   :  { %v51_v8 = vmul.f32 128.0, %v753_v7  ;;  %vm55_vm0 = vweird.f32 %v753_v7  ;;  %v573_v58 = vor.u32 %v683_v54, %v572_v53  ;;  %v574_v59 = vld [vmem:[%s1024_s3 + $0x38] sm:$0xf0]  ;;  %v564_v1 = vld [vmem:[%s1024_s3 + $0x20] sm:$0xf] }
   0x9   :  { %272 = vmatpush.bf16.msra.mxu0 %v597_v38  ;;  %291 = vmatpush.bf16.msra.mxu1 %v601_v40  ;;  %v577_v62 = vor.u32 %v682_v55, %v574_v59  ;;  %v681_v6 = vld [vmem:[%s1024_s3 + $0x24] sm:$0xf0]  ;;  %v550_v29 = vld [vmem:[%s1024_s3 + $0x8] sm:$0xf0] }
   0xa   :  { %v52_v9 = vsub.f32 1.0, %v51_v8  ;;  %v566_v8 = vld [vmem:[%s1024_s3 + $0x28] sm:$0xf0] }
   0xc   :  { %48 = vadd.xlane.f32.xlu1 %v815_v4  ;;  %44 = vadd.xlane.f32.xlu0 %v817_v5  ;;  %v53_v10 = vmul.f32 %v753_v7, %v52_v9  ;;  %v565_v9 = vor.u32 %v681_v6, %v564_v1 }
   0xd   :  { %273 = vmatpush.bf16.msra.mxu0 %v589_v44  ;;  %292 = vmatpush.bf16.msra.mxu1 %v593_v46 }
   0xe   :  { %v54_v11 = vadd.f32 %v753_v7, %v53_v10 }
  0x10   :  { %v821_v12 = vsel %vm55_vm0, %v753_v7, %v54_v11  ;;  %v680_v7 = vld [vmem:[%s1024_s3 + $0x24] sm:$0xf]  ;;  %v556_v11 = vld [vmem:[%s1024_s3 + $0x10] sm:$0xf] }
  0x11   :  { %274 = vmatpush.bf16.msra.mxu0 %v581_v50  ;;  %293 = vmatpush.bf16.msra.mxu1 %v585_v52  ;;  %v569_v10 = vor.u32 %v680_v7, %v566_v8 }
  0x15   :  { %275 = vmatpush.bf16.msra.mxu0 %v573_v58  ;;  %294 = vmatpush.bf16.msra.mxu1 %v577_v62 }
  0x19   :  { %276 = vmatpush.bf16.msra.mxu0 %v565_v9  ;;  %295 = vmatpush.bf16.msra.mxu1 %v569_v10  ;;  %v707_v9 = vld [vmem:[%s1025_s5 + $0x78] sm:$0xff] }
  0x1a   :  { %472 = vmatpush.bf16.msra.mxu3 %v707_v9 }
  0x77   :  { %v47_v13 = vpop.xlane.xlu1 %46  ;;  %v43_v14 = vpop.xlane.xlu0 %42 }
  0x78   :  { %v59_v15 = vmul.f32 %v821_v12, %v47_v13  ;;  %v57_v16 = vmul.f32 %v821_v12, %v43_v14  ;;  %v679_v13 = vld [vmem:[%s1024_s3 + $0x14] sm:$0xf0]  ;;  %v678_v14 = vld [vmem:[%s1024_s3 + $0x14] sm:$0xf] }
  0x7a   :  { %v826_v17 = vsub.f32 %v809_v2, %v59_v15  ;;  %v829_v18 = vsub.f32 %v811_v3, %v57_v16 }
  0x7c   :  { %v67_v19 = vmul.f32 %v826_v17, %v826_v17  ;;  %v65_v20 = vmul.f32 %v829_v18, %v829_v18 }
  0x7e   :  { %73 = vadd.xlane.f32.xlu0 %v67_v19  ;;  %69 = vadd.xlane.f32.xlu2 %v65_v20  ;;  %v557_v19 = vor.u32 %v679_v13, %v556_v11  ;;  %v558_v20 = vld [vmem:[%s1024_s3 + $0x18] sm:$0xf0] }
  0x7f   :  { %v49_v21 = vpop.xlane.xlu1 %48  ;;  %v45_v22 = vpop.xlane.xlu0 %44 }
  0x80   :  { %v60_v23 = vmul.f32 %v821_v12, %v49_v21  ;;  %v58_v24 = vmul.f32 %v821_v12, %v45_v22  ;;  %v548_v21 = vld [vmem:[%s1024_s3] sm:$0xf]  ;;  %v677_v22 = vld [vmem:[%s1024_s3 + $0x4] sm:$0xf0]  ;;  %277 = vmatpush.bf16.msra.mxu0 %v557_v19 }
  0x81   :  { %v549_v33 = vor.u32 %v677_v22, %v548_v21  ;;  %v705_v21 = vld [vmem:[%s1025_s5 + $0x68] sm:$0xff]  ;;  %v696_v22 = vld [vmem:[%s1025_s5 + $0x20] sm:$0xff] }
  0x82   :  { %v838_v25 = vsub.f32 %v815_v4, %v60_v23  ;;  %v841_v26 = vsub.f32 %v817_v5, %v58_v24 }
  0x84   :  { %v68_v27 = vmul.f32 %v838_v25, %v838_v25  ;;  %v66_v28 = vmul.f32 %v841_v26, %v841_v26  ;;  %278 = vmatpush.bf16.msra.mxu0 %v549_v33  ;;  %v701_v33 = vld [vmem:[%s1025_s5 + $0x48] sm:$0xff] }
  0x86   :  { %75 = vadd.xlane.f32.xlu1 %v68_v27  ;;  %71 = vadd.xlane.f32.xlu2 %v66_v28  ;;  %v561_v27 = vor.u32 %v678_v14, %v558_v20  ;;  %v676_v28 = vld [vmem:[%s1024_s3 + $0x4] sm:$0xf]  ;;  %v697_v20 = vld [vmem:[%s1025_s5 + $0x28] sm:$0xff] }
  0x87   :  { %v553_v36 = vor.u32 %v676_v28, %v550_v29  ;;  %v695_v28 = vld [vmem:[%s1025_s5 + $0x18] sm:$0xff] }
  0x88   :  { %296 = vmatpush.bf16.msra.mxu1 %v561_v27  ;;  %v703_v29 = vld [vmem:[%s1025_s5 + $0x58] sm:$0xff] }
  0x8c   :  { %297 = vmatpush.bf16.msra.mxu1 %v553_v36  ;;  %v173_v36 = vld [vmem:[%s1026_s4] sm:$0x3] }
  0xf1   :  { %v70_v56 = vpop.xlane.xlu2 %69  ;;  %v74_v57 = vpop.xlane.xlu0 %73 }
  0xf2   :  { %v77_v60 = vmul.f32 %v70_v56, %v821_v12  ;;  %v79_v61 = vmul.f32 %v74_v57, %v821_v12  ;;  %v749_v56 = vld [vmem:[%s1022_s1] ss:$0 sm:$0xff] }
  0xf4   :  { %v81_v63 = vadd.f32 1e-05, %v77_v60  ;;  %v83_v0 = vadd.f32 1e-05, %v79_v61 }
  0xf6   :  { %754 = vrsqrt.f32 %v81_v63  ;;  %vm111_vm1 = vweird.f32 %v83_v0  ;;  %vm91_vm5 = vweird.f32 %v81_v63 }
  0xf7   :  { %756 = vrsqrt.f32 %v83_v0 }
  0xf9   :  { %v76_v15 = vpop.xlane.xlu1 %75  ;;  %v72_v16 = vpop.xlane.xlu2 %71 }
  0xfa   :  { %v80_v23 = vmul.f32 %v76_v15, %v821_v12  ;;  %v78_v24 = vmul.f32 %v72_v16, %v821_v12 }
  0xfc   :  { %v755_v30 = vpop.eup %754  ;;  %v84_v31 = vadd.f32 1e-05, %v80_v23  ;;  %v82_v32 = vadd.f32 1e-05, %v78_v24  ;;  %v704_v23 = vld [vmem:[%s1025_s5 + $0x60] sm:$0xff] }
  0xfd   :  { %v757_v34 = vpop.eup %756  ;;  %v86_v35 = vmul.f32 %v755_v30, %v81_v63  ;;  %vm92_vm3 = vweird.f32 %v755_v30  ;;  %v750_v63 = vld [vmem:[%s1023_s2] ss:$0 sm:$0xff] }
  0xfe   :  { %v106_v37 = vmul.f32 %v757_v34, %v83_v0  ;;  %758 = vrsqrt.f32 %v84_v31  ;;  %vm112_vm2 = vweird.f32 %v757_v34  ;;  %vm93_vm6 = vmor %vm91_vm5, %vm92_vm3  ;;  %vm121_vm7 = vweird.f32 %v84_v31 }
  0xff   :  { %v87_v12 = vmul.f32 %v755_v30, %v86_v35  ;;  %760 = vrsqrt.f32 %v82_v32  ;;  %vm113_vm4 = vmor %vm111_vm1, %vm112_vm2  ;;  %vm101_vm11 = vweird.f32 %v82_v32  ;;  %v700_v35 = vld [vmem:[%s1025_s5 + $0x40] sm:$0xff] }
 0x100   :  { %v107_v38 = vmul.f32 %v757_v34, %v106_v37 }
 0x101   :  { %v88_v39 = vmul.f32 0.5, %v87_v12 }
 0x102   :  { %v108_v40 = vmul.f32 0.5, %v107_v38  ;;  %v175_v38 = vperm.slane %v173_v36, 0 }
 0x103   :  { %v89_v41 = vsub.f32 1.5, %v88_v39  ;;  %v176_v39 = vperm.slane %v173_v36, 1 }
 0x104   :  { %v759_v42 = vpop.eup %758  ;;  %v109_v43 = vsub.f32 1.5, %v108_v40 }
 0x105   :  { %v761_v44 = vpop.eup %760  ;;  %v116_v45 = vmul.f32 %v759_v42, %v84_v31  ;;  %v90_v46 = vmul.f32 %v755_v30, %v89_v41  ;;  %vm122_vm8 = vweird.f32 %v759_v42  ;;  %v702_v31 = vld [vmem:[%s1025_s5 + $0x50] sm:$0xff] }
 0x106   :  { %v110_v47 = vmul.f32 %v757_v34, %v109_v43  ;;  %v96_v48 = vmul.f32 %v761_v44, %v82_v32  ;;  %vm123_vm9 = vmor %vm121_vm7, %vm122_vm8  ;;  %vm102_vm10 = vweird.f32 %v761_v44  ;;  %v693_v32 = vld [vmem:[%s1025_s5 + $0x8] sm:$0xff] }
 0x107   :  { %v117_v49 = vmul.f32 %v759_v42, %v116_v45  ;;  %v94_v53 = vsel %vm93_vm6, %v755_v30, %v90_v46  ;;  %vm103_vm12 = vmor %vm101_vm11, %vm102_vm10  ;;  %v694_v30 = vld [vmem:[%s1025_s5 + $0x10] sm:$0xff] }
 0x108   :  { %v97_v50 = vmul.f32 %v761_v44, %v96_v48  ;;  %v114_v51 = vsel %vm113_vm4, %v757_v34, %v110_v47  ;;  %v125_v59 = vmul.f32 %v94_v53, %v829_v18  ;;  %v699_v18 = vld [vmem:[%s1025_s5 + $0x38] sm:$0xff]  ;;  %v692_v34 = vld [vmem:[%s1025_s5] sm:$0xff] }
 0x109   :  { %v118_v52 = vmul.f32 0.5, %v117_v49  ;;  %v127_v57 = vmul.f32 %v114_v51, %v826_v17  ;;  %453 = vmatpush.bf16.msra.mxu2 %v699_v18 }
 0x10a   :  { %v98_v54 = vmul.f32 0.5, %v97_v50  ;;  %v133_v7 = vmul.f32 %v749_v56, %v125_v59 }
 0x10b   :  { %v119_v55 = vsub.f32 1.5, %v118_v52  ;;  %v135_v0 = vmul.f32 %v749_v56, %v127_v57 }
 0x10c   :  { %v99_v58 = vsub.f32 1.5, %v98_v54  ;;  %v141_v14 = vadd.f32 %v750_v63, %v133_v7 }
 0x10d   :  { %v120_v60 = vmul.f32 %v759_v42, %v119_v55  ;;  %v143_v11 = vadd.f32 %v750_v63, %v135_v0 }
 0x10e   :  { %v100_v61 = vmul.f32 %v761_v44, %v99_v58 }
 0x10f   :  { %v124_v62 = vsel %vm123_vm9, %v759_v42, %v120_v60 }
 0x110   :  { %v128_v1 = vmul.f32 %v124_v62, %v838_v25  ;;  %v104_v6 = vsel %vm103_vm12, %v761_v44, %v100_v61  ;;  %v698_v25 = vld [vmem:[%s1025_s5 + $0x30] sm:$0xff] }
 0x111   :  { %v126_v17 = vmul.f32 %v104_v6, %v841_v26  ;;  %v706_v26 = vld [vmem:[%s1025_s5 + $0x70] sm:$0xff]  ;;  %454 = vmatpush.bf16.msra.mxu2 %v698_v25 }
 0x112   :  { %v136_v8 = vmul.f32 %v749_v56, %v128_v1  ;;  %473 = vmatpush.bf16.msra.mxu3 %v706_v26 }
 0x113   :  { %v134_v10 = vmul.f32 %v749_v56, %v126_v17 }
 0x114   :  { %v144_v13 = vadd.f32 %v750_v63, %v136_v8  ;;  %v751_v8 = vld [vmem:[%s1027_s6] ss:$0 sm:$0xff] }
 0x115   :  { %v142_v15 = vadd.f32 %v750_v63, %v134_v10  ;;  %455 = vmatpush.bf16.msra.mxu2 %v697_v20 }
 0x116   :  { %v724_v16 = vpack.c.bf16 %v144_v13, %v143_v11  ;;  %474 = vmatpush.bf16.msra.mxu3 %v705_v21 }
 0x117   :  { %v719_v19 = vpack.c.bf16 %v142_v15, %v141_v14 }
 0x118   :  { %745 = vst [vmem:[#allocation3 + $0x8] sm:$0xff] %v724_v16  }
 0x119   :  { %720 = vst [vmem:[#allocation3] sm:$0xff] %v719_v19   ;;  %456 = vmatpush.bf16.msra.mxu2 %v696_v22 }
 0x11a   :  { %475 = vmatpush.bf16.msra.mxu3 %v704_v23 }
 0x11d   :  { %457 = vmatpush.bf16.msra.mxu2 %v695_v28 }
 0x11e   :  { %476 = vmatpush.bf16.msra.mxu3 %v703_v29 }
 0x11f   :  { %v675_v27 = vld [vmem:[#allocation3 + $0x8] sm:$0xff] }
 0x120   :  { %v674_v24 = vld [vmem:[#allocation3] sm:$0xff] }
 0x121   :  { %279 = vmatmul.bf16.vlgmr.msra.gmra.mxu0 %v674_v24  ;;  %298 = vmatmul.bf16.vlgmr.msra.gmra.mxu1 %v674_v24 }
 0x122   :  { %458 = vmatpush.bf16.msra.mxu2 %v694_v30  ;;  %477 = vmatpush.bf16.msra.mxu3 %v702_v31 }
 0x126   :  { %459 = vmatpush.bf16.msra.mxu2 %v693_v32  ;;  %478 = vmatpush.bf16.msra.mxu3 %v701_v33 }
 0x12a   :  { %460 = vmatpush.bf16.msra.mxu2 %v692_v34  ;;  %479 = vmatpush.bf16.msra.mxu3 %v700_v35 }
 0x131   :  { %284 = vmatmul.bf16.gmra.mxu0 %v675_v27  ;;  %303 = vmatmul.bf16.gmra.mxu1 %v675_v27 }
 0x19e   :  { %v280_v37 = vpop.f32.mrf.mxu0  ;;  %v299_v12 = vpop.f32.mrf.mxu1 }
 0x19f   :  { %v281_v40 = vadd.f32 %v280_v37, %v175_v38  ;;  %v300_v41 = vadd.f32 %v299_v12, %v176_v39 }
 0x1a1   :  { %v309_v46 = vmax.f32 %v281_v40, 0.0  ;;  %v310_v47 = vmax.f32 %v300_v41, 0.0 }
 0x1a6   :  { %v282_v42 = vpop.f32.mrf.mxu0  ;;  %v301_v43 = vpop.f32.mrf.mxu1 }
 0x1a7   :  { %v283_v44 = vadd.f32 %v282_v42, %v175_v38  ;;  %v302_v45 = vadd.f32 %v301_v43, %v176_v39 }
 0x1a9   :  { %v311_v48 = vmax.f32 %v283_v44, 0.0  ;;  %v312_v49 = vmax.f32 %v302_v45, 0.0 }
 0x1ab   :  { %v321_v50 = vpack.c.bf16 %v311_v48, %v309_v46  ;;  %v322_v51 = vpack.c.bf16 %v312_v49, %v310_v47 }
 0x1ad   :  { %461 = vmatmul.bf16.vlgmr.msra.gmra.mxu2 %v321_v50  ;;  %480 = vmatmul.bf16.vlgmr.msra.gmra.mxu3 %v322_v51 }
 0x1ae   :  { %v285_v52 = vpop.f32.mrf.mxu0  ;;  %v304_v53 = vpop.f32.mrf.mxu1 }
 0x1af   :  { %v286_v54 = vadd.f32 %v285_v52, %v175_v38  ;;  %v305_v55 = vadd.f32 %v304_v53, %v176_v39 }
 0x1b1   :  { %v313_v60 = vmax.f32 %v286_v54, 0.0  ;;  %v314_v61 = vmax.f32 %v305_v55, 0.0 }
 0x1b6   :  { %v287_v56 = vpop.f32.mrf.mxu0  ;;  %v306_v57 = vpop.f32.mrf.mxu1 }
 0x1b7   :  { %v288_v58 = vadd.f32 %v287_v56, %v175_v38  ;;  %v307_v59 = vadd.f32 %v306_v57, %v176_v39 }
 0x1b9   :  { %v315_v62 = vmax.f32 %v288_v58, 0.0  ;;  %v316_v63 = vmax.f32 %v307_v59, 0.0 }
 0x1bb   :  { %v323_v0 = vpack.c.bf16 %v315_v62, %v313_v60  ;;  %v324_v1 = vpack.c.bf16 %v316_v63, %v314_v61 }
 0x1bd   :  { %466 = vmatmul.bf16.gmra.mxu2 %v323_v0  ;;  %485 = vmatmul.bf16.gmra.mxu3 %v324_v1 }
 0x230   :  { %v462_v6 = vpop.f32.mrf.mxu2  ;;  %v481_v7 = vpop.f32.mrf.mxu3 }
 0x231   :  { %v482_v17 = vadd.f32 %v481_v7, %v462_v6 }
 0x233   :  { %v510_v10 = vadd.f32 %v751_v8, %v482_v17 }
 0x235   :  { %v522_v25 = vadd.f32 %v811_v3, %v510_v10 }
 0x238   :  { %v464_v18 = vpop.f32.mrf.mxu2  ;;  %v483_v9 = vpop.f32.mrf.mxu3 }
 0x239   :  { %v484_v11 = vadd.f32 %v483_v9, %v464_v18 }
 0x23b   :  { %v511_v13 = vadd.f32 %v751_v8, %v484_v11 }
 0x23d   :  { %v523_v26 = vadd.f32 %v817_v5, %v511_v13 }
 0x23f   :  { %v737_v14 = vpack.c.bf16 %v523_v26, %v522_v25 }
 0x240   :  { %v467_v15 = vpop.f32.mrf.mxu2  ;;  %v486_v16 = vpop.f32.mrf.mxu3 }
 0x241   :  { %738 = vst [vmem:[%s1028_s7] sm:$0xff] %v737_v14   ;;  %v487_v19 = vadd.f32 %v486_v16, %v467_v15 }
 0x243   :  { %v512_v22 = vadd.f32 %v751_v8, %v487_v19 }
 0x245   :  { %v524_v27 = vadd.f32 %v809_v2, %v512_v22 }
 0x248   :  { %v469_v20 = vpop.f32.mrf.mxu2  ;;  %v488_v21 = vpop.f32.mrf.mxu3 }
 0x249   :  { %v489_v23 = vadd.f32 %v488_v21, %v469_v20 }
 0x24b   :  { %v513_v24 = vadd.f32 %v751_v8, %v489_v23 }
 0x24d   :  { %v525_v28 = vadd.f32 %v815_v4, %v513_v24 }
 0x24f   :  { %v742_v3 = vpack.c.bf16 %v525_v28, %v524_v27 }
 0x251   :  { %747 = vst [vmem:[%s1028_s7 + $0x8] sm:$0xff] %v742_v3  }

// kernel: speech_encoder_forward.21
= control target key start
LH: loop header
LB: loop body
LE: loop exit
PB: predicated region body
PF: predicated region fallthrough
CT: control target
= control target key end

     0   :  { %s248_s0 = inlined_call_operand.vmem [shape: bf16[32,128], index: 0, kind: input, shape index: {}]   ;;  %s249_s1 = inlined_call_operand.vmem [shape: f32[1,128], index: 1, kind: input, shape index: {}]   ;;  %s250_s2 = inlined_call_operand.vmem [shape: f32[1,128], index: 2, kind: input, shape index: {}]   ;;  %s251_s3 = inlined_call_operand.hbm [shape: f32[32,128], index: 3, kind: output, shape index: {}]  }
   0x1   :  { %v156_v0 = vld [vmem:[%s248_s0 + $0x8] sm:$0xff]   ;;  %v149_v1 = vld [vmem:[%s248_s0] sm:$0xff]  }
   0x2   :  { %v154_v2 = vunpack.c.l.bf16 %v156_v0  ;;  %v150_v3 = vunpack.c.l.bf16 %v149_v1 }
   0x3   :  { %8 = vsyncpa [#allocation3], 0  ;;  %v155_v4 = vunpack.c.h.bf16 %v156_v0  ;;  %v151_v5 = vunpack.c.h.bf16 %v149_v1  ;;  %v199_v6 = vmov 128.0   ;;  %v161_v55 = vld [vmem:[%s249_s1] ss:$0 sm:$0xff]  ;;  %s200_s1 = smov [#allocation2]  }
   0x4   :  { %27 = vadd.xlane.f32.xlu1 %v154_v2  ;;  %23 = vadd.xlane.f32.xlu0 %v150_v3  ;;  %163 = vrcp.f32 %v199_v6  ;;  %v162_v60 = vld [vmem:[%s250_s2] ss:$0 sm:$0xff]  ;;  %s134_s2 = sshll.u32 %s200_s1, 4  ;;  %s136_s21 = sshll.u32 %s251_s3, 4  ;;  %s135_s2 = int_to_ptr.vmem [resolvable:$true] %s134_s2  ;;  %s137_s21 = int_to_ptr.hbm [resolvable:$true] %s136_s21 }
   0x5   :  { %s201_s22 = smov 128   ;;  %s202_s23 = smov 8  }
   0xa   :  { %v164_v7 = vpop.eup %163 }
   0xb   :  { %v32_v8 = vmul.f32 128.0, %v164_v7  ;;  %vm36_vm0 = vweird.f32 %v164_v7 }
   0xc   :  { %29 = vadd.xlane.f32.xlu1 %v155_v4  ;;  %25 = vadd.xlane.f32.xlu0 %v151_v5 }
   0xd   :  { %v33_v9 = vsub.f32 1.0, %v32_v8 }
   0xf   :  { %v34_v10 = vmul.f32 %v164_v7, %v33_v9 }
  0x11   :  { %v35_v11 = vadd.f32 %v164_v7, %v34_v10 }
  0x13   :  { %v37_v12 = vsel %vm36_vm0, %v164_v7, %v35_v11 }
  0x77   :  { %v28_v13 = vpop.xlane.xlu1 %27  ;;  %v24_v14 = vpop.xlane.xlu0 %23 }
  0x78   :  { %v40_v15 = vmul.f32 %v37_v12, %v28_v13  ;;  %v38_v16 = vmul.f32 %v37_v12, %v24_v14 }
  0x7a   :  { %v44_v17 = vsub.f32 %v154_v2, %v40_v15  ;;  %v42_v18 = vsub.f32 %v150_v3, %v38_v16 }
  0x7c   :  { %v48_v19 = vmul.f32 %v44_v17, %v44_v17  ;;  %v46_v20 = vmul.f32 %v42_v18, %v42_v18 }
  0x7e   :  { %54 = vadd.xlane.f32.xlu0 %v48_v19  ;;  %50 = vadd.xlane.f32.xlu2 %v46_v20 }
  0x7f   :  { %v30_v21 = vpop.xlane.xlu1 %29  ;;  %v26_v22 = vpop.xlane.xlu0 %25 }
  0x80   :  { %v41_v23 = vmul.f32 %v37_v12, %v30_v21  ;;  %v39_v24 = vmul.f32 %v37_v12, %v26_v22 }
  0x82   :  { %v229_v25 = vsub.f32 %v155_v4, %v41_v23  ;;  %v231_v26 = vsub.f32 %v151_v5, %v39_v24 }
  0x84   :  { %v49_v27 = vmul.f32 %v229_v25, %v229_v25  ;;  %v47_v28 = vmul.f32 %v231_v26, %v231_v26 }
  0x86   :  { %56 = vadd.xlane.f32.xlu1 %v49_v27  ;;  %52 = vadd.xlane.f32.xlu2 %v47_v28 }
  0xf1   :  { %v51_v29 = vpop.xlane.xlu2 %50  ;;  %v55_v30 = vpop.xlane.xlu0 %54 }
  0xf2   :  { %v58_v31 = vmul.f32 %v51_v29, %v37_v12  ;;  %v60_v32 = vmul.f32 %v55_v30, %v37_v12 }
  0xf4   :  { %v62_v33 = vadd.f32 1e-05, %v58_v31  ;;  %v64_v34 = vadd.f32 1e-05, %v60_v32 }
  0xf6   :  { %165 = vrsqrt.f32 %v62_v33  ;;  %vm72_vm3 = vweird.f32 %v62_v33  ;;  %vm92_vm5 = vweird.f32 %v64_v34 }
  0xf7   :  { %167 = vrsqrt.f32 %v64_v34 }
  0xf9   :  { %v57_v35 = vpop.xlane.xlu1 %56  ;;  %v53_v36 = vpop.xlane.xlu2 %52 }
  0xfa   :  { %v61_v37 = vmul.f32 %v57_v35, %v37_v12  ;;  %v59_v38 = vmul.f32 %v53_v36, %v37_v12 }
  0xfc   :  { %v166_v39 = vpop.eup %165  ;;  %v65_v40 = vadd.f32 1e-05, %v61_v37  ;;  %v63_v41 = vadd.f32 1e-05, %v59_v38 }
  0xfd   :  { %v168_v42 = vpop.eup %167  ;;  %v67_v43 = vmul.f32 %v166_v39, %v62_v33  ;;  %vm73_vm1 = vweird.f32 %v166_v39 }
  0xfe   :  { %v87_v44 = vmul.f32 %v168_v42, %v64_v34  ;;  %169 = vrsqrt.f32 %v65_v40  ;;  %vm93_vm2 = vweird.f32 %v168_v42  ;;  %vm74_vm4 = vmor %vm72_vm3, %vm73_vm1  ;;  %vm102_vm9 = vweird.f32 %v65_v40 }
  0xff   :  { %v68_v45 = vmul.f32 %v166_v39, %v67_v43  ;;  %171 = vrsqrt.f32 %v63_v41  ;;  %vm94_vm6 = vmor %vm92_vm5, %vm93_vm2  ;;  %vm82_vm11 = vweird.f32 %v63_v41 }
 0x100   :  { %v88_v46 = vmul.f32 %v168_v42, %v87_v44 }
 0x101   :  { %v69_v47 = vmul.f32 0.5, %v68_v45 }
 0x102   :  { %v89_v48 = vmul.f32 0.5, %v88_v46 }
 0x103   :  { %v70_v49 = vsub.f32 1.5, %v69_v47 }
 0x104   :  { %v170_v50 = vpop.eup %169  ;;  %v90_v51 = vsub.f32 1.5, %v89_v48 }
 0x105   :  { %v172_v52 = vpop.eup %171  ;;  %v71_v53 = vmul.f32 %v166_v39, %v70_v49  ;;  %v97_v54 = vmul.f32 %v170_v50, %v65_v40  ;;  %vm103_vm7 = vweird.f32 %v170_v50 }
 0x106   :  { %v91_v56 = vmul.f32 %v168_v42, %v90_v51  ;;  %v77_v57 = vmul.f32 %v172_v52, %v63_v41  ;;  %vm83_vm8 = vweird.f32 %v172_v52  ;;  %vm104_vm10 = vmor %vm102_vm9, %vm103_vm7 }
 0x107   :  { %v75_v58 = vsel %vm74_vm4, %v166_v39, %v71_v53  ;;  %v98_v59 = vmul.f32 %v170_v50, %v97_v54  ;;  %vm84_vm12 = vmor %vm82_vm11, %vm83_vm8 }
 0x108   :  { %v106_v61 = vmul.f32 %v75_v58, %v42_v18  ;;  %v95_v62 = vsel %vm94_vm6, %v168_v42, %v91_v56  ;;  %v78_v63 = vmul.f32 %v172_v52, %v77_v57 }
 0x109   :  { %v108_v0 = vmul.f32 %v95_v62, %v44_v17  ;;  %v99_v1 = vmul.f32 0.5, %v98_v59 }
 0x10a   :  { %v114_v2 = vmul.f32 %v161_v55, %v106_v61  ;;  %v79_v3 = vmul.f32 0.5, %v78_v63 }
 0x10b   :  { %v116_v4 = vmul.f32 %v161_v55, %v108_v0  ;;  %v100_v5 = vsub.f32 1.5, %v99_v1 }
 0x10c   :  { %v122_v6 = vadd.f32 %v162_v60, %v114_v2  ;;  %v80_v7 = vsub.f32 1.5, %v79_v3 }
 0x10d   :  { %v124_v8 = vadd.f32 %v162_v60, %v116_v4  ;;  %v101_v9 = vmul.f32 %v170_v50, %v100_v5 }
 0x10e   :  { %126 = vst [vmem:[#allocation2] sm:$0xff] %v122_v6  ;;  %v81_v10 = vmul.f32 %v172_v52, %v80_v7 }
 0x10f   :  { %128 = vst [vmem:[#allocation2 + $0x10] sm:$0xff] %v124_v8  ;;  %v105_v11 = vsel %vm104_vm10, %v170_v50, %v101_v9 }
 0x110   :  { %v109_v12 = vmul.f32 %v105_v11, %v229_v25  ;;  %v85_v13 = vsel %vm84_vm12, %v172_v52, %v81_v10 }
 0x111   :  { %v107_v14 = vmul.f32 %v85_v13, %v231_v26 }
 0x112   :  { %v117_v15 = vmul.f32 %v161_v55, %v109_v12 }
 0x113   :  { %v115_v16 = vmul.f32 %v161_v55, %v107_v14 }
 0x114   :  { %v125_v17 = vadd.f32 %v162_v60, %v117_v15 }
 0x115   :  { %v123_v18 = vadd.f32 %v162_v60, %v115_v16 }
 0x116   :  { %129 = vst [vmem:[#allocation2 + $0x18] sm:$0xff] %v125_v17 }
 0x117   :  { %127 = vst [vmem:[#allocation2 + $0x8] sm:$0xff] %v123_v18 }
 0x118   :  { %142 = dma.vmem_to_hbm [thread:$0]  %s135_s2, 512, %s137_s21, [#allocation3], %s201_s22, %s201_s22, %s202_s23  }
 0x119   :  { %197 = dma.done.wait [#allocation3], 512  }
 0x11a   :  { %198 = vsyncadd [#allocation3], 4294966784 }
 0x11b   :  { %147 = vsyncpa [#allocation3], 1 }

// kernel: speech_encoder_forward.20
= control target key start
LH: loop header
LB: loop body
LE: loop exit
PB: predicated region body
PF: predicated region fallthrough
CT: control target
= control target key end

     0   :  { %12 = vsyncpa [#allocation5], 0  ;;  %s981_s0 = inlined_call_operand.vmem [shape: bf16[32,128], index: 0, kind: input, shape index: {}]   ;;  %s982_s1 = inlined_call_operand.vmem [shape: f32[1,128], index: 1, kind: input, shape index: {}]   ;;  %s983_s2 = inlined_call_operand.vmem [shape: f32[1,128], index: 2, kind: input, shape index: {}]   ;;  %s984_s3 = inlined_call_operand.hbm [shape: bf16[128,256], index: 3, kind: input, shape index: {}]   ;;  %s985_s4 = inlined_call_operand.vmem [shape: f32[1,256], index: 4, kind: input, shape index: {}]   ;;  %s986_s5 = inlined_call_operand.hbm [shape: bf16[256,128], index: 5, kind: input, shape index: {}]   ;;  %s987_s6 = inlined_call_operand.vmem [shape: f32[1,128], index: 6, kind: input, shape index: {}]   ;;  %s988_s7 = inlined_call_operand.vmem [shape: bf16[32,128], index: 7, kind: output, shape index: {}]  }
   0x1   :  { %s24_s26 = sshll.u32 %s984_s3, 4  ;;  %s25_s26 = int_to_ptr.hbm [resolvable:$true] %s24_s26 }
   0x2   :  { %13 = vsyncpa [#allocation7], 0  ;;  %s854_s27 = smov [#allocation4]   ;;  %s39_s8 = sshll.u32 %s986_s5, 4  ;;  %s40_s8 = int_to_ptr.hbm [resolvable:$true] %s39_s8 }
   0x3   :  { %s26_s28 = sshll.u32 %s854_s27, 4  ;;  %s855_s9 = smov 128   ;;  %s27_s28 = int_to_ptr.vmem [resolvable:$true] %s26_s28 }
   0x4   :  { %s856_s10 = smov 8   ;;  %s857_s11 = smov [#allocation6]  }
   0x5   :  { %32 = dma.hbm_to_vmem [thread:$0]  %s25_s26, 2048, %s27_s28, [#allocation5], %s855_s9, %s855_s9, %s856_s10  }
   0x6   :  { %s41_s12 = sshll.u32 %s857_s11, 4  ;;  %s858_s13 = smov 64   ;;  %s42_s12 = int_to_ptr.vmem [resolvable:$true] %s41_s12 }
   0x7   :  { %s859_s14 = smov 4  }
   0x8   :  { %47 = dma.hbm_to_vmem [thread:$0]  %s40_s8, 2048, %s42_s12, [#allocation7], %s858_s13, %s858_s13, %s859_s14  }
   0x9   :  { %850 = dma.done.wait [#allocation5], 2048  }
   0xa   :  { %851 = vsyncadd [#allocation5], 4294965248 }
   0xb   :  { %852 = dma.done.wait [#allocation7], 2048  }
   0xc   :  { %853 = vsyncadd [#allocation7], 4294965248  ;;  %v778_v0 = vld [vmem:[%s981_s0 + $0x8] sm:$0xff]   ;;  %v743_v1 = vld [vmem:[%s981_s0] sm:$0xff]   ;;  %v860_v6 = vmov 128.0  }
   0xd   :  { %v913_v2 = vunpack.c.l.bf16 %v778_v0  ;;  %v915_v3 = vunpack.c.l.bf16 %v743_v1  ;;  %v919_v4 = vunpack.c.h.bf16 %v778_v0  ;;  %v921_v5 = vunpack.c.h.bf16 %v743_v1  ;;  %v638_v29 = vld [vmem:[#allocation4 + $0x70] sm:$0xf]  ;;  %v725_v30 = vld [vmem:[#allocation4 + $0x74] sm:$0xf0]  ;;  %v724_v31 = vld [vmem:[#allocation4 + $0x74] sm:$0xf] }
   0xe   :  { %792 = vrcp.f32 %v860_v6  ;;  %v639_v32 = vor.u32 %v725_v30, %v638_v29  ;;  %v640_v33 = vld [vmem:[#allocation4 + $0x78] sm:$0xf0]  ;;  %v630_v35 = vld [vmem:[#allocation4 + $0x60] sm:$0xf]  ;;  %v723_v36 = vld [vmem:[#allocation4 + $0x64] sm:$0xf0] }
   0xf   :  { %78 = vadd.xlane.f32.xlu1 %v913_v2  ;;  %74 = vadd.xlane.f32.xlu0 %v915_v3  ;;  %v643_v34 = vor.u32 %v724_v31, %v640_v33  ;;  %v722_v37 = vld [vmem:[#allocation4 + $0x64] sm:$0xf]  ;;  %v631_v38 = vor.u32 %v723_v36, %v630_v35  ;;  %v632_v39 = vld [vmem:[#allocation4 + $0x68] sm:$0xf0]  ;;  %v622_v41 = vld [vmem:[#allocation4 + $0x50] sm:$0xf] }
  0x10   :  { %303 = vmatpush.bf16.msra.mxu0 %v639_v32  ;;  %v635_v40 = vor.u32 %v722_v37, %v632_v39  ;;  %v721_v42 = vld [vmem:[#allocation4 + $0x54] sm:$0xf0]  ;;  %v720_v43 = vld [vmem:[#allocation4 + $0x54] sm:$0xf]  ;;  %v624_v45 = vld [vmem:[#allocation4 + $0x58] sm:$0xf0] }
  0x11   :  { %322 = vmatpush.bf16.msra.mxu1 %v643_v34  ;;  %v623_v44 = vor.u32 %v721_v42, %v622_v41  ;;  %v627_v46 = vor.u32 %v720_v43, %v624_v45  ;;  %v614_v47 = vld [vmem:[#allocation4 + $0x40] sm:$0xf]  ;;  %v719_v48 = vld [vmem:[#allocation4 + $0x44] sm:$0xf0]  ;;  %v718_v49 = vld [vmem:[#allocation4 + $0x44] sm:$0xf] }
  0x12   :  { %v615_v50 = vor.u32 %v719_v48, %v614_v47  ;;  %v616_v51 = vld [vmem:[#allocation4 + $0x48] sm:$0xf0]  ;;  %v606_v53 = vld [vmem:[#allocation4 + $0x30] sm:$0xf]  ;;  %v717_v54 = vld [vmem:[#allocation4 + $0x34] sm:$0xf0] }
  0x13   :  { %v619_v52 = vor.u32 %v718_v49, %v616_v51  ;;  %v716_v55 = vld [vmem:[#allocation4 + $0x34] sm:$0xf]  ;;  %v607_v58 = vor.u32 %v717_v54, %v606_v53  ;;  %v608_v59 = vld [vmem:[#allocation4 + $0x38] sm:$0xf0]  ;;  %v598_v1 = vld [vmem:[#allocation4 + $0x20] sm:$0xf] }
  0x14   :  { %v793_v7 = vpop.eup %792  ;;  %304 = vmatpush.bf16.msra.mxu0 %v631_v38  ;;  %v611_v62 = vor.u32 %v716_v55, %v608_v59  ;;  %v715_v6 = vld [vmem:[#allocation4 + $0x24] sm:$0xf0]  ;;  %v584_v29 = vld [vmem:[#allocation4 + $0x8] sm:$0xf0] }
  0x15   :  { %v83_v8 = vmul.f32 128.0, %v793_v7  ;;  %vm87_vm0 = vweird.f32 %v793_v7  ;;  %323 = vmatpush.bf16.msra.mxu1 %v635_v40 }
  0x17   :  { %80 = vadd.xlane.f32.xlu1 %v919_v4  ;;  %76 = vadd.xlane.f32.xlu0 %v921_v5  ;;  %v84_v9 = vsub.f32 1.0, %v83_v8  ;;  %v600_v8 = vld [vmem:[#allocation4 + $0x28] sm:$0xf0] }
  0x18   :  { %305 = vmatpush.bf16.msra.mxu0 %v623_v44 }
  0x19   :  { %v85_v10 = vmul.f32 %v793_v7, %v84_v9  ;;  %324 = vmatpush.bf16.msra.mxu1 %v627_v46  ;;  %v599_v9 = vor.u32 %v715_v6, %v598_v1 }
  0x1b   :  { %v86_v11 = vadd.f32 %v793_v7, %v85_v10 }
  0x1c   :  { %306 = vmatpush.bf16.msra.mxu0 %v615_v50 }
  0x1d   :  { %v925_v12 = vsel %vm87_vm0, %v793_v7, %v86_v11  ;;  %325 = vmatpush.bf16.msra.mxu1 %v619_v52  ;;  %v714_v7 = vld [vmem:[#allocation4 + $0x24] sm:$0xf]  ;;  %v590_v11 = vld [vmem:[#allocation4 + $0x10] sm:$0xf] }
  0x1e   :  { %v603_v10 = vor.u32 %v714_v7, %v600_v8 }
  0x20   :  { %307 = vmatpush.bf16.msra.mxu0 %v607_v58 }
  0x21   :  { %326 = vmatpush.bf16.msra.mxu1 %v611_v62 }
  0x24   :  { %308 = vmatpush.bf16.msra.mxu0 %v599_v9  ;;  %v733_v9 = vld [vmem:[#allocation6 + $0x38] sm:$0xff] }
  0x25   :  { %327 = vmatpush.bf16.msra.mxu1 %v603_v10  ;;  %v741_v10 = vld [vmem:[#allocation6 + $0x78] sm:$0xff]  ;;  %485 = vmatpush.bf16.msra.mxu2 %v733_v9 }
  0x26   :  { %504 = vmatpush.bf16.msra.mxu3 %v741_v10 }
  0x82   :  { %v79_v13 = vpop.xlane.xlu1 %78  ;;  %v75_v14 = vpop.xlane.xlu0 %74 }
  0x83   :  { %v91_v15 = vmul.f32 %v925_v12, %v79_v13  ;;  %v89_v16 = vmul.f32 %v925_v12, %v75_v14  ;;  %v713_v13 = vld [vmem:[#allocation4 + $0x14] sm:$0xf0]  ;;  %v712_v14 = vld [vmem:[#allocation4 + $0x14] sm:$0xf] }
  0x85   :  { %v930_v17 = vsub.f32 %v913_v2, %v91_v15  ;;  %v933_v18 = vsub.f32 %v915_v3, %v89_v16 }
  0x87   :  { %v99_v19 = vmul.f32 %v930_v17, %v930_v17  ;;  %v97_v20 = vmul.f32 %v933_v18, %v933_v18 }
  0x89   :  { %105 = vadd.xlane.f32.xlu0 %v99_v19  ;;  %101 = vadd.xlane.f32.xlu2 %v97_v20  ;;  %v591_v19 = vor.u32 %v713_v13, %v590_v11  ;;  %v592_v20 = vld [vmem:[#allocation4 + $0x18] sm:$0xf0] }
  0x8a   :  { %v81_v21 = vpop.xlane.xlu1 %80  ;;  %v77_v22 = vpop.xlane.xlu0 %76 }
  0x8b   :  { %v92_v23 = vmul.f32 %v925_v12, %v81_v21  ;;  %v90_v24 = vmul.f32 %v925_v12, %v77_v22  ;;  %v582_v21 = vld [vmem:[#allocation4] sm:$0xf]  ;;  %v711_v22 = vld [vmem:[#allocation4 + $0x4] sm:$0xf0]  ;;  %309 = vmatpush.bf16.msra.mxu0 %v591_v19 }
  0x8c   :  { %v583_v33 = vor.u32 %v711_v22, %v582_v21  ;;  %v739_v22 = vld [vmem:[#allocation6 + $0x68] sm:$0xff] }
  0x8d   :  { %v942_v25 = vsub.f32 %v919_v4, %v92_v23  ;;  %v945_v26 = vsub.f32 %v921_v5, %v90_v24 }
  0x8f   :  { %v100_v27 = vmul.f32 %v942_v25, %v942_v25  ;;  %v98_v28 = vmul.f32 %v945_v26, %v945_v26  ;;  %310 = vmatpush.bf16.msra.mxu0 %v583_v33  ;;  %v735_v33 = vld [vmem:[#allocation6 + $0x48] sm:$0xff] }
  0x91   :  { %107 = vadd.xlane.f32.xlu1 %v100_v27  ;;  %103 = vadd.xlane.f32.xlu2 %v98_v28  ;;  %v595_v27 = vor.u32 %v712_v14, %v592_v20  ;;  %v710_v28 = vld [vmem:[#allocation4 + $0x4] sm:$0xf]  ;;  %v732_v14 = vld [vmem:[#allocation6 + $0x30] sm:$0xff] }
  0x92   :  { %v587_v36 = vor.u32 %v710_v28, %v584_v29  ;;  %486 = vmatpush.bf16.msra.mxu2 %v732_v14  ;;  %v729_v28 = vld [vmem:[#allocation6 + $0x18] sm:$0xff] }
  0x93   :  { %328 = vmatpush.bf16.msra.mxu1 %v595_v27  ;;  %v737_v29 = vld [vmem:[#allocation6 + $0x58] sm:$0xff] }
  0x97   :  { %329 = vmatpush.bf16.msra.mxu1 %v587_v36  ;;  %v205_v36 = vld [vmem:[%s985_s4] sm:$0x3] }
  0xfc   :  { %v102_v56 = vpop.xlane.xlu2 %101  ;;  %v106_v57 = vpop.xlane.xlu0 %105 }
  0xfd   :  { %v109_v60 = vmul.f32 %v102_v56, %v925_v12  ;;  %v111_v61 = vmul.f32 %v106_v57, %v925_v12  ;;  %v789_v56 = vld [vmem:[%s982_s1] ss:$0 sm:$0xff] }
  0xff   :  { %v113_v63 = vadd.f32 1e-05, %v109_v60  ;;  %v115_v0 = vadd.f32 1e-05, %v111_v61 }
 0x101   :  { %794 = vrsqrt.f32 %v113_v63  ;;  %vm143_vm1 = vweird.f32 %v115_v0  ;;  %vm123_vm5 = vweird.f32 %v113_v63 }
 0x102   :  { %796 = vrsqrt.f32 %v115_v0 }
 0x104   :  { %v108_v15 = vpop.xlane.xlu1 %107  ;;  %v104_v16 = vpop.xlane.xlu2 %103 }
 0x105   :  { %v112_v23 = vmul.f32 %v108_v15, %v925_v12  ;;  %v110_v24 = vmul.f32 %v104_v16, %v925_v12  ;;  %v740_v15 = vld [vmem:[#allocation6 + $0x70] sm:$0xff] }
 0x106   :  { %505 = vmatpush.bf16.msra.mxu3 %v740_v15 }
 0x107   :  { %v795_v30 = vpop.eup %794  ;;  %v116_v31 = vadd.f32 1e-05, %v112_v23  ;;  %v114_v32 = vadd.f32 1e-05, %v110_v24  ;;  %v738_v23 = vld [vmem:[#allocation6 + $0x60] sm:$0xff] }
 0x108   :  { %v797_v34 = vpop.eup %796  ;;  %v118_v35 = vmul.f32 %v795_v30, %v113_v63  ;;  %vm124_vm3 = vweird.f32 %v795_v30  ;;  %v790_v63 = vld [vmem:[%s983_s2] ss:$0 sm:$0xff] }
 0x109   :  { %v138_v37 = vmul.f32 %v797_v34, %v115_v0  ;;  %798 = vrsqrt.f32 %v116_v31  ;;  %vm144_vm2 = vweird.f32 %v797_v34  ;;  %vm125_vm6 = vmor %vm123_vm5, %vm124_vm3  ;;  %vm153_vm7 = vweird.f32 %v116_v31 }
 0x10a   :  { %v119_v38 = vmul.f32 %v795_v30, %v118_v35  ;;  %800 = vrsqrt.f32 %v114_v32  ;;  %vm145_vm4 = vmor %vm143_vm1, %vm144_vm2  ;;  %vm133_vm11 = vweird.f32 %v114_v32  ;;  %506 = vmatpush.bf16.msra.mxu3 %v739_v22  ;;  %v734_v35 = vld [vmem:[#allocation6 + $0x40] sm:$0xff] }
 0x10b   :  { %v139_v39 = vmul.f32 %v797_v34, %v138_v37 }
 0x10c   :  { %v120_v40 = vmul.f32 0.5, %v119_v38 }
 0x10d   :  { %v140_v12 = vmul.f32 0.5, %v139_v39  ;;  %v207_v39 = vperm.slane %v205_v36, 0 }
 0x10e   :  { %v121_v41 = vsub.f32 1.5, %v120_v40  ;;  %507 = vmatpush.bf16.msra.mxu3 %v738_v23  ;;  %v208_v40 = vperm.slane %v205_v36, 1 }
 0x10f   :  { %v799_v42 = vpop.eup %798  ;;  %v141_v43 = vsub.f32 1.5, %v140_v12 }
 0x110   :  { %v801_v44 = vpop.eup %800  ;;  %v148_v45 = vmul.f32 %v799_v42, %v116_v31  ;;  %v122_v46 = vmul.f32 %v795_v30, %v121_v41  ;;  %vm154_vm8 = vweird.f32 %v799_v42  ;;  %v736_v31 = vld [vmem:[#allocation6 + $0x50] sm:$0xff] }
 0x111   :  { %v142_v47 = vmul.f32 %v797_v34, %v141_v43  ;;  %v128_v48 = vmul.f32 %v801_v44, %v114_v32  ;;  %vm155_vm9 = vmor %vm153_vm7, %vm154_vm8  ;;  %vm134_vm10 = vweird.f32 %v801_v44  ;;  %v727_v32 = vld [vmem:[#allocation6 + $0x8] sm:$0xff] }
 0x112   :  { %v149_v49 = vmul.f32 %v799_v42, %v148_v45  ;;  %v126_v53 = vsel %vm125_vm6, %v795_v30, %v122_v46  ;;  %vm135_vm12 = vmor %vm133_vm11, %vm134_vm10  ;;  %508 = vmatpush.bf16.msra.mxu3 %v737_v29  ;;  %v728_v30 = vld [vmem:[#allocation6 + $0x10] sm:$0xff] }
 0x113   :  { %v129_v50 = vmul.f32 %v801_v44, %v128_v48  ;;  %v146_v51 = vsel %vm145_vm4, %v797_v34, %v142_v47  ;;  %v157_v59 = vmul.f32 %v126_v53, %v933_v18  ;;  %v726_v34 = vld [vmem:[#allocation6] sm:$0xff] }
 0x114   :  { %v150_v52 = vmul.f32 0.5, %v149_v49  ;;  %v159_v57 = vmul.f32 %v146_v51, %v930_v17 }
 0x115   :  { %v130_v54 = vmul.f32 0.5, %v129_v50  ;;  %v165_v7 = vmul.f32 %v789_v56, %v157_v59 }
 0x116   :  { %v151_v55 = vsub.f32 1.5, %v150_v52  ;;  %v167_v0 = vmul.f32 %v789_v56, %v159_v57  ;;  %509 = vmatpush.bf16.msra.mxu3 %v736_v31 }
 0x117   :  { %v131_v58 = vsub.f32 1.5, %v130_v54  ;;  %v173_v16 = vadd.f32 %v790_v63, %v165_v7 }
 0x118   :  { %v152_v60 = vmul.f32 %v799_v42, %v151_v55  ;;  %v175_v11 = vadd.f32 %v790_v63, %v167_v0 }
 0x119   :  { %v132_v61 = vmul.f32 %v801_v44, %v131_v58 }
 0x11a   :  { %v156_v62 = vsel %vm155_vm9, %v799_v42, %v152_v60  ;;  %510 = vmatpush.bf16.msra.mxu3 %v735_v33 }
 0x11b   :  { %v160_v1 = vmul.f32 %v156_v62, %v942_v25  ;;  %v136_v6 = vsel %vm135_vm12, %v801_v44, %v132_v61  ;;  %v731_v25 = vld [vmem:[#allocation6 + $0x28] sm:$0xff] }
 0x11c   :  { %v158_v17 = vmul.f32 %v136_v6, %v945_v26  ;;  %487 = vmatpush.bf16.msra.mxu2 %v731_v25  ;;  %v730_v26 = vld [vmem:[#allocation6 + $0x20] sm:$0xff] }
 0x11d   :  { %v168_v8 = vmul.f32 %v789_v56, %v160_v1 }
 0x11e   :  { %v166_v18 = vmul.f32 %v789_v56, %v158_v17  ;;  %511 = vmatpush.bf16.msra.mxu3 %v734_v35 }
 0x11f   :  { %v176_v13 = vadd.f32 %v790_v63, %v168_v8  ;;  %v791_v8 = vld [vmem:[%s987_s6] ss:$0 sm:$0xff] }
 0x120   :  { %v174_v19 = vadd.f32 %v790_v63, %v166_v18  ;;  %488 = vmatpush.bf16.msra.mxu2 %v730_v26 }
 0x121   :  { %v758_v20 = vpack.c.bf16 %v176_v13, %v175_v11 }
 0x122   :  { %v753_v21 = vpack.c.bf16 %v174_v19, %v173_v16 }
 0x123   :  { %779 = vst [vmem:[#allocation3 + $0x8] sm:$0xff] %v758_v20  }
 0x124   :  { %754 = vst [vmem:[#allocation3] sm:$0xff] %v753_v21   ;;  %489 = vmatpush.bf16.msra.mxu2 %v729_v28 }
 0x128   :  { %490 = vmatpush.bf16.msra.mxu2 %v728_v30 }
 0x12a   :  { %v709_v27 = vld [vmem:[#allocation3 + $0x8] sm:$0xff] }
 0x12b   :  { %v708_v24 = vld [vmem:[#allocation3] sm:$0xff] }
 0x12c   :  { %311 = vmatmul.bf16.vlgmr.msra.gmra.mxu0 %v708_v24  ;;  %330 = vmatmul.bf16.vlgmr.msra.gmra.mxu1 %v708_v24 }
 0x12d   :  { %491 = vmatpush.bf16.msra.mxu2 %v727_v32 }
 0x131   :  { %492 = vmatpush.bf16.msra.mxu2 %v726_v34 }
 0x13c   :  { %316 = vmatmul.bf16.gmra.mxu0 %v709_v27  ;;  %335 = vmatmul.bf16.gmra.mxu1 %v709_v27 }
 0x1a9   :  { %v312_v37 = vpop.f32.mrf.mxu0  ;;  %v331_v38 = vpop.f32.mrf.mxu1 }
 0x1aa   :  { %v313_v12 = vadd.f32 %v312_v37, %v207_v39  ;;  %v332_v41 = vadd.f32 %v331_v38, %v208_v40 }
 0x1ac   :  { %v341_v46 = vmax.f32 %v313_v12, 0.0  ;;  %v342_v47 = vmax.f32 %v332_v41, 0.0 }
 0x1b1   :  { %v314_v42 = vpop.f32.mrf.mxu0  ;;  %v333_v43 = vpop.f32.mrf.mxu1 }
 0x1b2   :  { %v315_v44 = vadd.f32 %v314_v42, %v207_v39  ;;  %v334_v45 = vadd.f32 %v333_v43, %v208_v40 }
 0x1b4   :  { %v343_v48 = vmax.f32 %v315_v44, 0.0  ;;  %v344_v49 = vmax.f32 %v334_v45, 0.0 }
 0x1b6   :  { %v353_v50 = vpack.c.bf16 %v343_v48, %v341_v46  ;;  %v354_v51 = vpack.c.bf16 %v344_v49, %v342_v47 }
 0x1b8   :  { %493 = vmatmul.bf16.vlgmr.msra.gmra.mxu2 %v353_v50  ;;  %512 = vmatmul.bf16.vlgmr.msra.gmra.mxu3 %v354_v51 }
 0x1b9   :  { %v317_v52 = vpop.f32.mrf.mxu0  ;;  %v336_v53 = vpop.f32.mrf.mxu1 }
 0x1ba   :  { %v318_v54 = vadd.f32 %v317_v52, %v207_v39  ;;  %v337_v55 = vadd.f32 %v336_v53, %v208_v40 }
 0x1bc   :  { %v345_v60 = vmax.f32 %v318_v54, 0.0  ;;  %v346_v61 = vmax.f32 %v337_v55, 0.0 }
 0x1c1   :  { %v319_v56 = vpop.f32.mrf.mxu0  ;;  %v338_v57 = vpop.f32.mrf.mxu1 }
 0x1c2   :  { %v320_v58 = vadd.f32 %v319_v56, %v207_v39  ;;  %v339_v59 = vadd.f32 %v338_v57, %v208_v40 }
 0x1c4   :  { %v347_v62 = vmax.f32 %v320_v58, 0.0  ;;  %v348_v63 = vmax.f32 %v339_v59, 0.0 }
 0x1c6   :  { %v355_v0 = vpack.c.bf16 %v347_v62, %v345_v60  ;;  %v356_v1 = vpack.c.bf16 %v348_v63, %v346_v61 }
 0x1c8   :  { %498 = vmatmul.bf16.gmra.mxu2 %v355_v0  ;;  %517 = vmatmul.bf16.gmra.mxu3 %v356_v1 }
 0x23b   :  { %v494_v6 = vpop.f32.mrf.mxu2  ;;  %v513_v7 = vpop.f32.mrf.mxu3 }
 0x23c   :  { %v514_v17 = vadd.f32 %v513_v7, %v494_v6 }
 0x23e   :  { %v542_v18 = vadd.f32 %v791_v8, %v514_v17 }
 0x240   :  { %v554_v14 = vadd.f32 %v915_v3, %v542_v18 }
 0x243   :  { %v496_v9 = vpop.f32.mrf.mxu2  ;;  %v515_v10 = vpop.f32.mrf.mxu3 }
 0x244   :  { %v516_v11 = vadd.f32 %v515_v10, %v496_v9 }
 0x246   :  { %v543_v13 = vadd.f32 %v791_v8, %v516_v11 }
 0x248   :  { %v555_v15 = vadd.f32 %v921_v5, %v543_v13 }
 0x24a   :  { %v771_v16 = vpack.c.bf16 %v555_v15, %v554_v14 }
 0x24b   :  { %v499_v19 = vpop.f32.mrf.mxu2  ;;  %v518_v20 = vpop.f32.mrf.mxu3 }
 0x24c   :  { %772 = vst [vmem:[%s988_s7] sm:$0xff] %v771_v16   ;;  %v519_v21 = vadd.f32 %v518_v20, %v499_v19 }
 0x24e   :  { %v544_v26 = vadd.f32 %v791_v8, %v519_v21 }
 0x250   :  { %v556_v27 = vadd.f32 %v913_v2, %v544_v26 }
 0x253   :  { %v501_v25 = vpop.f32.mrf.mxu2  ;;  %v520_v22 = vpop.f32.mrf.mxu3 }
 0x254   :  { %v521_v23 = vadd.f32 %v520_v22, %v501_v25 }
 0x256   :  { %v545_v24 = vadd.f32 %v791_v8, %v521_v23 }
 0x258   :  { %v557_v28 = vadd.f32 %v919_v4, %v545_v24 }
 0x25a   :  { %v776_v3 = vpack.c.bf16 %v557_v28, %v556_v27 }
 0x25c   :  { %781 = vst [vmem:[%s988_s7 + $0x8] sm:$0xff] %v776_v3  }
 0x25d   :  { %570 = vsyncpa [#allocation5], 1 }
 0x25e   :  { %571 = vsyncpa [#allocation7], 1 }

</bundles_post_ra>
